<compile_context>
chip_gen: v5e
topology: v5e:2x2
jax: 0.10.0
libtpu: 0.0.40
codegen_flags: <defaults>
</compile_context>

<pallas_src>
import jax
import jax.numpy as jnp
from jax import lax
from jax.experimental import pallas as pl
from jax.experimental.pallas import tpu as pltpu


# ---------------------------------------------------------------------------
# helpers
# ---------------------------------------------------------------------------
def _round_up(x, m):
    return (x + m - 1) // m * m


def _pad_gate_cols(w, H, Hp):
    """(rows, 4H) -> (rows, 4Hp): zero-pad each of the i,f,g,o gate blocks."""
    rows = w.shape[0]
    w4 = w.reshape(rows, 4, H)
    w4 = jnp.pad(w4, ((0, 0), (0, 0), (0, Hp - H)))
    return w4.reshape(rows, 4 * Hp)


# ---------------------------------------------------------------------------
# Pallas kernel: one (direction, time-chunk) grid step of a bi-LSTM layer
# ---------------------------------------------------------------------------
def _bilstm_kernel(x_ref, wih_ref, whh_ref, b_ref, h0_ref, c0_ref,
                   y_ref, hT_ref, cT_ref, gx_ref, h_scr, c_scr):
    """Grid = (2, num_chunks): axis0 = direction ("parallel"),
    axis1 = time chunk ("arbitrary", sequential).  Backward direction's chunks
    arrive in reverse time order via the index_map, so the h/c scratch carry
    is always the correct running state.

    x_ref : (Tc*Bp, I)   f32   time-major rows (Bp batch rows per timestep)
    wih   : (I, 4*Hp)    bf16  pre-transposed, gate-padded
    whh   : (Hp, 4*Hp)   bf16
    b     : (1, 4*Hp)    f32   b_ih + b_hh, gate-padded
    h0/c0 : (Bp, Hp)     f32
    y     : (Tc*Bp, Hp)  f32
    hT/cT : (Bp, Hp)     f32
    PyTorch gate order: i, f, g, o.
    """
    d = pl.program_id(0)
    c = pl.program_id(1)
    Bp, Hp = h0_ref.shape
    Tc = x_ref.shape[0] // Bp

    @pl.when(c == 0)
    def _init():
        h_scr[...] = h0_ref[...]
        c_scr[...] = c0_ref[...]

    # Input projection hoisted out of the recurrence: one big MXU matmul/chunk.
    gx_ref[...] = (
        jnp.dot(x_ref[...].astype(jnp.bfloat16), wih_ref[...],
                preferred_element_type=jnp.float32)
        + b_ref[...])

    fwd = d == 0

    def step(i, carry):
        # forward walks the chunk ascending, backward descending
        t = jnp.where(fwd, i, Tc - 1 - i)
        row = pl.multiple_of(t * Bp, Bp)
        gates = gx_ref[pl.ds(row, Bp), :] + jnp.dot(
            h_scr[...].astype(jnp.bfloat16), whh_ref[...],
            preferred_element_type=jnp.float32)
        i_g = jax.nn.sigmoid(gates[:, 0 * Hp:1 * Hp])
        f_g = jax.nn.sigmoid(gates[:, 1 * Hp:2 * Hp])
        g_g = jnp.tanh(gates[:, 2 * Hp:3 * Hp])
        o_g = jax.nn.sigmoid(gates[:, 3 * Hp:4 * Hp])
        c_new = f_g * c_scr[...] + i_g * g_g
        h_new = o_g * jnp.tanh(c_new)
        c_scr[...] = c_new
        h_scr[...] = h_new
        y_ref[pl.ds(row, Bp), :] = h_new
        return carry

    unroll = True if Tc <= 16 else (8 if Tc % 8 == 0 else (4 if Tc % 4 == 0 else False))
    lax.fori_loop(0, Tc, step, 0, unroll=unroll)

    hT_ref[...] = h_scr[...]
    cT_ref[...] = c_scr[...]


def _bilstm_layer(x2, wih, whh, b, h0, c0, T, Bp, tc):
    """x2: (T*Bp, I) f32.  Returns y (2, T*Bp, Hp), hT, cT (2, Bp, Hp)."""
    I = x2.shape[1]
    Hp = h0.shape[-1]
    nc = T // tc

    def csel(d, c):
        # forward: c ; backward: nc-1-c   (reverse chunk order via index_map)
        return c + d * (nc - 1 - 2 * c)

    return pl.pallas_call(
        _bilstm_kernel,
        out_shape=(jax.ShapeDtypeStruct((2, T * Bp, Hp), jnp.float32),
                   jax.ShapeDtypeStruct((2, Bp, Hp), jnp.float32),
                   jax.ShapeDtypeStruct((2, Bp, Hp), jnp.float32)),
        grid_spec=pltpu.PrefetchScalarGridSpec(
            num_scalar_prefetch=0,
            grid=(2, nc),
            in_specs=[
                pl.BlockSpec((tc * Bp, I), lambda d, c: (csel(d, c), 0)),
                pl.BlockSpec((None, I, 4 * Hp), lambda d, c: (d, 0, 0)),
                pl.BlockSpec((None, Hp, 4 * Hp), lambda d, c: (d, 0, 0)),
                pl.BlockSpec((None, 1, 4 * Hp), lambda d, c: (d, 0, 0)),
                pl.BlockSpec((None, Bp, Hp), lambda d, c: (d, 0, 0)),
                pl.BlockSpec((None, Bp, Hp), lambda d, c: (d, 0, 0)),
            ],
            out_specs=(
                pl.BlockSpec((None, tc * Bp, Hp), lambda d, c: (d, csel(d, c), 0)),
                pl.BlockSpec((None, Bp, Hp), lambda d, c: (d, 0, 0)),
                pl.BlockSpec((None, Bp, Hp), lambda d, c: (d, 0, 0)),
            ),
            scratch_shapes=[
                pltpu.VMEM((tc * Bp, 4 * Hp), jnp.float32),   # chunk gate pre-acts
                pltpu.VMEM((Bp, Hp), jnp.float32),            # h carry
                pltpu.VMEM((Bp, Hp), jnp.float32),            # c carry
            ],
        ),
        compiler_params=pltpu.CompilerParams(
            dimension_semantics=("parallel", "arbitrary"),
            vmem_limit_bytes=32 * 1024 * 1024),
    )(x2, wih, whh, b, h0, c0)


# ---------------------------------------------------------------------------
# Model wrapper
# ---------------------------------------------------------------------------
class LSTMPallas:
    """Pallas port of loganaliser.model.LSTM (bidirectional, batch_first)."""

    SUBLANE = 8
    LANE = 128

    def __init__(self, n_input, n_hidden_units, n_layers, n_output, mode,
                 dropout=0.1, key=None, time_chunk_bytes=2 << 20):
        assert n_hidden_units % 2 == 0
        self.n_input = n_input
        self.n_hidden_units = n_hidden_units
        self.n_layers = n_layers
        self.n_output = n_output
        self.mode = mode
        self.dropout = dropout
        self.time_chunk_bytes = time_chunk_bytes

        H = n_hidden_units // 2
        Hp = _round_up(H, self.LANE)
        self.H, self.Hp = H, Hp

        if key is None:
            key = jax.random.PRNGKey(0)
        bound = float(1.0 / (H ** 0.5))

        # Per layer: direction-stacked, pre-transposed, gate-padded bf16 weights
        # (done ONCE here instead of per forward call).
        self.wih = []   # (2, in_size, 4*Hp) bf16
        self.whh = []   # (2, Hp,      4*Hp) bf16
        self.bias = []  # (2, 1,       4*Hp) f32  (= b_ih + b_hh)
        k = key
        for layer in range(n_layers):
            in_size = n_input if layer == 0 else n_hidden_units
            wihs, whhs, bs = [], [], []
            for _direction in range(2):
                k, k1, k2, k3, k4 = jax.random.split(k, 5)
                w_ih = jax.random.uniform(k1, (4 * H, in_size), jnp.float32, -bound, bound)
                w_hh = jax.random.uniform(k2, (4 * H, H), jnp.float32, -bound, bound)
                b_ih = jax.random.uniform(k3, (4 * H,), jnp.float32, -bound, bound)
                b_hh = jax.random.uniform(k4, (4 * H,), jnp.float32, -bound, bound)
                wih_p = _pad_gate_cols(w_ih.T, H, Hp).astype(jnp.bfloat16)
                whh_p = jnp.pad(_pad_gate_cols(w_hh.T, H, Hp),
                                ((0, Hp - H), (0, 0))).astype(jnp.bfloat16)
                b_p = _pad_gate_cols((b_ih + b_hh).reshape(1, 4 * H), H, Hp)
                wihs.append(wih_p)
                whhs.append(whh_p)
                bs.append(b_p)
            self.wih.append(jnp.stack(wihs))
            self.whh.append(jnp.stack(whhs))
            self.bias.append(jnp.stack(bs))

        # decoder: init_weights() -> bias zero, weight uniform(-0.1, 0.1);
        # stored pre-transposed.  Runs in plain XLA (too small for a pallas_call).
        k, kd = jax.random.split(k)
        self.dec_w_t = jax.random.uniform(
            kd, (n_output, n_hidden_units), jnp.float32, -0.1, 0.1).T
        self.dec_b = jnp.zeros((n_output,), jnp.float32)

    def init_hidden(self, bsz):
        shape = (2 * self.n_layers, bsz, self.H)
        return (jnp.zeros(shape, jnp.float32), jnp.zeros(shape, jnp.float32))

    def _time_chunk(self, T, Bp):
        per_step = Bp * 4 * self.Hp * 4          # f32 gate-scratch bytes / timestep
        tc = max(1, min(T, self.time_chunk_bytes // per_step))
        while T % tc:
            tc -= 1
        return tc

    def __call__(self, x, hidden):
        # TODO(synk): nn.Dropout(p=0.1) on input/output and inter-layer dropout(0.5)
        # are train-time stochastic; eval-mode (identity) semantics used here.
        h0, c0 = hidden
        B, T, _ = x.shape
        H, Hp = self.H, self.Hp
        Bp = _round_up(B, self.SUBLANE)
        tc = self._time_chunk(T, Bp)

        # one transpose to time-major, shared by every layer and both directions
        x_t = jnp.transpose(x.astype(jnp.float32), (1, 0, 2))      # (T, B, I)
        x_t = jnp.pad(x_t, ((0, 0), (0, Bp - B), (0, 0)))          # (T, Bp, I)
        layer_in = x_t.reshape(T * Bp, self.n_input)

        h0p = jnp.pad(h0.astype(jnp.float32), ((0, 0), (0, Bp - B), (0, Hp - H)))
        c0p = jnp.pad(c0.astype(jnp.float32), ((0, 0), (0, Bp - B), (0, Hp - H)))

        h_fin, c_fin = [], []
        for layer in range(self.n_layers):
            y, hT, cT = _bilstm_layer(
                layer_in, self.wih[layer], self.whh[layer], self.bias[layer],
                h0p[2 * layer:2 * layer + 2], c0p[2 * layer:2 * layer + 2],
                T, Bp, tc)
            h_fin.append(hT)
            c_fin.append(cT)
            y = y.reshape(2, T, Bp, Hp)
            nxt = jnp.concatenate([y[0, :, :, :H], y[1, :, :, :H]], axis=-1)  # (T,Bp,2H)
            layer_in = nxt.reshape(T * Bp, 2 * H)

        # decoder on output[:, -1, :] (fwd & bwd halves are both stored at t=T-1)
        last = layer_in.reshape(T, Bp, 2 * H)[T - 1, :B, :]
        decoded = last @ self.dec_w_t + self.dec_b
        if self.mode == "multiclass":
            decoded = jax.nn.log_softmax(decoded, axis=1)

        h_n = jnp.concatenate(h_fin, axis=0)[:, :B, :H]
        c_n = jnp.concatenate(c_fin, axis=0)[:, :B, :H]
        return decoded, (h_n, c_n)


# ---------------------------------------------------------------------------
# Demo
# ---------------------------------------------------------------------------
if __name__ == "__main__":
    key = jax.random.PRNGKey(0)
    k_model, k_x = jax.random.split(key)

    B, T = 2, 8
    n_input, n_hidden, n_layers, n_output = 16, 32, 2, 8

    model = LSTMPallas(n_input, n_hidden, n_layers, n_output,
                       mode="multiclass", dropout=0.1, key=k_model)
    x = jax.random.normal(k_x, (B, T, n_input), jnp.float32)
    hidden = model.init_hidden(B)

    decoded, (h_n, c_n) = model(x, hidden)
    jax.block_until_ready((decoded, h_n, c_n))

    assert decoded.shape == (B, n_output)
    assert h_n.shape == (2 * n_layers, B, n_hidden // 2)
    assert c_n.shape == (2 * n_layers, B, n_hidden // 2)
    # multiclass: rows of log_softmax should exponentiate-sum to ~1
    assert jnp.allclose(jnp.sum(jnp.exp(decoded), axis=1), 1.0, atol=1e-4)
    assert jnp.all(jnp.isfinite(decoded))
    print("KERNEL_OK")
</pallas_src>

<mosaic_0001>
module attributes {stable_mosaic.version = 11 : i64} {
  func.func @_bilstm_kernel(%arg0: i32, %arg1: i32, %arg2: memref<64x16xf32, #tpu.memory_space<vmem>>, %arg3: memref<1x16x512xbf16, #tpu.memory_space<vmem>>, %arg4: memref<1x128x512xbf16, #tpu.memory_space<vmem>>, %arg5: memref<1x1x512xf32, #tpu.memory_space<vmem>>, %arg6: memref<1x8x128xf32, #tpu.memory_space<vmem>>, %arg7: memref<1x8x128xf32, #tpu.memory_space<vmem>>, %arg8: memref<1x64x128xf32, #tpu.memory_space<vmem>>, %arg9: memref<1x8x128xf32, #tpu.memory_space<vmem>>, %arg10: memref<1x8x128xf32, #tpu.memory_space<vmem>>, %arg11: memref<64x512xf32, #tpu.memory_space<vmem>>, %arg12: memref<8x128xf32, #tpu.memory_space<vmem>>, %arg13: memref<8x128xf32, #tpu.memory_space<vmem>>) attributes {dimension_semantics = [#tpu.dimension_semantics<parallel>, #tpu.dimension_semantics<arbitrary>], iteration_bounds = array<i64: 2, 1>, scalar_prefetch = 0 : i64, scratch_operands = 3 : i64, tpu.core_type = #tpu.core_type<tc>, window_params = [{transform_indices = @transform_0, window_bounds = array<i64: 64, 16>}, {transform_indices = @transform_1, window_bounds = array<i64: 1, 16, 512>}, {transform_indices = @transform_2, window_bounds = array<i64: 1, 128, 512>}, {transform_indices = @transform_3, window_bounds = array<i64: 1, 1, 512>}, {transform_indices = @transform_4, window_bounds = array<i64: 1, 8, 128>}, {transform_indices = @transform_5, window_bounds = array<i64: 1, 8, 128>}, {transform_indices = @transform_6, window_bounds = array<i64: 1, 64, 128>}, {transform_indices = @transform_7, window_bounds = array<i64: 1, 8, 128>}, {transform_indices = @transform_8, window_bounds = array<i64: 1, 8, 128>}]} {
    %c0_i32 = arith.constant 0 : i32
    %0 = arith.cmpi eq, %arg1, %c0_i32 : i32
    %1 = arith.extui %0 : i1 to i32
    %c0_i32_0 = arith.constant 0 : i32
    %2 = arith.cmpi ne, %1, %c0_i32_0 : i32
    scf.if %2 {
      %c0_182 = arith.constant 0 : index
      %c0_183 = arith.constant 0 : index
      %c0_184 = arith.constant 0 : index
      %374 = vector.load %arg6[%c0_182, %c0_183, %c0_184] : memref<1x8x128xf32, #tpu.memory_space<vmem>>, vector<1x8x128xf32>
      %375 = vector.shape_cast %374 : vector<1x8x128xf32> to vector<8x128xf32>
      %c0_185 = arith.constant 0 : index
      %c0_186 = arith.constant 0 : index
      %376 = vector.load %arg12[%c0_185, %c0_186] : memref<8x128xf32, #tpu.memory_space<vmem>>, vector<8x128xf32>
      tpu.vector_store %arg12[%c0_185, %c0_186], %375 {strides = array<i32>} : memref<8x128xf32, #tpu.memory_space<vmem>>, vector<8x128xf32>,
      %c0_187 = arith.constant 0 : index
      %c0_188 = arith.constant 0 : index
      %c0_189 = arith.constant 0 : index
      %377 = vector.load %arg7[%c0_187, %c0_188, %c0_189] : memref<1x8x128xf32, #tpu.memory_space<vmem>>, vector<1x8x128xf32>
      %378 = vector.shape_cast %377 : vector<1x8x128xf32> to vector<8x128xf32>
      %c0_190 = arith.constant 0 : index
      %c0_191 = arith.constant 0 : index
      %379 = vector.load %arg13[%c0_190, %c0_191] : memref<8x128xf32, #tpu.memory_space<vmem>>, vector<8x128xf32>
      tpu.vector_store %arg13[%c0_190, %c0_191], %378 {strides = array<i32>} : memref<8x128xf32, #tpu.memory_space<vmem>>, vector<8x128xf32>,
    } else {
    }
    %c0 = arith.constant 0 : index
    %c0_1 = arith.constant 0 : index
    %3 = vector.load %arg2[%c0, %c0_1] : memref<64x16xf32, #tpu.memory_space<vmem>>, vector<64x16xf32>
    %4 = arith.truncf %3 : vector<64x16xf32> to vector<64x16xbf16>
    %c0_2 = arith.constant 0 : index
    %c0_3 = arith.constant 0 : index
    %c0_4 = arith.constant 0 : index
    %5 = vector.load %arg3[%c0_2, %c0_3, %c0_4] : memref<1x16x512xbf16, #tpu.memory_space<vmem>>, vector<1x16x512xbf16>
    %6 = vector.shape_cast %5 : vector<1x16x512xbf16> to vector<16x512xbf16>
    %cst = arith.constant dense<0.000000e+00> : vector<64x512xf32>
    %7 = tpu.matmul %4, %6, %cst {dimension_numbers = #tpu.dot_dimension_numbers<[1], [0], [0], [1], [0, 0, 1, 1], [], []>} : vector<64x16xbf16>, vector<16x512xbf16>, vector<64x512xf32> -> vector<64x512xf32>
    %c0_5 = arith.constant 0 : index
    %c0_6 = arith.constant 0 : index
    %c0_7 = arith.constant 0 : index
    %8 = vector.load %arg5[%c0_5, %c0_6, %c0_7] : memref<1x1x512xf32, #tpu.memory_space<vmem>>, vector<1x1x512xf32>
    %9 = vector.shape_cast %8 : vector<1x1x512xf32> to vector<1x512xf32>
    %10 = vector.broadcast %9 : vector<1x512xf32> to vector<64x512xf32>
    %11 = arith.addf %7, %10 : vector<64x512xf32>
    %c0_8 = arith.constant 0 : index
    %c0_9 = arith.constant 0 : index
    %12 = vector.load %arg11[%c0_8, %c0_9] : memref<64x512xf32, #tpu.memory_space<vmem>>, vector<64x512xf32>
    tpu.vector_store %arg11[%c0_8, %c0_9], %11 {strides = array<i32>} : memref<64x512xf32, #tpu.memory_space<vmem>>, vector<64x512xf32>,
    %c0_i32_10 = arith.constant 0 : i32
    %13 = arith.cmpi eq, %arg0, %c0_i32_10 : i32
    %c0_i32_11 = arith.constant 0 : i32
    %c7_i32 = arith.constant 7 : i32
    %14 = arith.subi %c7_i32, %c0_i32_11 : i32
    %15 = arith.select %13, %c0_i32_11, %14 : i32
    %c8_i32 = arith.constant 8 : i32
    %16 = arith.muli %15, %c8_i32 : i32
    %17 = tpu.assume_multiple %16, 8 : i32
    %18 = arith.index_cast %17 : i32 to index
    %c0_12 = arith.constant 0 : index
    %19 = vector.load %arg11[%18, %c0_12] : memref<64x512xf32, #tpu.memory_space<vmem>>, vector<8x512xf32>
    %c0_13 = arith.constant 0 : index
    %c0_14 = arith.constant 0 : index
    %20 = vector.load %arg12[%c0_13, %c0_14] : memref<8x128xf32, #tpu.memory_space<vmem>>, vector<8x128xf32>
    %21 = arith.truncf %20 : vector<8x128xf32> to vector<8x128xbf16>
    %c0_15 = arith.constant 0 : index
    %c0_16 = arith.constant 0 : index
    %c0_17 = arith.constant 0 : index
    %22 = vector.load %arg4[%c0_15, %c0_16, %c0_17] : memref<1x128x512xbf16, #tpu.memory_space<vmem>>, vector<1x128x512xbf16>
    %23 = vector.shape_cast %22 : vector<1x128x512xbf16> to vector<128x512xbf16>
    %cst_18 = arith.constant dense<0.000000e+00> : vector<8x512xf32>
    %24 = tpu.matmul %21, %23, %cst_18 {dimension_numbers = #tpu.dot_dimension_numbers<[1], [0], [0], [1], [0, 0, 1, 1], [], []>} : vector<8x128xbf16>, vector<128x512xbf16>, vector<8x512xf32> -> vector<8x512xf32>
    %25 = arith.addf %19, %24 : vector<8x512xf32>
    %26 = vector.extract_strided_slice %25 {offsets = [0, 0], sizes = [8, 128], strides = [1, 1]} : vector<8x512xf32> to vector<8x128xf32>
    %27 = arith.negf %26 : vector<8x128xf32>
    %28 = math.exp %27 : vector<8x128xf32>
    %cst_19 = arith.constant 1.000000e+00 : f32
    %29 = vector.broadcast %cst_19 : f32 to vector<8x128xf32>
    %30 = arith.addf %29, %28 : vector<8x128xf32>
    %31 = arith.divf %29, %30 : vector<8x128xf32>
    %32 = vector.extract_strided_slice %25 {offsets = [0, 128], sizes = [8, 128], strides = [1, 1]} : vector<8x512xf32> to vector<8x128xf32>
    %33 = arith.negf %32 : vector<8x128xf32>
    %34 = math.exp %33 : vector<8x128xf32>
    %cst_20 = arith.constant 1.000000e+00 : f32
    %35 = vector.broadcast %cst_20 : f32 to vector<8x128xf32>
    %36 = arith.addf %35, %34 : vector<8x128xf32>
    %37 = arith.divf %35, %36 : vector<8x128xf32>
    %38 = vector.extract_strided_slice %25 {offsets = [0, 256], sizes = [8, 128], strides = [1, 1]} : vector<8x512xf32> to vector<8x128xf32>
    %39 = math.tanh %38 : vector<8x128xf32>
    %40 = vector.extract_strided_slice %25 {offsets = [0, 384], sizes = [8, 128], strides = [1, 1]} : vector<8x512xf32> to vector<8x128xf32>
    %41 = arith.negf %40 : vector<8x128xf32>
    %42 = math.exp %41 : vector<8x128xf32>
    %cst_21 = arith.constant 1.000000e+00 : f32
    %43 = vector.broadcast %cst_21 : f32 to vector<8x128xf32>
    %44 = arith.addf %43, %42 : vector<8x128xf32>
    %45 = arith.divf %43, %44 : vector<8x128xf32>
    %c0_22 = arith.constant 0 : index
    %c0_23 = arith.constant 0 : index
    %46 = vector.load %arg13[%c0_22, %c0_23] : memref<8x128xf32, #tpu.memory_space<vmem>>, vector<8x128xf32>
    %47 = arith.mulf %37, %46 : vector<8x128xf32>
    %48 = arith.mulf %31, %39 : vector<8x128xf32>
    %49 = arith.addf %47, %48 : vector<8x128xf32>
    %50 = math.tanh %49 : vector<8x128xf32>
    %51 = arith.mulf %45, %50 : vector<8x128xf32>
    %c0_24 = arith.constant 0 : index
    %c0_25 = arith.constant 0 : index
    %52 = vector.load %arg13[%c0_24, %c0_25] : memref<8x128xf32, #tpu.memory_space<vmem>>, vector<8x128xf32>
    tpu.vector_store %arg13[%c0_24, %c0_25], %49 {strides = array<i32>} : memref<8x128xf32, #tpu.memory_space<vmem>>, vector<8x128xf32>,
    %c0_26 = arith.constant 0 : index
    %c0_27 = arith.constant 0 : index
    %53 = vector.load %arg12[%c0_26, %c0_27] : memref<8x128xf32, #tpu.memory_space<vmem>>, vector<8x128xf32>
    tpu.vector_store %arg12[%c0_26, %c0_27], %51 {strides = array<i32>} : memref<8x128xf32, #tpu.memory_space<vmem>>, vector<8x128xf32>,
    %c0_28 = arith.constant 0 : index
    %54 = arith.index_cast %17 : i32 to index
    %c0_29 = arith.constant 0 : index
    %55 = vector.load %arg8[%c0_28, %54, %c0_29] : memref<1x64x128xf32, #tpu.memory_space<vmem>>, vector<1x8x128xf32>
    %56 = vector.shape_cast %55 : vector<1x8x128xf32> to vector<8x128xf32>
    %57 = vector.shape_cast %51 : vector<8x128xf32> to vector<1x8x128xf32>
    tpu.vector_store %arg8[%c0_28, %54, %c0_29], %57 {strides = array<i32>} : memref<1x64x128xf32, #tpu.memory_space<vmem>>, vector<1x8x128xf32>,
    %c1_i32 = arith.constant 1 : i32
    %c7_i32_30 = arith.constant 7 : i32
    %58 = arith.subi %c7_i32_30, %c1_i32 : i32
    %59 = arith.select %13, %c1_i32, %58 : i32
    %c8_i32_31 = arith.constant 8 : i32
    %60 = arith.muli %59, %c8_i32_31 : i32
    %61 = tpu.assume_multiple %60, 8 : i32
    %62 = arith.index_cast %61 : i32 to index
    %c0_32 = arith.constant 0 : index
    %63 = vector.load %arg11[%62, %c0_32] : memref<64x512xf32, #tpu.memory_space<vmem>>, vector<8x512xf32>
    %c0_33 = arith.constant 0 : index
    %c0_34 = arith.constant 0 : index
    %64 = vector.load %arg12[%c0_33, %c0_34] : memref<8x128xf32, #tpu.memory_space<vmem>>, vector<8x128xf32>
    %65 = arith.truncf %64 : vector<8x128xf32> to vector<8x128xbf16>
    %c0_35 = arith.constant 0 : index
    %c0_36 = arith.constant 0 : index
    %c0_37 = arith.constant 0 : index
    %66 = vector.load %arg4[%c0_35, %c0_36, %c0_37] : memref<1x128x512xbf16, #tpu.memory_space<vmem>>, vector<1x128x512xbf16>
    %67 = vector.shape_cast %66 : vector<1x128x512xbf16> to vector<128x512xbf16>
    %cst_38 = arith.constant dense<0.000000e+00> : vector<8x512xf32>
    %68 = tpu.matmul %65, %67, %cst_38 {dimension_numbers = #tpu.dot_dimension_numbers<[1], [0], [0], [1], [0, 0, 1, 1], [], []>} : vector<8x128xbf16>, vector<128x512xbf16>, vector<8x512xf32> -> vector<8x512xf32>
    %69 = arith.addf %63, %68 : vector<8x512xf32>
    %70 = vector.extract_strided_slice %69 {offsets = [0, 0], sizes = [8, 128], strides = [1, 1]} : vector<8x512xf32> to vector<8x128xf32>
    %71 = arith.negf %70 : vector<8x128xf32>
    %72 = math.exp %71 : vector<8x128xf32>
    %cst_39 = arith.constant 1.000000e+00 : f32
    %73 = vector.broadcast %cst_39 : f32 to vector<8x128xf32>
    %74 = arith.addf %73, %72 : vector<8x128xf32>
    %75 = arith.divf %73, %74 : vector<8x128xf32>
    %76 = vector.extract_strided_slice %69 {offsets = [0, 128], sizes = [8, 128], strides = [1, 1]} : vector<8x512xf32> to vector<8x128xf32>
    %77 = arith.negf %76 : vector<8x128xf32>
    %78 = math.exp %77 : vector<8x128xf32>
    %cst_40 = arith.constant 1.000000e+00 : f32
    %79 = vector.broadcast %cst_40 : f32 to vector<8x128xf32>
    %80 = arith.addf %79, %78 : vector<8x128xf32>
    %81 = arith.divf %79, %80 : vector<8x128xf32>
    %82 = vector.extract_strided_slice %69 {offsets = [0, 256], sizes = [8, 128], strides = [1, 1]} : vector<8x512xf32> to vector<8x128xf32>
    %83 = math.tanh %82 : vector<8x128xf32>
    %84 = vector.extract_strided_slice %69 {offsets = [0, 384], sizes = [8, 128], strides = [1, 1]} : vector<8x512xf32> to vector<8x128xf32>
    %85 = arith.negf %84 : vector<8x128xf32>
    %86 = math.exp %85 : vector<8x128xf32>
    %cst_41 = arith.constant 1.000000e+00 : f32
    %87 = vector.broadcast %cst_41 : f32 to vector<8x128xf32>
    %88 = arith.addf %87, %86 : vector<8x128xf32>
    %89 = arith.divf %87, %88 : vector<8x128xf32>
    %c0_42 = arith.constant 0 : index
    %c0_43 = arith.constant 0 : index
    %90 = vector.load %arg13[%c0_42, %c0_43] : memref<8x128xf32, #tpu.memory_space<vmem>>, vector<8x128xf32>
    %91 = arith.mulf %81, %90 : vector<8x128xf32>
    %92 = arith.mulf %75, %83 : vector<8x128xf32>
    %93 = arith.addf %91, %92 : vector<8x128xf32>
    %94 = math.tanh %93 : vector<8x128xf32>
    %95 = arith.mulf %89, %94 : vector<8x128xf32>
    %c0_44 = arith.constant 0 : index
    %c0_45 = arith.constant 0 : index
    %96 = vector.load %arg13[%c0_44, %c0_45] : memref<8x128xf32, #tpu.memory_space<vmem>>, vector<8x128xf32>
    tpu.vector_store %arg13[%c0_44, %c0_45], %93 {strides = array<i32>} : memref<8x128xf32, #tpu.memory_space<vmem>>, vector<8x128xf32>,
    %c0_46 = arith.constant 0 : index
    %c0_47 = arith.constant 0 : index
    %97 = vector.load %arg12[%c0_46, %c0_47] : memref<8x128xf32, #tpu.memory_space<vmem>>, vector<8x128xf32>
    tpu.vector_store %arg12[%c0_46, %c0_47], %95 {strides = array<i32>} : memref<8x128xf32, #tpu.memory_space<vmem>>, vector<8x128xf32>,
    %c0_48 = arith.constant 0 : index
    %98 = arith.index_cast %61 : i32 to index
    %c0_49 = arith.constant 0 : index
    %99 = vector.load %arg8[%c0_48, %98, %c0_49] : memref<1x64x128xf32, #tpu.memory_space<vmem>>, vector<1x8x128xf32>
    %100 = vector.shape_cast %99 : vector<1x8x128xf32> to vector<8x128xf32>
    %101 = vector.shape_cast %95 : vector<8x128xf32> to vector<1x8x128xf32>
    tpu.vector_store %arg8[%c0_48, %98, %c0_49], %101 {strides = array<i32>} : memref<1x64x128xf32, #tpu.memory_space<vmem>>, vector<1x8x128xf32>,
    %c2_i32 = arith.constant 2 : i32
    %c7_i32_50 = arith.constant 7 : i32
    %102 = arith.subi %c7_i32_50, %c2_i32 : i32
    %103 = arith.select %13, %c2_i32, %102 : i32
    %c8_i32_51 = arith.constant 8 : i32
    %104 = arith.muli %103, %c8_i32_51 : i32
    %105 = tpu.assume_multiple %104, 8 : i32
    %106 = arith.index_cast %105 : i32 to index
    %c0_52 = arith.constant 0 : index
    %107 = vector.load %arg11[%106, %c0_52] : memref<64x512xf32, #tpu.memory_space<vmem>>, vector<8x512xf32>
    %c0_53 = arith.constant 0 : index
    %c0_54 = arith.constant 0 : index
    %108 = vector.load %arg12[%c0_53, %c0_54] : memref<8x128xf32, #tpu.memory_space<vmem>>, vector<8x128xf32>
    %109 = arith.truncf %108 : vector<8x128xf32> to vector<8x128xbf16>
    %c0_55 = arith.constant 0 : index
    %c0_56 = arith.constant 0 : index
    %c0_57 = arith.constant 0 : index
    %110 = vector.load %arg4[%c0_55, %c0_56, %c0_57] : memref<1x128x512xbf16, #tpu.memory_space<vmem>>, vector<1x128x512xbf16>
    %111 = vector.shape_cast %110 : vector<1x128x512xbf16> to vector<128x512xbf16>
    %cst_58 = arith.constant dense<0.000000e+00> : vector<8x512xf32>
    %112 = tpu.matmul %109, %111, %cst_58 {dimension_numbers = #tpu.dot_dimension_numbers<[1], [0], [0], [1], [0, 0, 1, 1], [], []>} : vector<8x128xbf16>, vector<128x512xbf16>, vector<8x512xf32> -> vector<8x512xf32>
    %113 = arith.addf %107, %112 : vector<8x512xf32>
    %114 = vector.extract_strided_slice %113 {offsets = [0, 0], sizes = [8, 128], strides = [1, 1]} : vector<8x512xf32> to vector<8x128xf32>
    %115 = arith.negf %114 : vector<8x128xf32>
    %116 = math.exp %115 : vector<8x128xf32>
    %cst_59 = arith.constant 1.000000e+00 : f32
    %117 = vector.broadcast %cst_59 : f32 to vector<8x128xf32>
    %118 = arith.addf %117, %116 : vector<8x128xf32>
    %119 = arith.divf %117, %118 : vector<8x128xf32>
    %120 = vector.extract_strided_slice %113 {offsets = [0, 128], sizes = [8, 128], strides = [1, 1]} : vector<8x512xf32> to vector<8x128xf32>
    %121 = arith.negf %120 : vector<8x128xf32>
    %122 = math.exp %121 : vector<8x128xf32>
    %cst_60 = arith.constant 1.000000e+00 : f32
    %123 = vector.broadcast %cst_60 : f32 to vector<8x128xf32>
    %124 = arith.addf %123, %122 : vector<8x128xf32>
    %125 = arith.divf %123, %124 : vector<8x128xf32>
    %126 = vector.extract_strided_slice %113 {offsets = [0, 256], sizes = [8, 128], strides = [1, 1]} : vector<8x512xf32> to vector<8x128xf32>
    %127 = math.tanh %126 : vector<8x128xf32>
    %128 = vector.extract_strided_slice %113 {offsets = [0, 384], sizes = [8, 128], strides = [1, 1]} : vector<8x512xf32> to vector<8x128xf32>
    %129 = arith.negf %128 : vector<8x128xf32>
    %130 = math.exp %129 : vector<8x128xf32>
    %cst_61 = arith.constant 1.000000e+00 : f32
    %131 = vector.broadcast %cst_61 : f32 to vector<8x128xf32>
    %132 = arith.addf %131, %130 : vector<8x128xf32>
    %133 = arith.divf %131, %132 : vector<8x128xf32>
    %c0_62 = arith.constant 0 : index
    %c0_63 = arith.constant 0 : index
    %134 = vector.load %arg13[%c0_62, %c0_63] : memref<8x128xf32, #tpu.memory_space<vmem>>, vector<8x128xf32>
    %135 = arith.mulf %125, %134 : vector<8x128xf32>
    %136 = arith.mulf %119, %127 : vector<8x128xf32>
    %137 = arith.addf %135, %136 : vector<8x128xf32>
    %138 = math.tanh %137 : vector<8x128xf32>
    %139 = arith.mulf %133, %138 : vector<8x128xf32>
    %c0_64 = arith.constant 0 : index
    %c0_65 = arith.constant 0 : index
    %140 = vector.load %arg13[%c0_64, %c0_65] : memref<8x128xf32, #tpu.memory_space<vmem>>, vector<8x128xf32>
    tpu.vector_store %arg13[%c0_64, %c0_65], %137 {strides = array<i32>} : memref<8x128xf32, #tpu.memory_space<vmem>>, vector<8x128xf32>,
    %c0_66 = arith.constant 0 : index
    %c0_67 = arith.constant 0 : index
    %141 = vector.load %arg12[%c0_66, %c0_67] : memref<8x128xf32, #tpu.memory_space<vmem>>, vector<8x128xf32>
    tpu.vector_store %arg12[%c0_66, %c0_67], %139 {strides = array<i32>} : memref<8x128xf32, #tpu.memory_space<vmem>>, vector<8x128xf32>,
    %c0_68 = arith.constant 0 : index
    %142 = arith.index_cast %105 : i32 to index
    %c0_69 = arith.constant 0 : index
    %143 = vector.load %arg8[%c0_68, %142, %c0_69] : memref<1x64x128xf32, #tpu.memory_space<vmem>>, vector<1x8x128xf32>
    %144 = vector.shape_cast %143 : vector<1x8x128xf32> to vector<8x128xf32>
    %145 = vector.shape_cast %139 : vector<8x128xf32> to vector<1x8x128xf32>
    tpu.vector_store %arg8[%c0_68, %142, %c0_69], %145 {strides = array<i32>} : memref<1x64x128xf32, #tpu.memory_space<vmem>>, vector<1x8x128xf32>,
    %c3_i32 = arith.constant 3 : i32
    %c7_i32_70 = arith.constant 7 : i32
    %146 = arith.subi %c7_i32_70, %c3_i32 : i32
    %147 = arith.select %13, %c3_i32, %146 : i32
    %c8_i32_71 = arith.constant 8 : i32
    %148 = arith.muli %147, %c8_i32_71 : i32
    %149 = tpu.assume_multiple %148, 8 : i32
    %150 = arith.index_cast %149 : i32 to index
    %c0_72 = arith.constant 0 : index
    %151 = vector.load %arg11[%150, %c0_72] : memref<64x512xf32, #tpu.memory_space<vmem>>, vector<8x512xf32>
    %c0_73 = arith.constant 0 : index
    %c0_74 = arith.constant 0 : index
    %152 = vector.load %arg12[%c0_73, %c0_74] : memref<8x128xf32, #tpu.memory_space<vmem>>, vector<8x128xf32>
    %153 = arith.truncf %152 : vector<8x128xf32> to vector<8x128xbf16>
    %c0_75 = arith.constant 0 : index
    %c0_76 = arith.constant 0 : index
    %c0_77 = arith.constant 0 : index
    %154 = vector.load %arg4[%c0_75, %c0_76, %c0_77] : memref<1x128x512xbf16, #tpu.memory_space<vmem>>, vector<1x128x512xbf16>
    %155 = vector.shape_cast %154 : vector<1x128x512xbf16> to vector<128x512xbf16>
    %cst_78 = arith.constant dense<0.000000e+00> : vector<8x512xf32>
    %156 = tpu.matmul %153, %155, %cst_78 {dimension_numbers = #tpu.dot_dimension_numbers<[1], [0], [0], [1], [0, 0, 1, 1], [], []>} : vector<8x128xbf16>, vector<128x512xbf16>, vector<8x512xf32> -> vector<8x512xf32>
    %157 = arith.addf %151, %156 : vector<8x512xf32>
    %158 = vector.extract_strided_slice %157 {offsets = [0, 0], sizes = [8, 128], strides = [1, 1]} : vector<8x512xf32> to vector<8x128xf32>
    %159 = arith.negf %158 : vector<8x128xf32>
    %160 = math.exp %159 : vector<8x128xf32>
    %cst_79 = arith.constant 1.000000e+00 : f32
    %161 = vector.broadcast %cst_79 : f32 to vector<8x128xf32>
    %162 = arith.addf %161, %160 : vector<8x128xf32>
    %163 = arith.divf %161, %162 : vector<8x128xf32>
    %164 = vector.extract_strided_slice %157 {offsets = [0, 128], sizes = [8, 128], strides = [1, 1]} : vector<8x512xf32> to vector<8x128xf32>
    %165 = arith.negf %164 : vector<8x128xf32>
    %166 = math.exp %165 : vector<8x128xf32>
    %cst_80 = arith.constant 1.000000e+00 : f32
    %167 = vector.broadcast %cst_80 : f32 to vector<8x128xf32>
    %168 = arith.addf %167, %166 : vector<8x128xf32>
    %169 = arith.divf %167, %168 : vector<8x128xf32>
    %170 = vector.extract_strided_slice %157 {offsets = [0, 256], sizes = [8, 128], strides = [1, 1]} : vector<8x512xf32> to vector<8x128xf32>
    %171 = math.tanh %170 : vector<8x128xf32>
    %172 = vector.extract_strided_slice %157 {offsets = [0, 384], sizes = [8, 128], strides = [1, 1]} : vector<8x512xf32> to vector<8x128xf32>
    %173 = arith.negf %172 : vector<8x128xf32>
    %174 = math.exp %173 : vector<8x128xf32>
    %cst_81 = arith.constant 1.000000e+00 : f32
    %175 = vector.broadcast %cst_81 : f32 to vector<8x128xf32>
    %176 = arith.addf %175, %174 : vector<8x128xf32>
    %177 = arith.divf %175, %176 : vector<8x128xf32>
    %c0_82 = arith.constant 0 : index
    %c0_83 = arith.constant 0 : index
    %178 = vector.load %arg13[%c0_82, %c0_83] : memref<8x128xf32, #tpu.memory_space<vmem>>, vector<8x128xf32>
    %179 = arith.mulf %169, %178 : vector<8x128xf32>
    %180 = arith.mulf %163, %171 : vector<8x128xf32>
    %181 = arith.addf %179, %180 : vector<8x128xf32>
    %182 = math.tanh %181 : vector<8x128xf32>
    %183 = arith.mulf %177, %182 : vector<8x128xf32>
    %c0_84 = arith.constant 0 : index
    %c0_85 = arith.constant 0 : index
    %184 = vector.load %arg13[%c0_84, %c0_85] : memref<8x128xf32, #tpu.memory_space<vmem>>, vector<8x128xf32>
    tpu.vector_store %arg13[%c0_84, %c0_85], %181 {strides = array<i32>} : memref<8x128xf32, #tpu.memory_space<vmem>>, vector<8x128xf32>,
    %c0_86 = arith.constant 0 : index
    %c0_87 = arith.constant 0 : index
    %185 = vector.load %arg12[%c0_86, %c0_87] : memref<8x128xf32, #tpu.memory_space<vmem>>, vector<8x128xf32>
    tpu.vector_store %arg12[%c0_86, %c0_87], %183 {strides = array<i32>} : memref<8x128xf32, #tpu.memory_space<vmem>>, vector<8x128xf32>,
    %c0_88 = arith.constant 0 : index
    %186 = arith.index_cast %149 : i32 to index
    %c0_89 = arith.constant 0 : index
    %187 = vector.load %arg8[%c0_88, %186, %c0_89] : memref<1x64x128xf32, #tpu.memory_space<vmem>>, vector<1x8x128xf32>
    %188 = vector.shape_cast %187 : vector<1x8x128xf32> to vector<8x128xf32>
    %189 = vector.shape_cast %183 : vector<8x128xf32> to vector<1x8x128xf32>
    tpu.vector_store %arg8[%c0_88, %186, %c0_89], %189 {strides = array<i32>} : memref<1x64x128xf32, #tpu.memory_space<vmem>>, vector<1x8x128xf32>,
    %c4_i32 = arith.constant 4 : i32
    %c7_i32_90 = arith.constant 7 : i32
    %190 = arith.subi %c7_i32_90, %c4_i32 : i32
    %191 = arith.select %13, %c4_i32, %190 : i32
    %c8_i32_91 = arith.constant 8 : i32
    %192 = arith.muli %191, %c8_i32_91 : i32
    %193 = tpu.assume_multiple %192, 8 : i32
    %194 = arith.index_cast %193 : i32 to index
    %c0_92 = arith.constant 0 : index
    %195 = vector.load %arg11[%194, %c0_92] : memref<64x512xf32, #tpu.memory_space<vmem>>, vector<8x512xf32>
    %c0_93 = arith.constant 0 : index
    %c0_94 = arith.constant 0 : index
    %196 = vector.load %arg12[%c0_93, %c0_94] : memref<8x128xf32, #tpu.memory_space<vmem>>, vector<8x128xf32>
    %197 = arith.truncf %196 : vector<8x128xf32> to vector<8x128xbf16>
    %c0_95 = arith.constant 0 : index
    %c0_96 = arith.constant 0 : index
    %c0_97 = arith.constant 0 : index
    %198 = vector.load %arg4[%c0_95, %c0_96, %c0_97] : memref<1x128x512xbf16, #tpu.memory_space<vmem>>, vector<1x128x512xbf16>
    %199 = vector.shape_cast %198 : vector<1x128x512xbf16> to vector<128x512xbf16>
    %cst_98 = arith.constant dense<0.000000e+00> : vector<8x512xf32>
    %200 = tpu.matmul %197, %199, %cst_98 {dimension_numbers = #tpu.dot_dimension_numbers<[1], [0], [0], [1], [0, 0, 1, 1], [], []>} : vector<8x128xbf16>, vector<128x512xbf16>, vector<8x512xf32> -> vector<8x512xf32>
    %201 = arith.addf %195, %200 : vector<8x512xf32>
    %202 = vector.extract_strided_slice %201 {offsets = [0, 0], sizes = [8, 128], strides = [1, 1]} : vector<8x512xf32> to vector<8x128xf32>
    %203 = arith.negf %202 : vector<8x128xf32>
    %204 = math.exp %203 : vector<8x128xf32>
    %cst_99 = arith.constant 1.000000e+00 : f32
    %205 = vector.broadcast %cst_99 : f32 to vector<8x128xf32>
    %206 = arith.addf %205, %204 : vector<8x128xf32>
    %207 = arith.divf %205, %206 : vector<8x128xf32>
    %208 = vector.extract_strided_slice %201 {offsets = [0, 128], sizes = [8, 128], strides = [1, 1]} : vector<8x512xf32> to vector<8x128xf32>
    %209 = arith.negf %208 : vector<8x128xf32>
    %210 = math.exp %209 : vector<8x128xf32>
    %cst_100 = arith.constant 1.000000e+00 : f32
    %211 = vector.broadcast %cst_100 : f32 to vector<8x128xf32>
    %212 = arith.addf %211, %210 : vector<8x128xf32>
    %213 = arith.divf %211, %212 : vector<8x128xf32>
    %214 = vector.extract_strided_slice %201 {offsets = [0, 256], sizes = [8, 128], strides = [1, 1]} : vector<8x512xf32> to vector<8x128xf32>
    %215 = math.tanh %214 : vector<8x128xf32>
    %216 = vector.extract_strided_slice %201 {offsets = [0, 384], sizes = [8, 128], strides = [1, 1]} : vector<8x512xf32> to vector<8x128xf32>
    %217 = arith.negf %216 : vector<8x128xf32>
    %218 = math.exp %217 : vector<8x128xf32>
    %cst_101 = arith.constant 1.000000e+00 : f32
    %219 = vector.broadcast %cst_101 : f32 to vector<8x128xf32>
    %220 = arith.addf %219, %218 : vector<8x128xf32>
    %221 = arith.divf %219, %220 : vector<8x128xf32>
    %c0_102 = arith.constant 0 : index
    %c0_103 = arith.constant 0 : index
    %222 = vector.load %arg13[%c0_102, %c0_103] : memref<8x128xf32, #tpu.memory_space<vmem>>, vector<8x128xf32>
    %223 = arith.mulf %213, %222 : vector<8x128xf32>
    %224 = arith.mulf %207, %215 : vector<8x128xf32>
    %225 = arith.addf %223, %224 : vector<8x128xf32>
    %226 = math.tanh %225 : vector<8x128xf32>
    %227 = arith.mulf %221, %226 : vector<8x128xf32>
    %c0_104 = arith.constant 0 : index
    %c0_105 = arith.constant 0 : index
    %228 = vector.load %arg13[%c0_104, %c0_105] : memref<8x128xf32, #tpu.memory_space<vmem>>, vector<8x128xf32>
    tpu.vector_store %arg13[%c0_104, %c0_105], %225 {strides = array<i32>} : memref<8x128xf32, #tpu.memory_space<vmem>>, vector<8x128xf32>,
    %c0_106 = arith.constant 0 : index
    %c0_107 = arith.constant 0 : index
    %229 = vector.load %arg12[%c0_106, %c0_107] : memref<8x128xf32, #tpu.memory_space<vmem>>, vector<8x128xf32>
    tpu.vector_store %arg12[%c0_106, %c0_107], %227 {strides = array<i32>} : memref<8x128xf32, #tpu.memory_space<vmem>>, vector<8x128xf32>,
    %c0_108 = arith.constant 0 : index
    %230 = arith.index_cast %193 : i32 to index
    %c0_109 = arith.constant 0 : index
    %231 = vector.load %arg8[%c0_108, %230, %c0_109] : memref<1x64x128xf32, #tpu.memory_space<vmem>>, vector<1x8x128xf32>
    %232 = vector.shape_cast %231 : vector<1x8x128xf32> to vector<8x128xf32>
    %233 = vector.shape_cast %227 : vector<8x128xf32> to vector<1x8x128xf32>
    tpu.vector_store %arg8[%c0_108, %230, %c0_109], %233 {strides = array<i32>} : memref<1x64x128xf32, #tpu.memory_space<vmem>>, vector<1x8x128xf32>,
    %c5_i32 = arith.constant 5 : i32
    %c7_i32_110 = arith.constant 7 : i32
    %234 = arith.subi %c7_i32_110, %c5_i32 : i32
    %235 = arith.select %13, %c5_i32, %234 : i32
    %c8_i32_111 = arith.constant 8 : i32
    %236 = arith.muli %235, %c8_i32_111 : i32
    %237 = tpu.assume_multiple %236, 8 : i32
    %238 = arith.index_cast %237 : i32 to index
    %c0_112 = arith.constant 0 : index
    %239 = vector.load %arg11[%238, %c0_112] : memref<64x512xf32, #tpu.memory_space<vmem>>, vector<8x512xf32>
    %c0_113 = arith.constant 0 : index
    %c0_114 = arith.constant 0 : index
    %240 = vector.load %arg12[%c0_113, %c0_114] : memref<8x128xf32, #tpu.memory_space<vmem>>, vector<8x128xf32>
    %241 = arith.truncf %240 : vector<8x128xf32> to vector<8x128xbf16>
    %c0_115 = arith.constant 0 : index
    %c0_116 = arith.constant 0 : index
    %c0_117 = arith.constant 0 : index
    %242 = vector.load %arg4[%c0_115, %c0_116, %c0_117] : memref<1x128x512xbf16, #tpu.memory_space<vmem>>, vector<1x128x512xbf16>
    %243 = vector.shape_cast %242 : vector<1x128x512xbf16> to vector<128x512xbf16>
    %cst_118 = arith.constant dense<0.000000e+00> : vector<8x512xf32>
    %244 = tpu.matmul %241, %243, %cst_118 {dimension_numbers = #tpu.dot_dimension_numbers<[1], [0], [0], [1], [0, 0, 1, 1], [], []>} : vector<8x128xbf16>, vector<128x512xbf16>, vector<8x512xf32> -> vector<8x512xf32>
    %245 = arith.addf %239, %244 : vector<8x512xf32>
    %246 = vector.extract_strided_slice %245 {offsets = [0, 0], sizes = [8, 128], strides = [1, 1]} : vector<8x512xf32> to vector<8x128xf32>
    %247 = arith.negf %246 : vector<8x128xf32>
    %248 = math.exp %247 : vector<8x128xf32>
    %cst_119 = arith.constant 1.000000e+00 : f32
    %249 = vector.broadcast %cst_119 : f32 to vector<8x128xf32>
    %250 = arith.addf %249, %248 : vector<8x128xf32>
    %251 = arith.divf %249, %250 : vector<8x128xf32>
    %252 = vector.extract_strided_slice %245 {offsets = [0, 128], sizes = [8, 128], strides = [1, 1]} : vector<8x512xf32> to vector<8x128xf32>
    %253 = arith.negf %252 : vector<8x128xf32>
    %254 = math.exp %253 : vector<8x128xf32>
    %cst_120 = arith.constant 1.000000e+00 : f32
    %255 = vector.broadcast %cst_120 : f32 to vector<8x128xf32>
    %256 = arith.addf %255, %254 : vector<8x128xf32>
    %257 = arith.divf %255, %256 : vector<8x128xf32>
    %258 = vector.extract_strided_slice %245 {offsets = [0, 256], sizes = [8, 128], strides = [1, 1]} : vector<8x512xf32> to vector<8x128xf32>
    %259 = math.tanh %258 : vector<8x128xf32>
    %260 = vector.extract_strided_slice %245 {offsets = [0, 384], sizes = [8, 128], strides = [1, 1]} : vector<8x512xf32> to vector<8x128xf32>
    %261 = arith.negf %260 : vector<8x128xf32>
    %262 = math.exp %261 : vector<8x128xf32>
    %cst_121 = arith.constant 1.000000e+00 : f32
    %263 = vector.broadcast %cst_121 : f32 to vector<8x128xf32>
    %264 = arith.addf %263, %262 : vector<8x128xf32>
    %265 = arith.divf %263, %264 : vector<8x128xf32>
    %c0_122 = arith.constant 0 : index
    %c0_123 = arith.constant 0 : index
    %266 = vector.load %arg13[%c0_122, %c0_123] : memref<8x128xf32, #tpu.memory_space<vmem>>, vector<8x128xf32>
    %267 = arith.mulf %257, %266 : vector<8x128xf32>
    %268 = arith.mulf %251, %259 : vector<8x128xf32>
    %269 = arith.addf %267, %268 : vector<8x128xf32>
    %270 = math.tanh %269 : vector<8x128xf32>
    %271 = arith.mulf %265, %270 : vector<8x128xf32>
    %c0_124 = arith.constant 0 : index
    %c0_125 = arith.constant 0 : index
    %272 = vector.load %arg13[%c0_124, %c0_125] : memref<8x128xf32, #tpu.memory_space<vmem>>, vector<8x128xf32>
    tpu.vector_store %arg13[%c0_124, %c0_125], %269 {strides = array<i32>} : memref<8x128xf32, #tpu.memory_space<vmem>>, vector<8x128xf32>,
    %c0_126 = arith.constant 0 : index
    %c0_127 = arith.constant 0 : index
    %273 = vector.load %arg12[%c0_126, %c0_127] : memref<8x128xf32, #tpu.memory_space<vmem>>, vector<8x128xf32>
    tpu.vector_store %arg12[%c0_126, %c0_127], %271 {strides = array<i32>} : memref<8x128xf32, #tpu.memory_space<vmem>>, vector<8x128xf32>,
    %c0_128 = arith.constant 0 : index
    %274 = arith.index_cast %237 : i32 to index
    %c0_129 = arith.constant 0 : index
    %275 = vector.load %arg8[%c0_128, %274, %c0_129] : memref<1x64x128xf32, #tpu.memory_space<vmem>>, vector<1x8x128xf32>
    %276 = vector.shape_cast %275 : vector<1x8x128xf32> to vector<8x128xf32>
    %277 = vector.shape_cast %271 : vector<8x128xf32> to vector<1x8x128xf32>
    tpu.vector_store %arg8[%c0_128, %274, %c0_129], %277 {strides = array<i32>} : memref<1x64x128xf32, #tpu.memory_space<vmem>>, vector<1x8x128xf32>,
    %c6_i32 = arith.constant 6 : i32
    %c7_i32_130 = arith.constant 7 : i32
    %278 = arith.subi %c7_i32_130, %c6_i32 : i32
    %279 = arith.select %13, %c6_i32, %278 : i32
    %c8_i32_131 = arith.constant 8 : i32
    %280 = arith.muli %279, %c8_i32_131 : i32
    %281 = tpu.assume_multiple %280, 8 : i32
    %282 = arith.index_cast %281 : i32 to index
    %c0_132 = arith.constant 0 : index
    %283 = vector.load %arg11[%282, %c0_132] : memref<64x512xf32, #tpu.memory_space<vmem>>, vector<8x512xf32>
    %c0_133 = arith.constant 0 : index
    %c0_134 = arith.constant 0 : index
    %284 = vector.load %arg12[%c0_133, %c0_134] : memref<8x128xf32, #tpu.memory_space<vmem>>, vector<8x128xf32>
    %285 = arith.truncf %284 : vector<8x128xf32> to vector<8x128xbf16>
    %c0_135 = arith.constant 0 : index
    %c0_136 = arith.constant 0 : index
    %c0_137 = arith.constant 0 : index
    %286 = vector.load %arg4[%c0_135, %c0_136, %c0_137] : memref<1x128x512xbf16, #tpu.memory_space<vmem>>, vector<1x128x512xbf16>
    %287 = vector.shape_cast %286 : vector<1x128x512xbf16> to vector<128x512xbf16>
    %cst_138 = arith.constant dense<0.000000e+00> : vector<8x512xf32>
    %288 = tpu.matmul %285, %287, %cst_138 {dimension_numbers = #tpu.dot_dimension_numbers<[1], [0], [0], [1], [0, 0, 1, 1], [], []>} : vector<8x128xbf16>, vector<128x512xbf16>, vector<8x512xf32> -> vector<8x512xf32>
    %289 = arith.addf %283, %288 : vector<8x512xf32>
    %290 = vector.extract_strided_slice %289 {offsets = [0, 0], sizes = [8, 128], strides = [1, 1]} : vector<8x512xf32> to vector<8x128xf32>
    %291 = arith.negf %290 : vector<8x128xf32>
    %292 = math.exp %291 : vector<8x128xf32>
    %cst_139 = arith.constant 1.000000e+00 : f32
    %293 = vector.broadcast %cst_139 : f32 to vector<8x128xf32>
    %294 = arith.addf %293, %292 : vector<8x128xf32>
    %295 = arith.divf %293, %294 : vector<8x128xf32>
    %296 = vector.extract_strided_slice %289 {offsets = [0, 128], sizes = [8, 128], strides = [1, 1]} : vector<8x512xf32> to vector<8x128xf32>
    %297 = arith.negf %296 : vector<8x128xf32>
    %298 = math.exp %297 : vector<8x128xf32>
    %cst_140 = arith.constant 1.000000e+00 : f32
    %299 = vector.broadcast %cst_140 : f32 to vector<8x128xf32>
    %300 = arith.addf %299, %298 : vector<8x128xf32>
    %301 = arith.divf %299, %300 : vector<8x128xf32>
    %302 = vector.extract_strided_slice %289 {offsets = [0, 256], sizes = [8, 128], strides = [1, 1]} : vector<8x512xf32> to vector<8x128xf32>
    %303 = math.tanh %302 : vector<8x128xf32>
    %304 = vector.extract_strided_slice %289 {offsets = [0, 384], sizes = [8, 128], strides = [1, 1]} : vector<8x512xf32> to vector<8x128xf32>
    %305 = arith.negf %304 : vector<8x128xf32>
    %306 = math.exp %305 : vector<8x128xf32>
    %cst_141 = arith.constant 1.000000e+00 : f32
    %307 = vector.broadcast %cst_141 : f32 to vector<8x128xf32>
    %308 = arith.addf %307, %306 : vector<8x128xf32>
    %309 = arith.divf %307, %308 : vector<8x128xf32>
    %c0_142 = arith.constant 0 : index
    %c0_143 = arith.constant 0 : index
    %310 = vector.load %arg13[%c0_142, %c0_143] : memref<8x128xf32, #tpu.memory_space<vmem>>, vector<8x128xf32>
    %311 = arith.mulf %301, %310 : vector<8x128xf32>
    %312 = arith.mulf %295, %303 : vector<8x128xf32>
    %313 = arith.addf %311, %312 : vector<8x128xf32>
    %314 = math.tanh %313 : vector<8x128xf32>
    %315 = arith.mulf %309, %314 : vector<8x128xf32>
    %c0_144 = arith.constant 0 : index
    %c0_145 = arith.constant 0 : index
    %316 = vector.load %arg13[%c0_144, %c0_145] : memref<8x128xf32, #tpu.memory_space<vmem>>, vector<8x128xf32>
    tpu.vector_store %arg13[%c0_144, %c0_145], %313 {strides = array<i32>} : memref<8x128xf32, #tpu.memory_space<vmem>>, vector<8x128xf32>,
    %c0_146 = arith.constant 0 : index
    %c0_147 = arith.constant 0 : index
    %317 = vector.load %arg12[%c0_146, %c0_147] : memref<8x128xf32, #tpu.memory_space<vmem>>, vector<8x128xf32>
    tpu.vector_store %arg12[%c0_146, %c0_147], %315 {strides = array<i32>} : memref<8x128xf32, #tpu.memory_space<vmem>>, vector<8x128xf32>,
    %c0_148 = arith.constant 0 : index
    %318 = arith.index_cast %281 : i32 to index
    %c0_149 = arith.constant 0 : index
    %319 = vector.load %arg8[%c0_148, %318, %c0_149] : memref<1x64x128xf32, #tpu.memory_space<vmem>>, vector<1x8x128xf32>
    %320 = vector.shape_cast %319 : vector<1x8x128xf32> to vector<8x128xf32>
    %321 = vector.shape_cast %315 : vector<8x128xf32> to vector<1x8x128xf32>
    tpu.vector_store %arg8[%c0_148, %318, %c0_149], %321 {strides = array<i32>} : memref<1x64x128xf32, #tpu.memory_space<vmem>>, vector<1x8x128xf32>,
    %c7_i32_150 = arith.constant 7 : i32
    %c7_i32_151 = arith.constant 7 : i32
    %322 = arith.subi %c7_i32_151, %c7_i32_150 : i32
    %323 = arith.select %13, %c7_i32_150, %322 : i32
    %c8_i32_152 = arith.constant 8 : i32
    %324 = arith.muli %323, %c8_i32_152 : i32
    %325 = tpu.assume_multiple %324, 8 : i32
    %326 = arith.index_cast %325 : i32 to index
    %c0_153 = arith.constant 0 : index
    %327 = vector.load %arg11[%326, %c0_153] : memref<64x512xf32, #tpu.memory_space<vmem>>, vector<8x512xf32>
    %c0_154 = arith.constant 0 : index
    %c0_155 = arith.constant 0 : index
    %328 = vector.load %arg12[%c0_154, %c0_155] : memref<8x128xf32, #tpu.memory_space<vmem>>, vector<8x128xf32>
    %329 = arith.truncf %328 : vector<8x128xf32> to vector<8x128xbf16>
    %c0_156 = arith.constant 0 : index
    %c0_157 = arith.constant 0 : index
    %c0_158 = arith.constant 0 : index
    %330 = vector.load %arg4[%c0_156, %c0_157, %c0_158] : memref<1x128x512xbf16, #tpu.memory_space<vmem>>, vector<1x128x512xbf16>
    %331 = vector.shape_cast %330 : vector<1x128x512xbf16> to vector<128x512xbf16>
    %cst_159 = arith.constant dense<0.000000e+00> : vector<8x512xf32>
    %332 = tpu.matmul %329, %331, %cst_159 {dimension_numbers = #tpu.dot_dimension_numbers<[1], [0], [0], [1], [0, 0, 1, 1], [], []>} : vector<8x128xbf16>, vector<128x512xbf16>, vector<8x512xf32> -> vector<8x512xf32>
    %333 = arith.addf %327, %332 : vector<8x512xf32>
    %334 = vector.extract_strided_slice %333 {offsets = [0, 0], sizes = [8, 128], strides = [1, 1]} : vector<8x512xf32> to vector<8x128xf32>
    %335 = arith.negf %334 : vector<8x128xf32>
    %336 = math.exp %335 : vector<8x128xf32>
    %cst_160 = arith.constant 1.000000e+00 : f32
    %337 = vector.broadcast %cst_160 : f32 to vector<8x128xf32>
    %338 = arith.addf %337, %336 : vector<8x128xf32>
    %339 = arith.divf %337, %338 : vector<8x128xf32>
    %340 = vector.extract_strided_slice %333 {offsets = [0, 128], sizes = [8, 128], strides = [1, 1]} : vector<8x512xf32> to vector<8x128xf32>
    %341 = arith.negf %340 : vector<8x128xf32>
    %342 = math.exp %341 : vector<8x128xf32>
    %cst_161 = arith.constant 1.000000e+00 : f32
    %343 = vector.broadcast %cst_161 : f32 to vector<8x128xf32>
    %344 = arith.addf %343, %342 : vector<8x128xf32>
    %345 = arith.divf %343, %344 : vector<8x128xf32>
    %346 = vector.extract_strided_slice %333 {offsets = [0, 256], sizes = [8, 128], strides = [1, 1]} : vector<8x512xf32> to vector<8x128xf32>
    %347 = math.tanh %346 : vector<8x128xf32>
    %348 = vector.extract_strided_slice %333 {offsets = [0, 384], sizes = [8, 128], strides = [1, 1]} : vector<8x512xf32> to vector<8x128xf32>
    %349 = arith.negf %348 : vector<8x128xf32>
    %350 = math.exp %349 : vector<8x128xf32>
    %cst_162 = arith.constant 1.000000e+00 : f32
    %351 = vector.broadcast %cst_162 : f32 to vector<8x128xf32>
    %352 = arith.addf %351, %350 : vector<8x128xf32>
    %353 = arith.divf %351, %352 : vector<8x128xf32>
    %c0_163 = arith.constant 0 : index
    %c0_164 = arith.constant 0 : index
    %354 = vector.load %arg13[%c0_163, %c0_164] : memref<8x128xf32, #tpu.memory_space<vmem>>, vector<8x128xf32>
    %355 = arith.mulf %345, %354 : vector<8x128xf32>
    %356 = arith.mulf %339, %347 : vector<8x128xf32>
    %357 = arith.addf %355, %356 : vector<8x128xf32>
    %358 = math.tanh %357 : vector<8x128xf32>
    %359 = arith.mulf %353, %358 : vector<8x128xf32>
    %c0_165 = arith.constant 0 : index
    %c0_166 = arith.constant 0 : index
    %360 = vector.load %arg13[%c0_165, %c0_166] : memref<8x128xf32, #tpu.memory_space<vmem>>, vector<8x128xf32>
    tpu.vector_store %arg13[%c0_165, %c0_166], %357 {strides = array<i32>} : memref<8x128xf32, #tpu.memory_space<vmem>>, vector<8x128xf32>,
    %c0_167 = arith.constant 0 : index
    %c0_168 = arith.constant 0 : index
    %361 = vector.load %arg12[%c0_167, %c0_168] : memref<8x128xf32, #tpu.memory_space<vmem>>, vector<8x128xf32>
    tpu.vector_store %arg12[%c0_167, %c0_168], %359 {strides = array<i32>} : memref<8x128xf32, #tpu.memory_space<vmem>>, vector<8x128xf32>,
    %c0_169 = arith.constant 0 : index
    %362 = arith.index_cast %325 : i32 to index
    %c0_170 = arith.constant 0 : index
    %363 = vector.load %arg8[%c0_169, %362, %c0_170] : memref<1x64x128xf32, #tpu.memory_space<vmem>>, vector<1x8x128xf32>
    %364 = vector.shape_cast %363 : vector<1x8x128xf32> to vector<8x128xf32>
    %365 = vector.shape_cast %359 : vector<8x128xf32> to vector<1x8x128xf32>
    tpu.vector_store %arg8[%c0_169, %362, %c0_170], %365 {strides = array<i32>} : memref<1x64x128xf32, #tpu.memory_space<vmem>>, vector<1x8x128xf32>,
    %c8_i32_171 = arith.constant 8 : i32
    %c0_172 = arith.constant 0 : index
    %c0_173 = arith.constant 0 : index
    %366 = vector.load %arg12[%c0_172, %c0_173] : memref<8x128xf32, #tpu.memory_space<vmem>>, vector<8x128xf32>
    %c0_174 = arith.constant 0 : index
    %c0_175 = arith.constant 0 : index
    %c0_176 = arith.constant 0 : index
    %367 = vector.load %arg9[%c0_174, %c0_175, %c0_176] : memref<1x8x128xf32, #tpu.memory_space<vmem>>, vector<1x8x128xf32>
    %368 = vector.shape_cast %367 : vector<1x8x128xf32> to vector<8x128xf32>
    %369 = vector.shape_cast %366 : vector<8x128xf32> to vector<1x8x128xf32>
    tpu.vector_store %arg9[%c0_174, %c0_175, %c0_176], %369 {strides = array<i32>} : memref<1x8x128xf32, #tpu.memory_space<vmem>>, vector<1x8x128xf32>,
    %c0_177 = arith.constant 0 : index
    %c0_178 = arith.constant 0 : index
    %370 = vector.load %arg13[%c0_177, %c0_178] : memref<8x128xf32, #tpu.memory_space<vmem>>, vector<8x128xf32>
    %c0_179 = arith.constant 0 : index
    %c0_180 = arith.constant 0 : index
    %c0_181 = arith.constant 0 : index
    %371 = vector.load %arg10[%c0_179, %c0_180, %c0_181] : memref<1x8x128xf32, #tpu.memory_space<vmem>>, vector<1x8x128xf32>
    %372 = vector.shape_cast %371 : vector<1x8x128xf32> to vector<8x128xf32>
    %373 = vector.shape_cast %370 : vector<8x128xf32> to vector<1x8x128xf32>
    tpu.vector_store %arg10[%c0_179, %c0_180, %c0_181], %373 {strides = array<i32>} : memref<1x8x128xf32, #tpu.memory_space<vmem>>, vector<1x8x128xf32>,
    return
  }
  func.func @transform_0(%arg0: i32, %arg1: i32) -> (i32, i32) {
    %c2_i32 = arith.constant 2 : i32
    %0 = arith.muli %c2_i32, %arg1 : i32
    %c0_i32 = arith.constant 0 : i32
    %1 = arith.subi %c0_i32, %0 : i32
    %2 = arith.muli %arg0, %1 : i32
    %3 = arith.addi %arg1, %2 : i32
    %c0_i32_0 = arith.constant 0 : i32
    %c0_i32_1 = arith.constant 0 : i32
    return %3, %c0_i32_0 : i32, i32
  }
  func.func @transform_1(%arg0: i32, %arg1: i32) -> (i32, i32, i32) {
    %c0_i32 = arith.constant 0 : i32
    %c0_i32_0 = arith.constant 0 : i32
    %c0_i32_1 = arith.constant 0 : i32
    return %arg0, %c0_i32, %c0_i32_0 : i32, i32, i32
  }
  func.func @transform_2(%arg0: i32, %arg1: i32) -> (i32, i32, i32) {
    %c0_i32 = arith.constant 0 : i32
    %c0_i32_0 = arith.constant 0 : i32
    %c0_i32_1 = arith.constant 0 : i32
    return %arg0, %c0_i32, %c0_i32_0 : i32, i32, i32
  }
  func.func @transform_3(%arg0: i32, %arg1: i32) -> (i32, i32, i32) {
    %c0_i32 = arith.constant 0 : i32
    %c0_i32_0 = arith.constant 0 : i32
    %c0_i32_1 = arith.constant 0 : i32
    return %arg0, %c0_i32, %c0_i32_0 : i32, i32, i32
  }
  func.func @transform_4(%arg0: i32, %arg1: i32) -> (i32, i32, i32) {
    %c0_i32 = arith.constant 0 : i32
    %c0_i32_0 = arith.constant 0 : i32
    %c0_i32_1 = arith.constant 0 : i32
    return %arg0, %c0_i32, %c0_i32_0 : i32, i32, i32
  }
  func.func @transform_5(%arg0: i32, %arg1: i32) -> (i32, i32, i32) {
    %c0_i32 = arith.constant 0 : i32
    %c0_i32_0 = arith.constant 0 : i32
    %c0_i32_1 = arith.constant 0 : i32
    return %arg0, %c0_i32, %c0_i32_0 : i32, i32, i32
  }
  func.func @transform_6(%arg0: i32, %arg1: i32) -> (i32, i32, i32) {
    %c2_i32 = arith.constant 2 : i32
    %0 = arith.muli %c2_i32, %arg1 : i32
    %c0_i32 = arith.constant 0 : i32
    %1 = arith.subi %c0_i32, %0 : i32
    %2 = arith.muli %arg0, %1 : i32
    %3 = arith.addi %arg1, %2 : i32
    %c0_i32_0 = arith.constant 0 : i32
    %c0_i32_1 = arith.constant 0 : i32
    return %arg0, %3, %c0_i32_0 : i32, i32, i32
  }
  func.func @transform_7(%arg0: i32, %arg1: i32) -> (i32, i32, i32) {
    %c0_i32 = arith.constant 0 : i32
    %c0_i32_0 = arith.constant 0 : i32
    %c0_i32_1 = arith.constant 0 : i32
    return %arg0, %c0_i32, %c0_i32_0 : i32, i32, i32
  }
  func.func @transform_8(%arg0: i32, %arg1: i32) -> (i32, i32, i32) {
    %c0_i32 = arith.constant 0 : i32
    %c0_i32_0 = arith.constant 0 : i32
    %c0_i32_1 = arith.constant 0 : i32
    return %arg0, %c0_i32, %c0_i32_0 : i32, i32, i32
  }
}

</mosaic_0001>

<bundles_post_ra>
// kernel: tpu_custom_call.1
= control target key start
LH: loop header
LB: loop body
LE: loop exit
PB: predicated region body
PF: predicated region fallthrough
CT: control target
= control target key end

     0   :  { %s6648_s0 = inlined_call_operand.vmem [shape: f32[64,16], index: 0, kind: input, shape index: {}]   ;;  %s6649_s1 = inlined_call_operand.vmem [shape: bf16[2,16,512], index: 1, kind: input, shape index: {}]   ;;  %s6650_s2 = inlined_call_operand.hbm [shape: bf16[2,128,512], index: 2, kind: input, shape index: {}]   ;;  %s6651_s3 = inlined_call_operand.hbm [shape: f32[2,1,512], index: 3, kind: input, shape index: {}]   ;;  %s6652_s4 = inlined_call_operand.vmem [shape: f32[2,8,128], index: 4, kind: input, shape index: {}]   ;;  %s6653_s5 = inlined_call_operand.hbm [shape: f32[2,8,128], index: 5, kind: input, shape index: {}]   ;;  %s6654_s6 = inlined_call_operand.hbm [shape: f32[2,64,128], index: 6, kind: output, shape index: {0}]   ;;  %s6655_s7 = inlined_call_operand.hbm [shape: f32[2,8,128], index: 7, kind: output, shape index: {1}]   ;;  %s6656_s8 = inlined_call_operand.hbm [shape: f32[2,8,128], index: 8, kind: output, shape index: {2}]  }
   0x1   :  { %6670 = sst [smem:[#allocation26_spill]] %s6651_s3 }
   0x2   :  { %6671 = sst [smem:[#allocation27_spill]] %s6654_s6 }
   0x3   :  { %6672 = sst [smem:[#allocation28_spill]] %s6655_s7 }
   0x4   :  { %6673 = sst [smem:[#allocation29_spill]] %s6656_s8 }
   0x5   :  { %14 = vsyncpa [#allocation6], 0 }
   0x6   :  { %16 = vsyncpa [#allocation6 + $0x1], 0 }
   0x7   :  { %17 = vsyncpa [#allocation9], 0 }
   0x8   :  { %19 = vsyncpa [#allocation9 + $0x1], 0 }
   0x9   :  { %20 = vsyncpa [#allocation7], 0 }
   0xa   :  { %22 = vsyncpa [#allocation7 + $0x1], 0 }
   0xb   :  { %23 = vsyncpa [#allocation13], 0 }
   0xc   :  { %25 = vsyncpa [#allocation13 + $0x1], 0  ;;  %s5612_s27 = smov 0   ;;  %s5614_s28 = smov 0  }
   0xd   :  { %s5616_s29 = smov 0   ;;  %s5618_s30 = smov 0  }
   0xe   :  { %s5620_s9 = smov 0   ;;  %s5622_s10 = smov 0  }
   0xf LB: > { %6674 = sst [smem:[#allocation19_spill]] %s5541_s27  ;;  %s5643_s11 = sadd.s32 4294967295, %s5561_s10   ;;  %s5561_s10 = sphi %s5622_s10, %s31_s10   ;;  %s5557_s9 = sphi %s5620_s9, %s6704_s9   ;;  %s5553_s30 = sphi %s5618_s30, %s6703_s30   ;;  %s5549_s29 = sphi %s5616_s29, %s6699_s29   ;;  %s5545_s28 = sphi %s5614_s28, %s6702_s28   ;;  %s5541_s27 = sphi %s5612_s27, %s6701_s27  }
  0x10   : > { %6675 = sst [smem:[#allocation20_spill]] %s5549_s29  ;;  %s6657_s12 = sadd.s32 4294967294, %s5561_s10  }
  0x11   : > { %6676 = sst [smem:[#allocation21_spill]] %s5561_s10  ;;  %s43_s13 = sadd.s32 1, %s5557_s9 }
  0x12   : > { %s110_s14 = sadd.s32 1, %s5549_s29  ;;  %p45_p0 = scmp.ge.s32.totalorder %s43_s13, 2 }
  0x13   : > { %p117_p1 = scmp.ne.s32.totalorder %s5549_s29, %s5545_s28  ;;  %p118_p2 = scmp.eq.s32.totalorder %s5561_s10, 0 }
  0x14   : > { %p123_p3 = scmp.ne.s32.totalorder %s5545_s28, %s5541_s27  ;;  %s6706_s13 = smov (%p45_p0, %s43_s13), 0 }
  0x15   : > { %6677 = sst [smem:[#allocation22_spill]] %s6706_s13  ;;  %p5655_p4 = por %p118_p2, %p117_p1 }
  0x16   : > { %p124_p5 = scmp.eq.s32.totalorder %s5643_s11, 0  ;;  %s107_s16 = ssub.s32 %s5557_s9, %s6706_s13 }
  0x17   : > { %p235_p6 = scmp.eq.s32.totalorder %s5643_s11, 1  ;;  %p108_p7 = scmp.eq.s32.totalorder %s107_s16, 0 }
  0x18   : > { %p5663_p8 = por %p124_p5, %p123_p3  ;;  %p241_p10 = scmp.eq.s32.totalorder %s6657_s12, 1 }
  0x19   : > { %p5667_p9 = por %p235_p6, %p117_p1  ;;  %p3708_p12 = scmp.ge.s32.totalorder %s5561_s10, 2 }
  0x1a   : > { %s5674_s19 = scalar_select %p108_p7, %s5549_s29, %s110_s14  }
  0x1b   : > { %s6680_s18 = scalar_select %p5667_p9, 1, 0 }
  0x1c   : > { %6682 = sst [smem:[#allocation24_spill]] %s5674_s19  ;;  %p5676_p11 = por %p241_p10, %p123_p3 }
  0x1d   : > { %6681 = sst [smem:[#allocation23_spill]] %s6680_s18  ;;  %p5143_p13 = scmp.lt.s32.totalorder %s5561_s10, 2 }
  0x1e   : > { %s6683_s20 = scalar_select %p5676_p11, 1, 0 }
  0x1f   : > { %s5683_s21 = sand.u32 1, %s5549_s29   ;;  %s360_s22 = sand.u32 1, %s5561_s10  }
  0x20   : > { %6684 = sst [smem:[#allocation25_spill]] %s6683_s20  ;;  %s3713_s23 = sshll.u32 %s5683_s21, 2 }
  0x21   : > { %p5689_p0 = pnand %p5143_p13, %p5655_p4  ;;  %s3714_s25 = sshll.u32 %s5557_s9, 2 }
  0x22   : > { %s6686_s3 = sld [smem:[#allocation26_spill]]  ;;  %s364_s13 = scalar_lea.vmem [#allocation8], %s3713_s23 }
  0x23   : > { %s372_s19 = sshll.u32 %s364_s13, 4  ;;  %s361_s29 = scalar_lea.sflag [#allocation9], %s360_s22  ;;  %s373_s19 = int_to_ptr.vmem [resolvable:$true] %s372_s19 }
  0x24   : > { %p3717_p1 = scmp.ge.s32.totalorder %s5561_s10, 1  ;;  %p403_p2 = scmp.lt.s32.totalorder %s5561_s10, 3 }
  0x25   : > { %s3710_s26 = sshll.u32 %s5683_s21, 8  ;;  %s5564_s20 = smov 16  }
  0x26   : > { %p5701_p3 = pnand %p3717_p1, %p403_p2  ;;  %s3715_s10 = sshll.u32 %s5683_s21, 3 }
  0x27   : > { %s3716_s27 = sshll.u32 %s5557_s9, 3  ;;  %s390_s14 = scalar_lea.vmem [#allocation10], %s3715_s10 }
  0x28   : > { %s368_s16 = scalar_lea.hbm %s6686_s3, %s3714_s25  ;;  %s4840_s25 = sshll.u32 %s5557_s9, 8 }
  0x29   : > { %s370_s12 = sshll.u32 %s368_s16, 4  ;;  %s347_s13 = scalar_lea.hbm %s6650_s2, %s4840_s25  ;;  %s371_s12 = int_to_ptr.hbm [resolvable:$true] %s370_s12 }
  0x2a   : > { %5129 = dma.hbm_to_vmem [thread:$0]  (!%p5689_p0), %s371_s12, 64, %s373_s19, %s361_s29  }
  0x2b   : > { %s348_s16 = sshll.u32 %s347_s13, 4  ;;  %s342_s3 = scalar_lea.vmem [#allocation5], %s3710_s26  ;;  %s349_s16 = int_to_ptr.hbm [resolvable:$true] %s348_s16 }
  0x2c   : > { %s350_s22 = sshll.u32 %s342_s3, 4  ;;  %s339_s12 = scalar_lea.sflag [#allocation6], %s5683_s21  ;;  %s351_s22 = int_to_ptr.vmem [resolvable:$true] %s350_s22 }
  0x2d   : > { %s5563_s19 = smov 256   ;;  %s394_s8 = scalar_lea.hbm %s6653_s5, %s3716_s27 }
  0x2e   : > { %5126 = dma.hbm_to_vmem [thread:$0]  (!%p5689_p0), %s349_s16, 4096, %s351_s22, %s339_s12, %s5563_s19, %s5563_s19, %s5564_s20  }
  0x2f   : > { %s396_s7 = sshll.u32 %s394_s8, 4  ;;  %s398_s25 = sshll.u32 %s390_s14, 4  ;;  %s397_s7 = int_to_ptr.hbm [resolvable:$true] %s396_s7  ;;  %s399_s25 = int_to_ptr.vmem [resolvable:$true] %s398_s25 }
  0x30   : > { %5132 = dma.hbm_to_vmem [thread:$0]  (!%p5689_p0), %s397_s7, 128, %s399_s25, %s361_s29  }
  0x31   : > { %407 = sbr.rel (%p5701_p3) target bundleno = 1552 (0x610), region = 44  ;;  %s5723_s3 = sand.u32 (!%p5701_p3), 1, %s5545_s28  }
  0x32   : > { %s3718_s20 = sshll.u32 (!%p5701_p3), %s5723_s3, 8  ;;  %s410_s21 = scalar_lea.sflag (!%p5701_p3), [#allocation6], %s5723_s3 }
  0x33   : > { %s5727_s6 = scalar_lea.vmem (!%p5701_p3), [#allocation5], %s3718_s20 }
  0x36   : > { %5524 = dma.done.wait (%p5663_p8), %s410_s21, 4096  }
  0x37   : > { %5526 = vsyncadd (%p5663_p8), %s410_s21, 4294963200  ;;  %s6669_s7 = sand.u32 1, %s5643_s11   ;;  %s3719_s8 = sshll.u32 %s5723_s3, 2 }
  0x38   : > { %s420_s27 = scalar_lea.sflag [#allocation9], %s6669_s7  ;;  %s5737_s29 = scalar_lea.vmem [#allocation8], %s3719_s8 }
  0x39   : > { %5528 = dma.done.wait (%p5663_p8), %s420_s27, 192  }
  0x3a   : > { %5530 = vsyncadd (%p5663_p8), %s420_s27, 4294967104  ;;  %p519_p4 = scmp.lt.s32.totalorder %s5553_s30, 1  ;;  %v542_v11 = vld [vmem:[%s6648_s0] sm:$0xff]  ;;  %v543_v13 = vld [vmem:[%s6648_s0 + $0x8] sm:$0xff]  ;;  %vm588_vm0 = vcmask 130048   ;;  %p749_p5 = scmp.eq.s32.totalorder %s5553_s30, 0 }
  0x3b   : > { %v3876_v14 = vld [vmem:[%s5727_s6 + $0xe0] sm:$0xf]  ;;  %v4877_v15 = vld [vmem:[%s5727_s6 + $0xec] sm:$0xf0]  ;;  %v550_v16 = vpack.c.bf16 %v543_v13, %v542_v11  ;;  %v4875_v18 = vld [vmem:[%s5727_s6 + $0xe4] sm:$0xf] }
  0x3c   : > { %s5745_s10 = scalar_select %p519_p4, %s5553_s30, 1  ;;  %v3877_v17 = vor.u32 %v4877_v15, %v3876_v14  ;;  %v3878_v19 = vld [vmem:[%s5727_s6 + $0xf0] sm:$0xf0]  ;;  %v4876_v20 = vld [vmem:[%s5727_s6 + $0xec] sm:$0xf]  ;;  %v545_v57 = vld [vmem:[%s6648_s0 + $0x18] sm:$0xff] }
  0x3d   : > { %v3881_v21 = vor.u32 %v4875_v18, %v3878_v19  ;;  %v3886_v22 = vld [vmem:[%s5727_s6 + $0xf8] sm:$0xf0]  ;;  %v3860_v23 = vld [vmem:[%s5727_s6 + $0xc0] sm:$0xf]  ;;  %v4873_v24 = vld [vmem:[%s5727_s6 + $0xcc] sm:$0xf0] }
  0x3e   : > { %s4841_s18 = sshll.u32 %s5745_s10, 5  ;;  %v3889_v25 = vor.u32 %v4876_v20, %v3886_v22  ;;  %v4871_v26 = vld [vmem:[%s5727_s6 + $0xc4] sm:$0xf]  ;;  %v3862_v27 = vld [vmem:[%s5727_s6 + $0xd0] sm:$0xf0]  ;;  %v3861_v30 = vor.u32 %v4873_v24, %v3860_v23  ;;  %s5984_s19 = sshll.u32 %s5723_s3, 3 }
  0x3f   : > { %s523_s26 = scalar_lea.vmem %s6649_s1, %s4841_s18  ;;  %v4872_v28 = vld [vmem:[%s5727_s6 + $0xcc] sm:$0xf]  ;;  %v3870_v29 = vld [vmem:[%s5727_s6 + $0xd8] sm:$0xf0]  ;;  %v3884_v31 = vld [vmem:[%s5727_s6 + $0xe8] sm:$0xf]  ;;  %v3865_v34 = vor.u32 %v4871_v26, %v3862_v27 }
  0x40   : > { %v3729_v0 = vld [vmem:[%s523_s26] sm:$0xf]  ;;  %v4844_v1 = vld [vmem:[%s523_s26 + $0xc] sm:$0xf0]  ;;  %v4842_v2 = vld [vmem:[%s523_s26 + $0x4] sm:$0xf]  ;;  %v3873_v35 = vor.u32 %v4872_v28, %v3870_v29 }
  0x41   : > { %v3730_v3 = vor.u32 %v4844_v1, %v3729_v0  ;;  %v3731_v4 = vld [vmem:[%s523_s26 + $0x10] sm:$0xf0]  ;;  %v3737_v5 = vld [vmem:[%s523_s26 + $0x8] sm:$0xf]  ;;  %v4845_v6 = vld [vmem:[%s523_s26 + $0x14] sm:$0xf0] }
  0x42   : > { %v3734_v7 = vor.u32 %v4842_v2, %v3731_v4  ;;  %v3738_v8 = vor.u32 %v4845_v6, %v3737_v5  ;;  %v4843_v9 = vld [vmem:[%s523_s26 + $0xc] sm:$0xf]  ;;  %v3739_v10 = vld [vmem:[%s523_s26 + $0x18] sm:$0xf0]  ;;  %v4878_v32 = vld [vmem:[%s5727_s6 + $0xf4] sm:$0xf0] }
  0x43   : > { %608 = vmatpush.bf16.msra.mxu0 %v3730_v3  ;;  %v3742_v12 = vor.u32 %v4843_v9, %v3739_v10  ;;  %v3844_v33 = vld [vmem:[%s5727_s6 + $0xa0] sm:$0xf]  ;;  %v3885_v36 = vor.u32 %v4878_v32, %v3884_v31  ;;  %v4869_v37 = vld [vmem:[%s5727_s6 + $0xac] sm:$0xf0]  ;;  %v4867_v38 = vld [vmem:[%s5727_s6 + $0xa4] sm:$0xf] }
  0x44   : > { %637 = vmatpush.bf16.msra.mxu1 %v3734_v7  ;;  %666 = vmatpush.bf16.msra.mxu2 %v3738_v8  ;;  %v3846_v39 = vld [vmem:[%s5727_s6 + $0xb0] sm:$0xf0]  ;;  %v4868_v40 = vld [vmem:[%s5727_s6 + $0xac] sm:$0xf]  ;;  %v3854_v41 = vld [vmem:[%s5727_s6 + $0xb8] sm:$0xf0]  ;;  %v3845_v44 = vor.u32 %v4869_v37, %v3844_v33 }
  0x45   : > { %695 = vmatpush.bf16.msra.mxu3 %v3742_v12  ;;  %v3868_v42 = vld [vmem:[%s5727_s6 + $0xc8] sm:$0xf]  ;;  %v4874_v43 = vld [vmem:[%s5727_s6 + $0xd4] sm:$0xf0]  ;;  %v3828_v46 = vld [vmem:[%s5727_s6 + $0x80] sm:$0xf]  ;;  %v3849_v48 = vor.u32 %v4867_v38, %v3846_v39  ;;  %v3857_v49 = vor.u32 %v4868_v40, %v3854_v41 }
  0x46   : > { %3743 = vmatmul.msk.bf16.vlgmr.msra.gmra.mxu0 %vm588_vm0, %v550_v16  ;;  %v3869_v45 = vor.u32 %v4874_v43, %v3868_v42  ;;  %v4865_v47 = vld [vmem:[%s5727_s6 + $0x8c] sm:$0xf0]  ;;  %v4863_v50 = vld [vmem:[%s5727_s6 + $0x84] sm:$0xf]  ;;  %v3830_v51 = vld [vmem:[%s5727_s6 + $0x90] sm:$0xf0] }
  0x47   : > { %3747 = vmatmul.msk.bf16.vlgmr.msra.gmra.mxu1 %vm588_vm0, %v550_v16  ;;  %3751 = vmatmul.msk.bf16.vlgmr.msra.gmra.mxu2 %vm588_vm0, %v550_v16  ;;  %v4864_v52 = vld [vmem:[%s5727_s6 + $0x8c] sm:$0xf]  ;;  %v3838_v53 = vld [vmem:[%s5727_s6 + $0x98] sm:$0xf0]  ;;  %v3852_v54 = vld [vmem:[%s5727_s6 + $0xa8] sm:$0xf]  ;;  %v3829_v59 = vor.u32 %v4865_v47, %v3828_v46  ;;  %v3833_v60 = vor.u32 %v4863_v50, %v3830_v51 }
  0x48   : > { %3755 = vmatmul.msk.bf16.vlgmr.msra.gmra.mxu3 %vm588_vm0, %v550_v16  ;;  %955 = vmatpush.bf16.msrb.mxu0 %v3877_v17  ;;  %v4870_v55 = vld [vmem:[%s5727_s6 + $0xb4] sm:$0xf0]  ;;  %v544_v56 = vld [vmem:[%s6648_s0 + $0x10] sm:$0xff]  ;;  %v3841_v61 = vor.u32 %v4864_v52, %v3838_v53  ;;  %v3812_v62 = vld [vmem:[%s5727_s6 + $0x60] sm:$0xf]  ;;  %s3726_s26 = sshll.u32 %s5745_s10, 3 }
  0x49   : > { %968 = vmatpush.bf16.msrb.mxu1 %v3881_v21  ;;  %994 = vmatpush.bf16.msrb.mxu3 %v3889_v25  ;;  %v3853_v58 = vor.u32 %v4870_v55, %v3852_v54  ;;  %v4861_v63 = vld [vmem:[%s5727_s6 + $0x6c] sm:$0xf0]  ;;  %v4859_v0 = vld [vmem:[%s5727_s6 + $0x64] sm:$0xf]  ;;  %v551_v1 = vpack.c.bf16 %v545_v57, %v544_v56  ;;  %v3814_v2 = vld [vmem:[%s5727_s6 + $0x70] sm:$0xf0]  ;;  %s527_s13 = scalar_lea.vmem %s6652_s4, %s3726_s26 }
  0x4a   : > { %981 = vmatpush.bf16.msrb.mxu2 %v3885_v36  ;;  %v4860_v3 = vld [vmem:[%s5727_s6 + $0x6c] sm:$0xf]  ;;  %v3822_v4 = vld [vmem:[%s5727_s6 + $0x78] sm:$0xf0]  ;;  %v3836_v5 = vld [vmem:[%s5727_s6 + $0x88] sm:$0xf]  ;;  %v3813_v7 = vor.u32 %v4861_v63, %v3812_v62  ;;  %v3817_v8 = vor.u32 %v4859_v0, %v3814_v2 }
  0x4b   : > { %v4866_v6 = vld [vmem:[%s5727_s6 + $0x94] sm:$0xf0]  ;;  %v3825_v9 = vor.u32 %v4860_v3, %v3822_v4  ;;  %v3796_v10 = vld [vmem:[%s5727_s6 + $0x40] sm:$0xf]  ;;  %v4857_v11 = vld [vmem:[%s5727_s6 + $0x4c] sm:$0xf0] }
  0x4c   : > { %956 = vmatpush.bf16.msrb.mxu0 %v3861_v30  ;;  %v4855_v12 = vld [vmem:[%s5727_s6 + $0x44] sm:$0xf]  ;;  %v3837_v13 = vor.u32 %v4866_v6, %v3836_v5  ;;  %v3798_v14 = vld [vmem:[%s5727_s6 + $0x50] sm:$0xf0]  ;;  %v4856_v15 = vld [vmem:[%s5727_s6 + $0x4c] sm:$0xf]  ;;  %v3797_v17 = vor.u32 %v4857_v11, %v3796_v10 }
  0x4d   : > { %969 = vmatpush.bf16.msrb.mxu1 %v3865_v34  ;;  %995 = vmatpush.bf16.msrb.mxu3 %v3873_v35  ;;  %v3806_v16 = vld [vmem:[%s5727_s6 + $0x58] sm:$0xf0]  ;;  %v3820_v18 = vld [vmem:[%s5727_s6 + $0x68] sm:$0xf]  ;;  %v4862_v19 = vld [vmem:[%s5727_s6 + $0x74] sm:$0xf0]  ;;  %v3801_v20 = vor.u32 %v4855_v12, %v3798_v14 }
  0x4e   : > { %982 = vmatpush.bf16.msrb.mxu2 %v3869_v45  ;;  %v3809_v21 = vor.u32 %v4856_v15, %v3806_v16  ;;  %v3780_v22 = vld [vmem:[%s5727_s6 + $0x20] sm:$0xf]  ;;  %v4853_v23 = vld [vmem:[%s5727_s6 + $0x2c] sm:$0xf0]  ;;  %v3821_v24 = vor.u32 %v4862_v19, %v3820_v18  ;;  %v4851_v25 = vld [vmem:[%s5727_s6 + $0x24] sm:$0xf] }
  0x4f   : > { %v3782_v26 = vld [vmem:[%s5727_s6 + $0x30] sm:$0xf0]  ;;  %v4852_v27 = vld [vmem:[%s5727_s6 + $0x2c] sm:$0xf]  ;;  %v3804_v28 = vld [vmem:[%s5727_s6 + $0x48] sm:$0xf]  ;;  %v3781_v31 = vor.u32 %v4853_v23, %v3780_v22 }
  0x50   : > { %957 = vmatpush.bf16.msrb.mxu0 %v3845_v44  ;;  %v4858_v29 = vld [vmem:[%s5727_s6 + $0x54] sm:$0xf0]  ;;  %v3790_v30 = vld [vmem:[%s5727_s6 + $0x38] sm:$0xf0]  ;;  %v546_v32 = vld [vmem:[%s6648_s0 + $0x20] sm:$0xff]  ;;  %v3785_v33 = vor.u32 %v4851_v25, %v3782_v26  ;;  %s433_s14 = scalar_lea.vmem [#allocation10], %s5984_s19 }
  0x51   : > { %970 = vmatpush.bf16.msrb.mxu1 %v3849_v48  ;;  %996 = vmatpush.bf16.msrb.mxu3 %v3857_v49  ;;  %v3793_v34 = vor.u32 %v4852_v27, %v3790_v30  ;;  %v3764_v35 = vld [vmem:[%s5727_s6] sm:$0xf]  ;;  %v4849_v36 = vld [vmem:[%s5727_s6 + $0xc] sm:$0xf0]  ;;  %v4847_v37 = vld [vmem:[%s5727_s6 + $0x4] sm:$0xf]  ;;  %v3805_v38 = vor.u32 %v4858_v29, %v3804_v28 }
  0x52   : > { %983 = vmatpush.bf16.msrb.mxu2 %v3853_v58  ;;  %v3766_v39 = vld [vmem:[%s5727_s6 + $0x10] sm:$0xf0]  ;;  %v4848_v40 = vld [vmem:[%s5727_s6 + $0xc] sm:$0xf]  ;;  %v3774_v41 = vld [vmem:[%s5727_s6 + $0x18] sm:$0xf0]  ;;  %v3765_v45 = vor.u32 %v4849_v36, %v3764_v35 }
  0x53   : > { %v547_v42 = vld [vmem:[%s6648_s0 + $0x28] sm:$0xff]  ;;  %v4854_v44 = vld [vmem:[%s5727_s6 + $0x34] sm:$0xf0]  ;;  %v3769_v46 = vor.u32 %v4847_v37, %v3766_v39  ;;  %v3777_v47 = vor.u32 %v4848_v40, %v3774_v41  ;;  %v548_v53 = vld [vmem:[%s6648_s0 + $0x30] sm:$0xff]  ;;  %s3721_s25 = sshll.u32 %s5723_s3, 6 }
  0x54   : > { %958 = vmatpush.bf16.msrb.mxu0 %v3829_v59  ;;  %v3788_v43 = vld [vmem:[%s5727_s6 + $0x28] sm:$0xf]  ;;  %v552_v48 = vpack.c.bf16 %v547_v42, %v546_v32  ;;  %v4850_v51 = vld [vmem:[%s5727_s6 + $0x14] sm:$0xf0]  ;;  %v538_v56 = vld [vmem:[%s527_s13] sm:$0xff]  ;;  %s5991_s20 = scalar_lea.vmem [#allocation11], %s3721_s25 }
  0x55   : > { %971 = vmatpush.bf16.msrb.mxu1 %v3833_v60  ;;  %997 = vmatpush.bf16.msrb.mxu3 %v3841_v61  ;;  %v3789_v49 = vor.u32 %v4854_v44, %v3788_v43  ;;  %v3772_v50 = vld [vmem:[%s5727_s6 + $0x8] sm:$0xf]  ;;  %v549_v54 = vld [vmem:[%s6648_s0 + $0x38] sm:$0xff]  ;;  %v762_v57 = vpack.c.bf16 %v538_v56, %v538_v56  ;;  %v558_v58 = vld [vmem:[%s5737_s29] sm:$0xf] }
  0x56   : > { %3744 = vmatmul.msk.bf16.gmra.mxu0 %vm588_vm0, %v551_v1  ;;  %984 = vmatpush.bf16.msrb.mxu2 %v3837_v13  ;;  %v3773_v52 = vor.u32 %v4850_v51, %v3772_v50  ;;  %v553_v55 = vpack.c.bf16 %v549_v54, %v548_v53  ;;  %v5860_v59 = vperm.slane %v558_v58, 0  ;;  %v5862_v60 = vperm.slane %v558_v58, 1  ;;  %s5893_s29 = scalar_select %p749_p5, 0, 7  ;;  %v4012_v54 = vld [vmem:[%s5727_s6 + $0xf0] sm:$0xf0] }
  0x57   : > { %3748 = vmatmul.msk.bf16.gmra.mxu1 %vm588_vm0, %v551_v1  ;;  %3752 = vmatmul.msk.bf16.gmra.mxu2 %vm588_vm0, %v551_v1  ;;  %v5868_v2 = vperm.slane %v558_v58, 3  ;;  %v4911_v56 = vld [vmem:[%s5727_s6 + $0xf4] sm:$0xf0]  ;;  %s5998_s8 = scalar_select %p749_p5, 1, 6 }
  0x58   : > { %3756 = vmatmul.msk.bf16.gmra.mxu3 %vm588_vm0, %v551_v1  ;;  %959 = vmatpush.bf16.msrb.mxu0 %v3813_v7  ;;  %v5866_v1 = vperm.slane %v558_v58, 2  ;;  %s3759_s10 = sshll.u32 %s5893_s29, 3 }
  0x59   : > { %972 = vmatpush.bf16.msrb.mxu1 %v3817_v8  ;;  %998 = vmatpush.bf16.msrb.mxu3 %v3825_v9  ;;  %s5917_s16 = sshra.s32 %s3759_s10, 3  ;;  %s1077_s21 = scalar_lea.vmem %s5991_s20, %s3759_s10 [#allocation11] }
  0x5a   : > { %985 = vmatpush.bf16.msrb.mxu2 %v3821_v24  ;;  %s4846_s22 = sshll.u32 %s5917_s16, 5  ;;  %s3893_s27 = sshll.u32 %s5998_s8, 3 }
  0x5b   : > { %s5953_s12 = scalar_lea.vmem [#allocation2], %s4846_s22  ;;  %s6019_s18 = sshra.s32 %s3893_s27, 3 }
  0x5c   : > { %960 = vmatpush.bf16.msrb.mxu0 %v3797_v17  ;;  %s4879_s24 = sshll.u32 %s6019_s18, 5  ;;  %s1406_s26 = scalar_lea.vmem %s5991_s20, %s3893_s27 [#allocation11] }
  0x5d   : > { %973 = vmatpush.bf16.msrb.mxu1 %v3801_v20  ;;  %999 = vmatpush.bf16.msrb.mxu3 %v3809_v21  ;;  %s6048_s15 = scalar_lea.vmem [#allocation2], %s4879_s24 }
  0x5e   : > { %986 = vmatpush.bf16.msrb.mxu2 %v3805_v38  ;;  %s6087_s17 = scalar_select %p749_p5, 2, 5 }
  0x5f   : > { %s6176_s22 = scalar_select %p749_p5, 3, 4 }
  0x60   : > { %961 = vmatpush.bf16.msrb.mxu0 %v3781_v31  ;;  %s4027_s23 = sshll.u32 %s6087_s17, 3 }
  0x61   : > { %974 = vmatpush.bf16.msrb.mxu1 %v3785_v33  ;;  %1000 = vmatpush.bf16.msrb.mxu3 %v3793_v34  ;;  %s6108_s13 = sshra.s32 %s4027_s23, 3  ;;  %s1735_s16 = scalar_lea.vmem %s5991_s20, %s4027_s23 [#allocation11] }
  0x62   : > { %987 = vmatpush.bf16.msrb.mxu2 %v3789_v49  ;;  %v4908_v49 = vld [vmem:[%s5727_s6 + $0xe4] sm:$0xf]  ;;  %s4912_s29 = sshll.u32 %s6108_s13, 5 }
  0x63   : > { %v4015_v58 = vor.u32 %v4908_v49, %v4012_v54  ;;  %v3946_v49 = vld [vmem:[%s5727_s6 + $0x60] sm:$0xf]  ;;  %s6137_s10 = scalar_lea.vmem [#allocation2], %s4912_s29 }
  0x64   : > { %962 = vmatpush.bf16.msrb.mxu0 %v3765_v45  ;;  %s6265_s27 = scalar_select %p749_p5, 4, 3 }
  0x65   : > { %975 = vmatpush.bf16.msrb.mxu1 %v3769_v46  ;;  %1001 = vmatpush.bf16.msrb.mxu3 %v3777_v47  ;;  %v4010_v47 = vld [vmem:[%s5727_s6 + $0xe0] sm:$0xf]  ;;  %s6354_s23 = scalar_select %p749_p5, 5, 2 }
  0x66   : > { %3745 = vmatmul.msk.bf16.gmra.mxu0 %vm588_vm0, %v552_v48  ;;  %988 = vmatpush.bf16.msrb.mxu2 %v3773_v52  ;;  %s4295_s18 = sshll.u32 %s6265_s27, 3 }
  0x67   : > { %3749 = vmatmul.msk.bf16.gmra.mxu1 %vm588_vm0, %v552_v48  ;;  %3753 = vmatmul.msk.bf16.gmra.mxu2 %vm588_vm0, %v552_v48  ;;  %s6286_s24 = sshra.s32 %s4295_s18, 3  ;;  %s2393_s17 = scalar_lea.vmem %s5991_s20, %s4295_s18 [#allocation11] }
  0x68   : > { %3757 = vmatmul.msk.bf16.gmra.mxu3 %vm588_vm0, %v552_v48  ;;  %v4910_v48 = vld [vmem:[%s5727_s6 + $0xec] sm:$0xf0]  ;;  %s4429_s13 = sshll.u32 %s6354_s23, 3 }
  0x69   : > { %v4011_v53 = vor.u32 %v4910_v48, %v4010_v47  ;;  %1297 = vmatpush.bf16.msra.mxu1 %v4015_v58  ;;  %s6375_s29 = sshra.s32 %s4429_s13, 3 }
  0x6a   : > { %s6542_s27 = scalar_select %p749_p5, 7, 0 }
  0x6b   : > { %1284 = vmatpush.bf16.msra.mxu0 %v4011_v53 }
  0x6c   : > { %s4697_s18 = sshll.u32 %s6542_s27, 3 }
  0x76   : > { %3746 = vmatmul.msk.bf16.gmra.mxu0 %vm588_vm0, %v553_v55 }
  0x77   : > { %3750 = vmatmul.msk.bf16.gmra.mxu1 %vm588_vm0, %v553_v55  ;;  %3754 = vmatmul.msk.bf16.gmra.mxu2 %vm588_vm0, %v553_v55 }
  0x78   : > { %3758 = vmatmul.msk.bf16.gmra.mxu3 %vm588_vm0, %v553_v55  ;;  %v4018_v55 = vld [vmem:[%s5727_s6 + $0xe8] sm:$0xf] }
  0x86   : > { %963 = vmatmul.bf16.vlgmr.msrb.gmra.mxu0 %v762_v57 }
  0x87   : > { %976 = vmatmul.bf16.vlgmr.msrb.gmra.mxu1 %v762_v57  ;;  %989 = vmatmul.bf16.vlgmr.msrb.gmra.mxu2 %v762_v57 }
  0x88   : > { %1002 = vmatmul.bf16.vlgmr.msrb.gmra.mxu3 %v762_v57 }
  0xc3   : > { %v610_v61 = vpop.f32.mrf.mxu0 }
  0xc4   : > { %v611_v62 = vadd.f32 %v610_v61, %v5860_v59  ;;  %v639_v63 = vpop.f32.mrf.mxu1  ;;  %v4019_v61 = vor.u32 %v4911_v56, %v4018_v55  ;;  %v3948_v55 = vld [vmem:[%s5727_s6 + $0x70] sm:$0xf0]  ;;  %v3954_v56 = vld [vmem:[%s5727_s6 + $0x68] sm:$0xf] }
  0xc5   : > { %v640_v0 = vadd.f32 %v639_v63, %v5862_v60  ;;  %v4020_v63 = vld [vmem:[%s5727_s6 + $0xf8] sm:$0xf0] }
  0xc6   : > { %717 = vst [vmem:[#allocation2] sm:$0xff] %v611_v62  ;;  %v4909_v62 = vld [vmem:[%s5727_s6 + $0xec] sm:$0xf]  ;;  %1310 = vmatpush.bf16.msra.mxu2 %v4019_v61 }
  0xc7   : > { %718 = vst [vmem:[#allocation2 + $0x8] sm:$0xff] %v640_v0  ;;  %v4023_v0 = vor.u32 %v4909_v62, %v4020_v63  ;;  %v4893_v61 = vld [vmem:[%s5727_s6 + $0x6c] sm:$0xf]  ;;  %v3956_v62 = vld [vmem:[%s5727_s6 + $0x78] sm:$0xf0] }
  0xc8   : > { %v3959_v63 = vor.u32 %v4893_v61, %v3956_v62 }
  0xc9   : > { %1323 = vmatpush.bf16.msra.mxu3 %v4023_v0 }
  0xca   : > { %v668_v3 = vpop.f32.mrf.mxu2 }
  0xcb   : > { %v669_v4 = vadd.f32 %v668_v3, %v5866_v1  ;;  %v697_v5 = vpop.f32.mrf.mxu3  ;;  %v612_v6 = vpop.f32.mrf.mxu0  ;;  %v3994_v3 = vld [vmem:[%s5727_s6 + $0xc0] sm:$0xf] }
  0xcc   : > { %v698_v7 = vadd.f32 %v697_v5, %v5868_v2  ;;  %v613_v8 = vadd.f32 %v612_v6, %v5860_v59  ;;  %v641_v9 = vpop.f32.mrf.mxu1  ;;  %v4904_v6 = vld [vmem:[%s5727_s6 + $0xc4] sm:$0xf] }
  0xcd   : > { %719 = vst [vmem:[#allocation2 + $0x10] sm:$0xff] %v669_v4  ;;  %v642_v10 = vadd.f32 %v641_v9, %v5862_v60  ;;  %v4906_v4 = vld [vmem:[%s5727_s6 + $0xcc] sm:$0xf0]  ;;  %v4002_v9 = vld [vmem:[%s5727_s6 + $0xc8] sm:$0xf] }
  0xce   : > { %720 = vst [vmem:[#allocation2 + $0x18] sm:$0xff] %v698_v7  ;;  %v3995_v5 = vor.u32 %v4906_v4, %v3994_v3  ;;  %v3996_v7 = vld [vmem:[%s5727_s6 + $0xd0] sm:$0xf0]  ;;  %v3930_v4 = vld [vmem:[%s5727_s6 + $0x40] sm:$0xf] }
  0xcf   : > { %721 = vst [vmem:[#allocation2 + $0x20] sm:$0xff] %v613_v8  ;;  %v3999_v8 = vor.u32 %v4904_v6, %v3996_v7 }
  0xd0   : > { %722 = vst [vmem:[#allocation2 + $0x28] sm:$0xff] %v642_v10  ;;  %v4907_v10 = vld [vmem:[%s5727_s6 + $0xd4] sm:$0xf0]  ;;  %1285 = vmatpush.bf16.msra.mxu0 %v3995_v5  ;;  %v4890_v5 = vld [vmem:[%s5727_s6 + $0x4c] sm:$0xf0] }
  0xd1   : > { %1298 = vmatpush.bf16.msra.mxu1 %v3999_v8  ;;  %v3931_v7 = vor.u32 %v4890_v5, %v3930_v4  ;;  %v4888_v8 = vld [vmem:[%s5727_s6 + $0x44] sm:$0xf] }
  0xd2   : > { %v670_v11 = vpop.f32.mrf.mxu2 }
  0xd3   : > { %v671_v12 = vadd.f32 %v670_v11, %v5866_v1  ;;  %v699_v13 = vpop.f32.mrf.mxu3  ;;  %v615_v14 = vpop.f32.mrf.mxu0  ;;  %v4905_v11 = vld [vmem:[%s5727_s6 + $0xcc] sm:$0xf] }
  0xd4   : > { %v700_v15 = vadd.f32 %v699_v13, %v5868_v2  ;;  %v616_v16 = vadd.f32 %v615_v14, %v5860_v59  ;;  %v644_v17 = vpop.f32.mrf.mxu1  ;;  %v4003_v13 = vor.u32 %v4907_v10, %v4002_v9  ;;  %v4004_v14 = vld [vmem:[%s5727_s6 + $0xd8] sm:$0xf0]  ;;  %v3932_v9 = vld [vmem:[%s5727_s6 + $0x50] sm:$0xf0]  ;;  %v3938_v10 = vld [vmem:[%s5727_s6 + $0x48] sm:$0xf] }
  0xd5   : > { %723 = vst [vmem:[#allocation2 + $0x30] sm:$0xff] %v671_v12  ;;  %v645_v18 = vadd.f32 %v644_v17, %v5862_v60 }
  0xd6   : > { %724 = vst [vmem:[#allocation2 + $0x38] sm:$0xff] %v700_v15  ;;  %1311 = vmatpush.bf16.msra.mxu2 %v4003_v13  ;;  %v4891_v13 = vld [vmem:[%s5727_s6 + $0x54] sm:$0xf0] }
  0xd7   : > { %725 = vst [vmem:[#allocation2 + $0x40] sm:$0xff] %v616_v16 }
  0xd8   : > { %726 = vst [vmem:[#allocation2 + $0x48] sm:$0xff] %v645_v18  ;;  %v4007_v18 = vor.u32 %v4905_v11, %v4004_v14  ;;  %v4889_v14 = vld [vmem:[%s5727_s6 + $0x4c] sm:$0xf] }
  0xda   : > { %v673_v19 = vpop.f32.mrf.mxu2  ;;  %1324 = vmatpush.bf16.msra.mxu3 %v4007_v18  ;;  %v3940_v18 = vld [vmem:[%s5727_s6 + $0x58] sm:$0xf0] }
  0xdb   : > { %v674_v20 = vadd.f32 %v673_v19, %v5866_v1  ;;  %v702_v21 = vpop.f32.mrf.mxu3  ;;  %v617_v22 = vpop.f32.mrf.mxu0  ;;  %v3978_v19 = vld [vmem:[%s5727_s6 + $0xa0] sm:$0xf] }
  0xdc   : > { %v703_v23 = vadd.f32 %v702_v21, %v5868_v2  ;;  %v618_v24 = vadd.f32 %v617_v22, %v5860_v59  ;;  %v646_v25 = vpop.f32.mrf.mxu1  ;;  %v4900_v21 = vld [vmem:[%s5727_s6 + $0xa4] sm:$0xf] }
  0xdd   : > { %727 = vst [vmem:[#allocation2 + $0x50] sm:$0xff] %v674_v20  ;;  %v647_v26 = vadd.f32 %v646_v25, %v5862_v60  ;;  %v4902_v20 = vld [vmem:[%s5727_s6 + $0xac] sm:$0xf0] }
  0xde   : > { %728 = vst [vmem:[#allocation2 + $0x58] sm:$0xff] %v703_v23  ;;  %v3979_v25 = vor.u32 %v4902_v20, %v3978_v19  ;;  %v3914_v19 = vld [vmem:[%s5727_s6 + $0x20] sm:$0xf] }
  0xdf   : > { %729 = vst [vmem:[#allocation2 + $0x60] sm:$0xff] %v618_v24 }
  0xe0   : > { %730 = vst [vmem:[#allocation2 + $0x68] sm:$0xff] %v647_v26  ;;  %v3980_v26 = vld [vmem:[%s5727_s6 + $0xb0] sm:$0xf0]  ;;  %1286 = vmatpush.bf16.msra.mxu0 %v3979_v25 }
  0xe1   : > { %v3916_v25 = vld [vmem:[%s5727_s6 + $0x30] sm:$0xf0] }
  0xe2   : > { %v675_v27 = vpop.f32.mrf.mxu2 }
  0xe3   : > { %v676_v28 = vadd.f32 %v675_v27, %v5866_v1  ;;  %v704_v29 = vpop.f32.mrf.mxu3  ;;  %v620_v30 = vpop.f32.mrf.mxu0  ;;  %v3986_v27 = vld [vmem:[%s5727_s6 + $0xa8] sm:$0xf] }
  0xe4   : > { %v705_v31 = vadd.f32 %v704_v29, %v5868_v2  ;;  %v621_v32 = vadd.f32 %v620_v30, %v5860_v59  ;;  %v649_v33 = vpop.f32.mrf.mxu1  ;;  %v3983_v30 = vor.u32 %v4900_v21, %v3980_v26 }
  0xe5   : > { %731 = vst [vmem:[#allocation2 + $0x70] sm:$0xff] %v676_v28  ;;  %v650_v34 = vadd.f32 %v649_v33, %v5862_v60  ;;  %v4903_v28 = vld [vmem:[%s5727_s6 + $0xb4] sm:$0xf0]  ;;  %v3988_v33 = vld [vmem:[%s5727_s6 + $0xb8] sm:$0xf0] }
  0xe6   : > { %732 = vst [vmem:[#allocation2 + $0x78] sm:$0xff] %v705_v31  ;;  %v3987_v31 = vor.u32 %v4903_v28, %v3986_v27  ;;  %1299 = vmatpush.bf16.msra.mxu1 %v3983_v30  ;;  %v4887_v30 = vld [vmem:[%s5727_s6 + $0x34] sm:$0xf0] }
  0xe7   : > { %733 = vst [vmem:[#allocation2 + $0x80] sm:$0xff] %v621_v32  ;;  %v4901_v32 = vld [vmem:[%s5727_s6 + $0xac] sm:$0xf] }
  0xe8   : > { %734 = vst [vmem:[#allocation2 + $0x88] sm:$0xff] %v650_v34  ;;  %v3962_v34 = vld [vmem:[%s5727_s6 + $0x80] sm:$0xf]  ;;  %1312 = vmatpush.bf16.msra.mxu2 %v3987_v31 }
  0xea   : > { %v678_v35 = vpop.f32.mrf.mxu2 }
  0xeb   : > { %v679_v36 = vadd.f32 %v678_v35, %v5866_v1  ;;  %v707_v37 = vpop.f32.mrf.mxu3  ;;  %v622_v38 = vpop.f32.mrf.mxu0  ;;  %v4898_v35 = vld [vmem:[%s5727_s6 + $0x8c] sm:$0xf0] }
  0xec   : > { %v708_v39 = vadd.f32 %v707_v37, %v5868_v2  ;;  %v623_v40 = vadd.f32 %v622_v38, %v5860_v59  ;;  %v651_v41 = vpop.f32.mrf.mxu1  ;;  %v3964_v37 = vld [vmem:[%s5727_s6 + $0x90] sm:$0xf0] }
  0xed   : > { %735 = vst [vmem:[#allocation2 + $0x90] sm:$0xff] %v679_v36  ;;  %v652_v42 = vadd.f32 %v651_v41, %v5862_v60  ;;  %v4896_v36 = vld [vmem:[%s5727_s6 + $0x84] sm:$0xf]  ;;  %v4897_v41 = vld [vmem:[%s5727_s6 + $0x8c] sm:$0xf] }
  0xee   : > { %736 = vst [vmem:[#allocation2 + $0x98] sm:$0xff] %v708_v39  ;;  %v3967_v38 = vor.u32 %v4896_v36, %v3964_v37  ;;  %v3970_v39 = vld [vmem:[%s5727_s6 + $0x88] sm:$0xf]  ;;  %v4882_v36 = vld [vmem:[%s5727_s6 + $0xc] sm:$0xf0] }
  0xef   : > { %737 = vst [vmem:[#allocation2 + $0xa0] sm:$0xff] %v623_v40  ;;  %v4899_v40 = vld [vmem:[%s5727_s6 + $0x94] sm:$0xf0]  ;;  %v4880_v37 = vld [vmem:[%s5727_s6 + $0x4] sm:$0xf] }
  0xf0   : > { %738 = vst [vmem:[#allocation2 + $0xa8] sm:$0xff] %v652_v42  ;;  %1300 = vmatpush.bf16.msra.mxu1 %v3967_v38 }
  0xf2   : > { %v680_v43 = vpop.f32.mrf.mxu2 }
  0xf3   : > { %v681_v44 = vadd.f32 %v680_v43, %v5866_v1  ;;  %v709_v45 = vpop.f32.mrf.mxu3  ;;  %v625_v46 = vpop.f32.mrf.mxu0  ;;  %v3971_v43 = vor.u32 %v4899_v40, %v3970_v39  ;;  %v3900_v39 = vld [vmem:[%s5727_s6 + $0x10] sm:$0xf0]  ;;  %v3906_v40 = vld [vmem:[%s5727_s6 + $0x8] sm:$0xf] }
  0xf4   : > { %v710_v50 = vadd.f32 %v709_v45, %v5868_v2  ;;  %v626_v51 = vadd.f32 %v625_v46, %v5860_v59  ;;  %v654_v52 = vpop.f32.mrf.mxu1 }
  0xf5   : > { %739 = vst [vmem:[#allocation2 + $0xb0] sm:$0xff] %v681_v44  ;;  %v655_v57 = vadd.f32 %v654_v52, %v5862_v60  ;;  %v3972_v44 = vld [vmem:[%s5727_s6 + $0x98] sm:$0xf0]  ;;  %1313 = vmatpush.bf16.msra.mxu2 %v3971_v43  ;;  %v3903_v43 = vor.u32 %v4880_v37, %v3900_v39  ;;  %v4152_v37 = vld [vmem:[%s5727_s6 + $0xe8] sm:$0xf] }
  0xf6   : > { %740 = vst [vmem:[#allocation2 + $0xb8] sm:$0xff] %v710_v50  ;;  %v3975_v48 = vor.u32 %v4897_v41, %v3972_v44  ;;  %v4894_v50 = vld [vmem:[%s5727_s6 + $0x6c] sm:$0xf0]  ;;  %v4883_v41 = vld [vmem:[%s5727_s6 + $0x14] sm:$0xf0] }
  0xf7   : > { %741 = vst [vmem:[#allocation2 + $0xc0] sm:$0xff] %v626_v51  ;;  %v4892_v51 = vld [vmem:[%s5727_s6 + $0x64] sm:$0xf]  ;;  %v3947_v54 = vor.u32 %v4894_v50, %v3946_v49  ;;  %v3907_v44 = vor.u32 %v4883_v41, %v3906_v40  ;;  %v4942_v41 = vld [vmem:[%s5727_s6 + $0xec] sm:$0xf] }
  0xf8   : > { %742 = vst [vmem:[#allocation2 + $0xc8] sm:$0xff] %v655_v57  ;;  %v4895_v57 = vld [vmem:[%s5727_s6 + $0x74] sm:$0xf0] }
  0xf9   : > { %v3955_v58 = vor.u32 %v4895_v57, %v3954_v56 }
  0xfa   : > { %v683_v12 = vpop.f32.mrf.mxu2 }
  0xfb   : > { %v684_v15 = vadd.f32 %v683_v12, %v5866_v1  ;;  %v712_v16 = vpop.f32.mrf.mxu3  ;;  %v627_v17 = vpop.f32.mrf.mxu0  ;;  %1314 = vmatpush.bf16.msra.mxu2 %v3955_v58  ;;  %v3935_v12 = vor.u32 %v4888_v8, %v3932_v9 }
  0xfc   : > { %v713_v22 = vadd.f32 %v712_v16, %v5868_v2  ;;  %v628_v23 = vadd.f32 %v627_v17, %v5860_v59  ;;  %v656_v24 = vpop.f32.mrf.mxu1  ;;  %v3991_v59 = vor.u32 %v4901_v32, %v3988_v33  ;;  %v3939_v17 = vor.u32 %v4891_v13, %v3938_v10  ;;  %v4885_v33 = vld [vmem:[%s5727_s6 + $0x2c] sm:$0xf] }
  0xfd   : > { %743 = vst [vmem:[#allocation2 + $0xd0] sm:$0xff] %v684_v15  ;;  %v657_v29 = vadd.f32 %v656_v24, %v5862_v60  ;;  %v3963_v60 = vor.u32 %v4898_v35, %v3962_v34  ;;  %v4884_v24 = vld [vmem:[%s5727_s6 + $0x24] sm:$0xf] }
  0xfe   : > { %744 = vst [vmem:[#allocation2 + $0xd8] sm:$0xff] %v713_v22  ;;  %1325 = vmatpush.bf16.msra.mxu3 %v3991_v59  ;;  %v3943_v22 = vor.u32 %v4889_v14, %v3940_v18  ;;  %v3919_v28 = vor.u32 %v4884_v24, %v3916_v25  ;;  %v3924_v59 = vld [vmem:[%s5727_s6 + $0x38] sm:$0xf0]  ;;  %v540_v14 = vld [vmem:[%s433_s14] sm:$0xff] }
  0xff   : > { %745 = vst [vmem:[#allocation2 + $0xe0] sm:$0xff] %v628_v23  ;;  %1287 = vmatpush.bf16.msra.mxu0 %v3963_v60  ;;  %v4886_v23 = vld [vmem:[%s5727_s6 + $0x2c] sm:$0xf0]  ;;  %1315 = vmatpush.bf16.msra.mxu2 %v3939_v17  ;;  %v3927_v35 = vor.u32 %v4885_v33, %v3924_v59  ;;  %v3898_v60 = vld [vmem:[%s5727_s6] sm:$0xf] }
 0x100   : > { %746 = vst [vmem:[#allocation2 + $0xe8] sm:$0xff] %v657_v29  ;;  %v3915_v27 = vor.u32 %v4886_v23, %v3914_v19  ;;  %v3922_v29 = vld [vmem:[%s5727_s6 + $0x28] sm:$0xf]  ;;  %v3899_v38 = vor.u32 %v4882_v36, %v3898_v60  ;;  %v4144_v59 = vld [vmem:[%s5727_s6 + $0xe0] sm:$0xf] }
 0x101   : > { %v3923_v32 = vor.u32 %v4887_v30, %v3922_v29  ;;  %v4146_v36 = vld [vmem:[%s5727_s6 + $0xf0] sm:$0xf0] }
 0x102   : > { %v685_v42 = vpop.f32.mrf.mxu2  ;;  %1326 = vmatpush.bf16.msra.mxu3 %v3975_v48 }
 0x103   : > { %v686_v45 = vadd.f32 %v685_v42, %v5866_v1  ;;  %v714_v46 = vpop.f32.mrf.mxu3  ;;  %v964_v47 = vpop.f32.mrf.mxu0  ;;  %v3951_v1 = vor.u32 %v4892_v51, %v3948_v55  ;;  %1288 = vmatpush.bf16.msra.mxu0 %v3947_v54  ;;  %1316 = vmatpush.bf16.msra.mxu2 %v3923_v32 }
 0x104   : > { %v715_v52 = vadd.f32 %v714_v46, %v5868_v2  ;;  %v977_v53 = vpop.f32.mrf.mxu1  ;;  %v3908_v46 = vld [vmem:[%s5727_s6 + $0x18] sm:$0xf0] }
 0x105   : > { %747 = vst [vmem:[#allocation2 + $0xf0] sm:$0xff] %v686_v45  ;;  %1301 = vmatpush.bf16.msra.mxu1 %v3951_v1  ;;  %v4881_v45 = vld [vmem:[%s5727_s6 + $0xc] sm:$0xf] }
 0x106   : > { %748 = vst [vmem:[#allocation2 + $0xf8] sm:$0xff] %v715_v52  ;;  %1327 = vmatpush.bf16.msra.mxu3 %v3959_v63  ;;  %v3911_v48 = vor.u32 %v4881_v45, %v3908_v46  ;;  %v4939_v45 = vld [vmem:[%s5727_s6 + $0xcc] sm:$0xf0]  ;;  %v4937_v46 = vld [vmem:[%s5727_s6 + $0xc4] sm:$0xf] }
 0x107   : > { %1289 = vmatpush.bf16.msra.mxu0 %v3931_v7  ;;  %1317 = vmatpush.bf16.msra.mxu2 %v3907_v44  ;;  %v4128_v44 = vld [vmem:[%s5727_s6 + $0xc0] sm:$0xf] }
 0x109   : > { %1302 = vmatpush.bf16.msra.mxu1 %v3935_v12 }
 0x10a   : > { %v990_v16 = vpop.f32.mrf.mxu2  ;;  %1328 = vmatpush.bf16.msra.mxu3 %v3943_v22 }
 0x10b   : > { %v1003_v20 = vpop.f32.mrf.mxu3  ;;  %v966_v21 = vpop.f32.mrf.mxu0  ;;  %1290 = vmatpush.bf16.msra.mxu0 %v3915_v27 }
 0x10c   : > { %v979_v26 = vpop.f32.mrf.mxu1 }
 0x10d   : > { %v757_v2 = vld [vmem:[%s5953_s12] sm:$0xff]  ;;  %v758_v3 = vld [vmem:[%s5953_s12 + $0x8] sm:$0xff]  ;;  %v760_v31 = vld [vmem:[%s5953_s12 + $0x18] sm:$0xff]  ;;  %1303 = vmatpush.bf16.msra.mxu1 %v3919_v28 }
 0x10e   : > { %v1007_v0 = vadd.f32 %v964_v47, %v757_v2  ;;  %v1008_v6 = vadd.f32 %v977_v53, %v758_v3  ;;  %v1010_v34 = vadd.f32 %v1003_v20, %v760_v31  ;;  %1329 = vmatpush.bf16.msra.mxu3 %v3927_v35  ;;  %v759_v54 = vld [vmem:[%s5953_s12 + $0x10] sm:$0xff]  ;;  %v4941_v35 = vld [vmem:[%s5727_s6 + $0xe4] sm:$0xf]  ;;  %s4161_s12 = sshll.u32 %s6176_s22, 3  ;;  %s2722_s22 = scalar_lea.vmem %s5991_s20, %s4429_s13 [#allocation11] }
 0x10f   : > { %1291 = vmatpush.bf16.msra.mxu0 %v3899_v38  ;;  %v1009_v1 = vadd.f32 %v990_v16, %v759_v54  ;;  %v4944_v38 = vld [vmem:[%s5727_s6 + $0xf4] sm:$0xf0]  ;;  %v4149_v39 = vor.u32 %v4941_v35, %v4146_v36  ;;  %v4138_v54 = vld [vmem:[%s5727_s6 + $0xd8] sm:$0xf0]  ;;  %v4923_v36 = vld [vmem:[%s5727_s6 + $0x4c] sm:$0xf0]  ;;  %s2064_s8 = scalar_lea.vmem %s5991_s20, %s4161_s12 [#allocation11] }
 0x110   : > { %v3890_v11 = vmul.f32 -1.442695, %v1007_v0  ;;  %v3891_v15 = vmul.f32 -1.442695, %v1008_v6  ;;  %v3892_v42 = vmul.f32 -1.442695, %v1010_v34  ;;  %v4153_v40 = vor.u32 %v4944_v38, %v4152_v37 }
 0x111   : > { %1304 = vmatpush.bf16.msra.mxu1 %v3903_v43  ;;  %v4943_v34 = vld [vmem:[%s5727_s6 + $0xec] sm:$0xf0]  ;;  %v4921_v37 = vld [vmem:[%s5727_s6 + $0x44] sm:$0xf]  ;;  %s6197_s14 = sshra.s32 %s4161_s12, 3  ;;  %s6691_s13 = sld [smem:[#allocation27_spill]] }
 0x112   : > { %5197 = vpow2.f32 %v3890_v11  ;;  %v992_v51 = vpop.f32.mrf.mxu2  ;;  %1330 = vmatpush.bf16.msra.mxu3 %v3911_v48  ;;  %v4145_v60 = vor.u32 %v4943_v34, %v4144_v59  ;;  %1639 = vmatpush.bf16.msrb.mxu2 %v4153_v40  ;;  %v4130_v48 = vld [vmem:[%s5727_s6 + $0xd0] sm:$0xf0]  ;;  %v4072_v40 = vld [vmem:[%s5727_s6 + $0x48] sm:$0xf]  ;;  %s4945_s25 = sshll.u32 %s6197_s14, 5 }
 0x113   : > { %5199 = vpow2.f32 %v3891_v15  ;;  %v1005_v53 = vpop.f32.mrf.mxu3  ;;  %v4133_v51 = vor.u32 %v4937_v46, %v4130_v48  ;;  %v4922_v46 = vld [vmem:[%s5727_s6 + $0x4c] sm:$0xf]  ;;  %v4048_v48 = vld [vmem:[%s5727_s6 + $0x20] sm:$0xf]  ;;  %s6443_s12 = scalar_select %p749_p5, 6, 1 }
 0x114   : > { %5201 = vpow2.f32 %v3892_v42  ;;  %v4154_v42 = vld [vmem:[%s5727_s6 + $0xf8] sm:$0xf0]  ;;  %1613 = vmatpush.bf16.msrb.mxu0 %v4145_v60  ;;  %v4938_v53 = vld [vmem:[%s5727_s6 + $0xcc] sm:$0xf]  ;;  %v4064_v60 = vld [vmem:[%s5727_s6 + $0x40] sm:$0xf] }
 0x115   : > { %v4157_v43 = vor.u32 %v4942_v41, %v4154_v42  ;;  %1626 = vmatpush.bf16.msrb.mxu1 %v4149_v39  ;;  %v4065_v38 = vor.u32 %v4923_v36, %v4064_v60  ;;  %v4066_v39 = vld [vmem:[%s5727_s6 + $0x50] sm:$0xf0]  ;;  %v4924_v41 = vld [vmem:[%s5727_s6 + $0x54] sm:$0xf0]  ;;  %s4563_s14 = sshll.u32 %s6443_s12, 3  ;;  %s504_s12 = scalar_lea.vmem [#allocation14], %s5984_s19 }
 0x116   : > { %s6568_s7 = sshll.u32 %s504_s12, 4  ;;  %s3447_s7 = int_to_ptr.vmem [resolvable:$true] %s6568_s7 }
 0x117   : > { %1652 = vmatpush.bf16.msrb.mxu3 %v4157_v43 }
 0x118   : > { %v5198_v47 = vpop.eup %5197 }
 0x119   : > { %v5200_v49 = vpop.eup %5199  ;;  %v1014_v50 = vadd.f32 1.0, %v5198_v47  ;;  %v4129_v47 = vor.u32 %v4939_v45, %v4128_v44  ;;  %1627 = vmatpush.bf16.msrb.mxu1 %v4133_v51  ;;  %v4069_v44 = vor.u32 %v4921_v37, %v4066_v39  ;;  %v4073_v45 = vor.u32 %v4924_v41, %v4072_v40 }
 0x11a   : > { %v1033_v52 = vadd.f32 1.0, %v5200_v49  ;;  %v5202_v55 = vpop.eup %5201  ;;  %v4136_v49 = vld [vmem:[%s5727_s6 + $0xc8] sm:$0xf] }
 0x11b   : > { %5203 = vrcp.f32 %v1014_v50  ;;  %v1053_v56 = vadd.f32 1.0, %v5202_v55  ;;  %v1026_v0 = vand.u32 2147483648, %v1014_v50  ;;  %v1024_v5 = vand.u32 2147483647, %v1014_v50  ;;  %1614 = vmatpush.bf16.msrb.mxu0 %v4129_v47  ;;  %v4074_v47 = vld [vmem:[%s5727_s6 + $0x58] sm:$0xf0] }
 0x11c   : > { %5205 = vrcp.f32 %v1033_v52  ;;  %v1045_v3 = vand.u32 2147483648, %v1033_v52  ;;  %v1043_v7 = vand.u32 2147483647, %v1033_v52  ;;  %vm1020_vm3 = vweird.f32 %v1014_v50 }
 0x11d   : > { %5207 = vrcp.f32 %v1053_v56  ;;  %vm1039_vm4 = vweird.f32 %v1033_v52  ;;  %v1027_v11 = vor.u32 1.1754944e-38, %v1026_v0  ;;  %vm1025_vm7 = vcmp.eq.f32.partialorder %v1024_v5, 8.507059e+37 }
 0x11e   : > { %5209 = vtanh.f32 %v1009_v1  ;;  %v1046_v13 = vor.u32 1.1754944e-38, %v1045_v3  ;;  %vm1044_vm8 = vcmp.eq.f32.partialorder %v1043_v7, 8.507059e+37  ;;  %v1065_v26 = vand.u32 2147483648, %v1053_v56  ;;  %v4933_v1 = vld [vmem:[%s5727_s6 + $0xa4] sm:$0xf] }
 0x11f   : > { %vm1059_vm10 = vweird.f32 %v1053_v56  ;;  %v1063_v27 = vand.u32 2147483647, %v1053_v56  ;;  %v4141_v55 = vor.u32 %v4938_v53, %v4138_v54  ;;  %v4934_v3 = vld [vmem:[%s5727_s6 + $0xac] sm:$0xf]  ;;  %v4931_v7 = vld [vmem:[%s5727_s6 + $0x8c] sm:$0xf0]  ;;  %v4077_v51 = vor.u32 %v4922_v46, %v4074_v47 }
 0x120   : > { %v1066_v29 = vor.u32 1.1754944e-38, %v1065_v26  ;;  %v4917_v53 = vld [vmem:[%s5727_s6 + $0x24] sm:$0xf]  ;;  %v4050_v54 = vld [vmem:[%s5727_s6 + $0x30] sm:$0xf0] }
 0x121   : > { %v5204_v57 = vpop.eup %5203  ;;  %vm1064_vm12 = vcmp.eq.f32.partialorder %v1063_v27, 8.507059e+37  ;;  %1653 = vmatpush.bf16.msrb.mxu3 %v4141_v55  ;;  %v4056_v55 = vld [vmem:[%s5727_s6 + $0x28] sm:$0xf] }
 0x122   : > { %v5206_v58 = vpop.eup %5205  ;;  %v1016_v61 = vmul.f32 %v5204_v57, %v1014_v50  ;;  %vm1021_vm1 = vweird.f32 %v5204_v57  ;;  %v4940_v50 = vld [vmem:[%s5727_s6 + $0xd4] sm:$0xf0] }
 0x123   : > { %v1035_v62 = vmul.f32 %v5206_v58, %v1033_v52  ;;  %vm1040_vm2 = vweird.f32 %v5206_v58  ;;  %v5208_v8 = vpop.eup %5207  ;;  %vm1022_vm5 = vmor %vm1020_vm3, %vm1021_vm1  ;;  %v4137_v52 = vor.u32 %v4940_v50, %v4136_v49  ;;  %v4919_v49 = vld [vmem:[%s5727_s6 + $0x2c] sm:$0xf0]  ;;  %v1089_v50 = vld [vmem:[%s6048_s15 + $0x18] sm:$0xff] }
 0x124   : > { %v1017_v2 = vsub.f32 1.0, %v1016_v61  ;;  %v1055_v10 = vmul.f32 %v5208_v8, %v1053_v56  ;;  %vm1041_vm6 = vmor %vm1039_vm4, %vm1040_vm2  ;;  %v5210_v16 = vpop.eup %5209  ;;  %vm1060_vm9 = vweird.f32 %v5208_v8  ;;  %v4112_v56 = vld [vmem:[%s5727_s6 + $0xa0] sm:$0xf]  ;;  %v4114_v61 = vld [vmem:[%s5727_s6 + $0xb0] sm:$0xf0] }
 0x125   : > { %v1036_v63 = vsub.f32 1.0, %v1035_v62  ;;  %vm1061_vm11 = vmor %vm1059_vm10, %vm1060_vm9  ;;  %1640 = vmatpush.bf16.msrb.mxu2 %v4137_v52  ;;  %v4120_v62 = vld [vmem:[%s5727_s6 + $0xa8] sm:$0xf]  ;;  %v4049_v52 = vor.u32 %v4919_v49, %v4048_v48 }
 0x126   : > { %v1018_v4 = vmul.f32 %v5204_v57, %v1017_v2  ;;  %v1056_v17 = vsub.f32 1.0, %v1055_v10  ;;  %v4936_v2 = vld [vmem:[%s5727_s6 + $0xb4] sm:$0xf0]  ;;  %v4098_v10 = vld [vmem:[%s5727_s6 + $0x90] sm:$0xf0] }
 0x127   : > { %v1037_v6 = vmul.f32 %v5206_v58, %v1036_v63  ;;  %v4117_v63 = vor.u32 %v4933_v1, %v4114_v61  ;;  %v4121_v0 = vor.u32 %v4936_v2, %v4120_v62  ;;  %v4918_v1 = vld [vmem:[%s5727_s6 + $0x2c] sm:$0xf] }
 0x128   : > { %v1019_v9 = vadd.f32 %v5204_v57, %v1018_v4  ;;  %v1057_v22 = vmul.f32 %v5208_v8, %v1056_v17  ;;  %v4122_v4 = vld [vmem:[%s5727_s6 + $0xb8] sm:$0xf0] }
 0x129   : > { %v1038_v12 = vadd.f32 %v5206_v58, %v1037_v6  ;;  %v4125_v5 = vor.u32 %v4934_v3, %v4122_v4  ;;  %1628 = vmatpush.bf16.msrb.mxu1 %v4117_v63  ;;  %1641 = vmatpush.bf16.msrb.mxu2 %v4121_v0  ;;  %v4096_v6 = vld [vmem:[%s5727_s6 + $0x80] sm:$0xf]  ;;  %v4915_v3 = vld [vmem:[%s5727_s6 + $0xc] sm:$0xf0]  ;;  %v4913_v4 = vld [vmem:[%s5727_s6 + $0x4] sm:$0xf] }
 0x12a   : > { %v1023_v15 = vsel %vm1022_vm5, %v5204_v57, %v1019_v9  ;;  %v1058_v25 = vadd.f32 %v5208_v8, %v1057_v22  ;;  %v4935_v57 = vld [vmem:[%s5727_s6 + $0xac] sm:$0xf0]  ;;  %v4097_v9 = vor.u32 %v4931_v7, %v4096_v6  ;;  %v4082_v22 = vld [vmem:[%s5727_s6 + $0x70] sm:$0xf0]  ;;  %v4032_v0 = vld [vmem:[%s5727_s6] sm:$0xf] }
 0x12b   : > { %v1028_v18 = vsel %vm1025_vm7, %v1027_v11, %v1023_v15  ;;  %v1042_v19 = vsel %vm1041_vm6, %v5206_v58, %v1038_v12  ;;  %v4113_v58 = vor.u32 %v4935_v57, %v4112_v56  ;;  %1654 = vmatpush.bf16.msrb.mxu3 %v4125_v5  ;;  %v4104_v11 = vld [vmem:[%s5727_s6 + $0x88] sm:$0xf]  ;;  %v4932_v12 = vld [vmem:[%s5727_s6 + $0x94] sm:$0xf0]  ;;  %v4930_v15 = vld [vmem:[%s5727_s6 + $0x8c] sm:$0xf]  ;;  %v4053_v56 = vor.u32 %v4917_v53, %v4050_v54 }
 0x12c   : > { %v1047_v20 = vsel %vm1044_vm8, %v1046_v13, %v1042_v19  ;;  %v1071_v21 = vmul.f32 %v5210_v16, %v1028_v18  ;;  %v1062_v28 = vsel %vm1061_vm11, %v5208_v8, %v1058_v25  ;;  %v4929_v8 = vld [vmem:[%s5727_s6 + $0x84] sm:$0xf]  ;;  %v4106_v16 = vld [vmem:[%s5727_s6 + $0x98] sm:$0xf0]  ;;  %v4080_v18 = vld [vmem:[%s5727_s6 + $0x60] sm:$0xf] }
 0x12d   : > { %v1070_v23 = vmul.f32 %v1047_v20, %v540_v14  ;;  %v1067_v31 = vsel %vm1064_vm12, %v1066_v29, %v1062_v28  ;;  %1615 = vmatpush.bf16.msrb.mxu0 %v4113_v58  ;;  %v4101_v13 = vor.u32 %v4929_v8, %v4098_v10  ;;  %v4105_v14 = vor.u32 %v4932_v12, %v4104_v11  ;;  %v4927_v19 = vld [vmem:[%s5727_s6 + $0x6c] sm:$0xf0]  ;;  %v4925_v20 = vld [vmem:[%s5727_s6 + $0x64] sm:$0xf]  ;;  %v4928_v25 = vld [vmem:[%s5727_s6 + $0x74] sm:$0xf0] }
 0x12e   : > { %v4109_v17 = vor.u32 %v4930_v15, %v4106_v16  ;;  %v4085_v26 = vor.u32 %v4925_v20, %v4082_v22  ;;  %v4926_v28 = vld [vmem:[%s5727_s6 + $0x6c] sm:$0xf]  ;;  %v4090_v29 = vld [vmem:[%s5727_s6 + $0x78] sm:$0xf0]  ;;  %v4920_v57 = vld [vmem:[%s5727_s6 + $0x34] sm:$0xf0]  ;;  %v4033_v8 = vor.u32 %v4915_v3, %v4032_v0 }
 0x12f   : > { %v5987_v24 = vadd.f32 %v1071_v21, %v1070_v23  ;;  %1629 = vmatpush.bf16.msrb.mxu1 %v4101_v13  ;;  %1642 = vmatpush.bf16.msrb.mxu2 %v4105_v14  ;;  %v4081_v21 = vor.u32 %v4927_v19, %v4080_v18  ;;  %v4088_v23 = vld [vmem:[%s5727_s6 + $0x68] sm:$0xf]  ;;  %v4093_v59 = vor.u32 %v4926_v28, %v4090_v29  ;;  %v4058_v58 = vld [vmem:[%s5727_s6 + $0x38] sm:$0xf0]  ;;  %v4916_v11 = vld [vmem:[%s5727_s6 + $0x14] sm:$0xf0] }
 0x130   : > { %1655 = vmatpush.bf16.msrb.mxu3 %v4109_v17  ;;  %v4089_v27 = vor.u32 %v4928_v25, %v4088_v23  ;;  %v4057_v2 = vor.u32 %v4920_v57, %v4056_v55  ;;  %v4061_v63 = vor.u32 %v4918_v1, %v4058_v58  ;;  %v4040_v10 = vld [vmem:[%s5727_s6 + $0x8] sm:$0xf]  ;;  %v4914_v14 = vld [vmem:[%s5727_s6 + $0xc] sm:$0xf]  ;;  %v4042_v15 = vld [vmem:[%s5727_s6 + $0x18] sm:$0xf0] }
 0x131   : > { %5211 = vtanh.f32 %v5987_v24  ;;  %1616 = vmatpush.bf16.msrb.mxu0 %v4097_v9  ;;  %v4034_v9 = vld [vmem:[%s5727_s6 + $0x10] sm:$0xf0]  ;;  %v4041_v13 = vor.u32 %v4916_v11, %v4040_v10  ;;  %v4045_v18 = vor.u32 %v4914_v14, %v4042_v15  ;;  %v4976_v0 = vld [vmem:[%s5727_s6 + $0xec] sm:$0xf0]  ;;  %v4974_v3 = vld [vmem:[%s5727_s6 + $0xe4] sm:$0xf] }
 0x132   : > { %v4037_v12 = vor.u32 %v4913_v4, %v4034_v9  ;;  %v4975_v10 = vld [vmem:[%s5727_s6 + $0xec] sm:$0xf]  ;;  %v4288_v11 = vld [vmem:[%s5727_s6 + $0xf8] sm:$0xf0]  ;;  %v4972_v14 = vld [vmem:[%s5727_s6 + $0xcc] sm:$0xf0] }
 0x133   : > { %1630 = vmatpush.bf16.msrb.mxu1 %v4085_v26  ;;  %1643 = vmatpush.bf16.msrb.mxu2 %v4089_v27  ;;  %v1088_v26 = vld [vmem:[%s6048_s15 + $0x10] sm:$0xff]  ;;  %v4970_v15 = vld [vmem:[%s5727_s6 + $0xc4] sm:$0xf] }
 0x134   : > { %1656 = vmatpush.bf16.msrb.mxu3 %v4093_v59 }
 0x135   : > { %1617 = vmatpush.bf16.msrb.mxu0 %v4081_v21 }
 0x137   : > { %v5212_v30 = vpop.eup %5211  ;;  %1631 = vmatpush.bf16.msrb.mxu1 %v4069_v44  ;;  %1644 = vmatpush.bf16.msrb.mxu2 %v4073_v45 }
 0x138   : > { %v1074_v32 = vmul.f32 %v5212_v30, %v1067_v31  ;;  %v1086_v30 = vld [vmem:[%s6048_s15] sm:$0xff]  ;;  %1657 = vmatpush.bf16.msrb.mxu3 %v4077_v51 }
 0x139   : > { %1618 = vmatpush.bf16.msrb.mxu0 %v4065_v38 }
 0x13a   : > { %1078 = vst [vmem:[%s1077_s21] sm:$0xff] %v1074_v32  ;;  %v1091_v33 = vpack.c.bf16 %v1074_v32, %v1074_v32  ;;  %v1087_v32 = vld [vmem:[%s6048_s15 + $0x8] sm:$0xff]  ;;  %s6226_s21 = scalar_lea.vmem [#allocation2], %s4945_s25  ;;  %s4978_s15 = sshll.u32 %s6286_s24, 5 }
 0x13b   : > { %1632 = vmatpush.bf16.msrb.mxu1 %v4053_v56  ;;  %1645 = vmatpush.bf16.msrb.mxu2 %v4057_v2  ;;  %s6448_s25 = sshra.s32 %s4563_s14, 3  ;;  %s3055_s24 = sshra.s32 %s4697_s18, 3 }
 0x13c   : > { %1292 = vmatmul.bf16.vlgmr.msra.gmra.mxu0 %v1091_v33  ;;  %1305 = vmatmul.bf16.vlgmr.msra.gmra.mxu1 %v1091_v33 }
 0x13d   : > { %1318 = vmatmul.bf16.vlgmr.msra.gmra.mxu2 %v1091_v33  ;;  %1331 = vmatmul.bf16.vlgmr.msra.gmra.mxu3 %v1091_v33 }
 0x13e   : > { %1619 = vmatpush.bf16.msrb.mxu0 %v4049_v52  ;;  %1658 = vmatpush.bf16.msrb.mxu3 %v4061_v63  ;;  %v4278_v63 = vld [vmem:[%s5727_s6 + $0xe0] sm:$0xf] }
 0x13f   : > { %1633 = vmatpush.bf16.msrb.mxu1 %v4037_v12  ;;  %1646 = vmatpush.bf16.msrb.mxu2 %v4041_v13  ;;  %v4279_v4 = vor.u32 %v4976_v0, %v4278_v63  ;;  %v4291_v12 = vor.u32 %v4975_v10, %v4288_v11  ;;  %v4262_v13 = vld [vmem:[%s5727_s6 + $0xc0] sm:$0xf]  ;;  %v4957_v10 = vld [vmem:[%s5727_s6 + $0x54] sm:$0xf0] }
 0x142   : > { %1620 = vmatpush.bf16.msrb.mxu0 %v4033_v8  ;;  %1659 = vmatpush.bf16.msrb.mxu3 %v4045_v18  ;;  %v4270_v18 = vld [vmem:[%s5727_s6 + $0xc8] sm:$0xf] }
 0x146   : > { %1942 = vmatpush.bf16.msra.mxu0 %v4279_v4  ;;  %1981 = vmatpush.bf16.msra.mxu3 %v4291_v12  ;;  %v4198_v4 = vld [vmem:[%s5727_s6 + $0x40] sm:$0xf] }
 0x1b9   : > { %v1293_v31 = vpop.f32.mrf.mxu0  ;;  %v1306_v33 = vpop.f32.mrf.mxu1 }
 0x1ba   : > { %v1336_v34 = vadd.f32 %v1293_v31, %v1086_v30  ;;  %v1337_v35 = vadd.f32 %v1306_v33, %v1087_v32 }
 0x1bc   : > { %v4024_v42 = vmul.f32 -1.442695, %v1336_v34  ;;  %v4025_v43 = vmul.f32 -1.442695, %v1337_v35 }
 0x1be   : > { %5213 = vpow2.f32 %v4024_v42 }
 0x1bf   : > { %5215 = vpow2.f32 %v4025_v43 }
 0x1c0   : > { %v1319_v61 = vpop.f32.mrf.mxu2  ;;  %v1332_v62 = vpop.f32.mrf.mxu3 }
 0x1c1   : > { %v1339_v5 = vadd.f32 %v1332_v62, %v1089_v50  ;;  %v1295_v6 = vpop.f32.mrf.mxu0  ;;  %v1308_v7 = vpop.f32.mrf.mxu1  ;;  %v1338_v29 = vadd.f32 %v1319_v61, %v1088_v26  ;;  %v4246_v26 = vld [vmem:[%s5727_s6 + $0xa0] sm:$0xf] }
 0x1c2   : > { %v4286_v6 = vld [vmem:[%s5727_s6 + $0xe8] sm:$0xf]  ;;  %v4977_v7 = vld [vmem:[%s5727_s6 + $0xf4] sm:$0xf0] }
 0x1c3   : > { %v4026_v16 = vmul.f32 -1.442695, %v1339_v5  ;;  %v4280_v5 = vld [vmem:[%s5727_s6 + $0xf0] sm:$0xf0]  ;;  %v4287_v9 = vor.u32 %v4977_v7, %v4286_v6  ;;  %v4954_v6 = vld [vmem:[%s5727_s6 + $0x44] sm:$0xf] }
 0x1c4   : > { %v5214_v17 = vpop.eup %5213  ;;  %v4283_v8 = vor.u32 %v4974_v3, %v4280_v5  ;;  %v4956_v5 = vld [vmem:[%s5727_s6 + $0x4c] sm:$0xf0] }
 0x1c5   : > { %v5216_v19 = vpop.eup %5215  ;;  %v1343_v20 = vadd.f32 1.0, %v5214_v17  ;;  %5217 = vpow2.f32 %v4026_v16  ;;  %1968 = vmatpush.bf16.msra.mxu2 %v4287_v9  ;;  %v4263_v16 = vor.u32 %v4972_v14, %v4262_v13  ;;  %v4264_v17 = vld [vmem:[%s5727_s6 + $0xd0] sm:$0xf0]  ;;  %v4199_v7 = vor.u32 %v4956_v5, %v4198_v4  ;;  %v4206_v9 = vld [vmem:[%s5727_s6 + $0x48] sm:$0xf] }
 0x1c6   : > { %v1362_v21 = vadd.f32 1.0, %v5216_v19  ;;  %1955 = vmatpush.bf16.msra.mxu1 %v4283_v8  ;;  %v4973_v19 = vld [vmem:[%s5727_s6 + $0xd4] sm:$0xf0]  ;;  %v4200_v8 = vld [vmem:[%s5727_s6 + $0x50] sm:$0xf0]  ;;  %v4207_v14 = vor.u32 %v4957_v10, %v4206_v9 }
 0x1c7   : > { %5219 = vrcp.f32 %v1343_v20  ;;  %v1355_v34 = vand.u32 2147483648, %v1343_v20  ;;  %v1353_v36 = vand.u32 2147483647, %v1343_v20  ;;  %vm1349_vm15 = vweird.f32 %v1343_v20  ;;  %1943 = vmatpush.bf16.msra.mxu0 %v4263_v16  ;;  %v4208_v16 = vld [vmem:[%s5727_s6 + $0x58] sm:$0xf0] }
 0x1c8   : > { %5221 = vrcp.f32 %v1362_v21  ;;  %v1321_v22 = vpop.f32.mrf.mxu2  ;;  %v1334_v23 = vpop.f32.mrf.mxu3  ;;  %v1374_v35 = vand.u32 2147483648, %v1362_v21  ;;  %v1372_v38 = vand.u32 2147483647, %v1362_v21  ;;  %vm1368_vm0 = vweird.f32 %v1362_v21 }
 0x1c9   : > { %v1356_v41 = vor.u32 1.1754944e-38, %v1355_v34  ;;  %vm1354_vm3 = vcmp.eq.f32.partialorder %v1353_v36, 8.507059e+37  ;;  %v4971_v22 = vld [vmem:[%s5727_s6 + $0xcc] sm:$0xf]  ;;  %v4272_v23 = vld [vmem:[%s5727_s6 + $0xd8] sm:$0xf0]  ;;  %v4203_v13 = vor.u32 %v4954_v6, %v4200_v8 }
 0x1ca   : > { %v1375_v44 = vor.u32 1.1754944e-38, %v1374_v35  ;;  %vm1373_vm4 = vcmp.eq.f32.partialorder %v1372_v38, 8.507059e+37  ;;  %v4967_v34 = vld [vmem:[%s5727_s6 + $0xac] sm:$0xf]  ;;  %v4256_v35 = vld [vmem:[%s5727_s6 + $0xb8] sm:$0xf0] }
 0x1cb   : > { %v5218_v25 = vpop.eup %5217  ;;  %v4230_v36 = vld [vmem:[%s5727_s6 + $0x80] sm:$0xf]  ;;  %v4962_v38 = vld [vmem:[%s5727_s6 + $0x84] sm:$0xf] }
 0x1cc   : > { %v1382_v27 = vadd.f32 1.0, %v5218_v25  ;;  %v4275_v25 = vor.u32 %v4971_v22, %v4272_v23  ;;  %v4950_v22 = vld [vmem:[%s5727_s6 + $0x24] sm:$0xf]  ;;  %v4184_v23 = vld [vmem:[%s5727_s6 + $0x30] sm:$0xf0] }
 0x1cd   : > { %v5220_v28 = vpop.eup %5219 }
 0x1ce   : > { %v5222_v30 = vpop.eup %5221  ;;  %v1345_v31 = vmul.f32 %v5220_v28, %v1343_v20  ;;  %5223 = vrcp.f32 %v1382_v27  ;;  %vm1350_vm13 = vweird.f32 %v5220_v28  ;;  %v1394_v56 = vand.u32 2147483648, %v1382_v27  ;;  %1982 = vmatpush.bf16.msra.mxu3 %v4275_v25  ;;  %v4190_v25 = vld [vmem:[%s5727_s6 + $0x28] sm:$0xf] }
 0x1cf   : > { %v1364_v32 = vmul.f32 %v5222_v30, %v1362_v21  ;;  %5225 = vtanh.f32 %v1338_v29  ;;  %vm1369_vm14 = vweird.f32 %v5222_v30  ;;  %vm1351_vm1 = vmor %vm1349_vm15, %vm1350_vm13  ;;  %vm1388_vm6 = vweird.f32 %v1382_v27 }
 0x1d0   : > { %v1346_v33 = vsub.f32 1.0, %v1345_v31  ;;  %vm1370_vm2 = vmor %vm1368_vm0, %vm1369_vm14  ;;  %v1392_v57 = vand.u32 2147483647, %v1382_v27  ;;  %v1395_v58 = vor.u32 1.1754944e-38, %v1394_v56  ;;  %v4267_v20 = vor.u32 %v4970_v15, %v4264_v17  ;;  %v4254_v31 = vld [vmem:[%s5727_s6 + $0xa8] sm:$0xf] }
 0x1d1   : > { %v1365_v59 = vsub.f32 1.0, %v1364_v32  ;;  %v4271_v21 = vor.u32 %v4973_v19, %v4270_v18  ;;  %v4969_v32 = vld [vmem:[%s5727_s6 + $0xb4] sm:$0xf0]  ;;  %v4955_v15 = vld [vmem:[%s5727_s6 + $0x4c] sm:$0xf] }
 0x1d2   : > { %v1347_v60 = vmul.f32 %v5220_v28, %v1346_v33  ;;  %vm1393_vm8 = vcmp.eq.f32.partialorder %v1392_v57, 8.507059e+37  ;;  %1956 = vmatpush.bf16.msra.mxu1 %v4267_v20  ;;  %v4182_v17 = vld [vmem:[%s5727_s6 + $0x20] sm:$0xf]  ;;  %v4952_v18 = vld [vmem:[%s5727_s6 + $0x2c] sm:$0xf0]  ;;  %v1418_v19 = vld [vmem:[%s6137_s10 + $0x18] sm:$0xff]  ;;  %v4211_v20 = vor.u32 %v4955_v15, %v4208_v16 }
 0x1d3   : > { %v1366_v37 = vmul.f32 %v5222_v30, %v1365_v59  ;;  %1969 = vmatpush.bf16.msra.mxu2 %v4271_v21  ;;  %v4255_v59 = vor.u32 %v4969_v32, %v4254_v31  ;;  %v4183_v21 = vor.u32 %v4952_v18, %v4182_v17 }
 0x1d4   : > { %v5224_v39 = vpop.eup %5223  ;;  %v1348_v40 = vadd.f32 %v5220_v28, %v1347_v60  ;;  %v4259_v60 = vor.u32 %v4967_v34, %v4256_v35  ;;  %v4948_v34 = vld [vmem:[%s5727_s6 + $0xc] sm:$0xf0]  ;;  %v4946_v35 = vld [vmem:[%s5727_s6 + $0x4] sm:$0xf] }
 0x1d5   : > { %v1367_v42 = vadd.f32 %v5222_v30, %v1366_v37  ;;  %v1384_v43 = vmul.f32 %v5224_v39, %v1382_v27  ;;  %v5226_v46 = vpop.eup %5225  ;;  %vm1389_vm5 = vweird.f32 %v5224_v39  ;;  %v4968_v27 = vld [vmem:[%s5727_s6 + $0xac] sm:$0xf0] }
 0x1d6   : > { %v1352_v45 = vsel %vm1351_vm1, %v5220_v28, %v1348_v40  ;;  %vm1390_vm7 = vmor %vm1388_vm6, %vm1389_vm5  ;;  %v4966_v28 = vld [vmem:[%s5727_s6 + $0xa4] sm:$0xf]  ;;  %v4247_v29 = vor.u32 %v4968_v27, %v4246_v26  ;;  %v4964_v37 = vld [vmem:[%s5727_s6 + $0x8c] sm:$0xf0]  ;;  %1983 = vmatpush.bf16.msra.mxu3 %v4259_v60  ;;  %v4187_v26 = vor.u32 %v4950_v22, %v4184_v23 }
 0x1d7   : > { %v1357_v47 = vsel %vm1354_vm3, %v1356_v41, %v1352_v45  ;;  %v1371_v48 = vsel %vm1370_vm2, %v5222_v30, %v1367_v42  ;;  %v1385_v49 = vsub.f32 1.0, %v1384_v43  ;;  %v4248_v30 = vld [vmem:[%s5727_s6 + $0xb0] sm:$0xf0]  ;;  %1970 = vmatpush.bf16.msra.mxu2 %v4255_v59  ;;  %v4238_v41 = vld [vmem:[%s5727_s6 + $0x88] sm:$0xf] }
 0x1d8   : > { %v1376_v50 = vsel %vm1373_vm4, %v1375_v44, %v1371_v48  ;;  %v1400_v51 = vmul.f32 %v5226_v46, %v1357_v47  ;;  %v4251_v33 = vor.u32 %v4966_v28, %v4248_v30  ;;  %1944 = vmatpush.bf16.msra.mxu0 %v4247_v29  ;;  %v4232_v40 = vld [vmem:[%s5727_s6 + $0x90] sm:$0xf0]  ;;  %v4965_v42 = vld [vmem:[%s5727_s6 + $0x94] sm:$0xf0]  ;;  %v4963_v45 = vld [vmem:[%s5727_s6 + $0x8c] sm:$0xf] }
 0x1d9   : > { %v1399_v52 = vmul.f32 %v1376_v50, %v5987_v24  ;;  %v1386_v53 = vmul.f32 %v5224_v39, %v1385_v49  ;;  %v4235_v43 = vor.u32 %v4962_v38, %v4232_v40  ;;  %v4239_v44 = vor.u32 %v4965_v42, %v4238_v41  ;;  %v4240_v46 = vld [vmem:[%s5727_s6 + $0x98] sm:$0xf0]  ;;  %v4214_v48 = vld [vmem:[%s5727_s6 + $0x60] sm:$0xf]  ;;  %v4960_v49 = vld [vmem:[%s5727_s6 + $0x6c] sm:$0xf0] }
 0x1da   : > { %1957 = vmatpush.bf16.msra.mxu1 %v4251_v33  ;;  %v4243_v47 = vor.u32 %v4963_v45, %v4240_v46  ;;  %v4958_v50 = vld [vmem:[%s5727_s6 + $0x64] sm:$0xf]  ;;  %v4953_v27 = vld [vmem:[%s5727_s6 + $0x34] sm:$0xf0]  ;;  %v4951_v28 = vld [vmem:[%s5727_s6 + $0x2c] sm:$0xf] }
 0x1db   : > { %v6079_v54 = vadd.f32 %v1400_v51, %v1399_v52  ;;  %v1387_v55 = vadd.f32 %v5224_v39, %v1386_v53  ;;  %1971 = vmatpush.bf16.msra.mxu2 %v4239_v44  ;;  %v4215_v51 = vor.u32 %v4960_v49, %v4214_v48  ;;  %v4216_v52 = vld [vmem:[%s5727_s6 + $0x70] sm:$0xf0]  ;;  %v4222_v53 = vld [vmem:[%s5727_s6 + $0x68] sm:$0xf]  ;;  %v4192_v29 = vld [vmem:[%s5727_s6 + $0x38] sm:$0xf0]  ;;  %v4191_v32 = vor.u32 %v4953_v27, %v4190_v25 }
 0x1dc   : > { %1984 = vmatpush.bf16.msra.mxu3 %v4243_v47  ;;  %v4219_v56 = vor.u32 %v4958_v50, %v4216_v52  ;;  %v4195_v33 = vor.u32 %v4951_v28, %v4192_v29  ;;  %v4166_v59 = vld [vmem:[%s5727_s6] sm:$0xf]  ;;  %v4174_v40 = vld [vmem:[%s5727_s6 + $0x8] sm:$0xf]  ;;  %v4949_v41 = vld [vmem:[%s5727_s6 + $0x14] sm:$0xf0] }
 0x1dd   : > { %5227 = vtanh.f32 %v6079_v54  ;;  %v1391_v1 = vsel %vm1390_vm7, %v5224_v39, %v1387_v55  ;;  %v4231_v39 = vor.u32 %v4964_v37, %v4230_v36  ;;  %v4961_v55 = vld [vmem:[%s5727_s6 + $0x74] sm:$0xf0]  ;;  %v4167_v38 = vor.u32 %v4948_v34, %v4166_v59  ;;  %v4947_v44 = vld [vmem:[%s5727_s6 + $0xc] sm:$0xf]  ;;  %v4176_v45 = vld [vmem:[%s5727_s6 + $0x18] sm:$0xf0] }
 0x1de   : > { %v1396_v61 = vsel %vm1393_vm8, %v1395_v58, %v1391_v1  ;;  %1958 = vmatpush.bf16.msra.mxu1 %v4235_v43  ;;  %v4223_v57 = vor.u32 %v4961_v55, %v4222_v53  ;;  %v4959_v1 = vld [vmem:[%s5727_s6 + $0x6c] sm:$0xf]  ;;  %v4224_v58 = vld [vmem:[%s5727_s6 + $0x78] sm:$0xf0]  ;;  %v4175_v43 = vor.u32 %v4949_v41, %v4174_v40  ;;  %v4179_v48 = vor.u32 %v4947_v44, %v4176_v45  ;;  %v5009_v59 = vld [vmem:[%s5727_s6 + $0xec] sm:$0xf0] }
 0x1df   : > { %1945 = vmatpush.bf16.msra.mxu0 %v4231_v39  ;;  %v4227_v63 = vor.u32 %v4959_v1, %v4224_v58  ;;  %v4168_v39 = vld [vmem:[%s5727_s6 + $0x10] sm:$0xf0]  ;;  %v5007_v34 = vld [vmem:[%s5727_s6 + $0xe4] sm:$0xf]  ;;  %v5008_v40 = vld [vmem:[%s5727_s6 + $0xec] sm:$0xf] }
 0x1e0   : > { %1972 = vmatpush.bf16.msra.mxu2 %v4223_v57  ;;  %v4171_v42 = vor.u32 %v4946_v35, %v4168_v39  ;;  %v4422_v41 = vld [vmem:[%s5727_s6 + $0xf8] sm:$0xf0]  ;;  %v5005_v44 = vld [vmem:[%s5727_s6 + $0xcc] sm:$0xf0]  ;;  %v5003_v45 = vld [vmem:[%s5727_s6 + $0xc4] sm:$0xf] }
 0x1e1   : > { %1985 = vmatpush.bf16.msra.mxu3 %v4227_v63 }
 0x1e2   : > { %1959 = vmatpush.bf16.msra.mxu1 %v4219_v56  ;;  %v1417_v56 = vld [vmem:[%s6137_s10 + $0x10] sm:$0xff] }
 0x1e3   : > { %v5228_v24 = vpop.eup %5227  ;;  %1946 = vmatpush.bf16.msra.mxu0 %v4215_v51 }
 0x1e4   : > { %v1403_v62 = vmul.f32 %v5228_v24, %v1396_v61  ;;  %v1415_v24 = vld [vmem:[%s6137_s10] sm:$0xff]  ;;  %1973 = vmatpush.bf16.msra.mxu2 %v4207_v14 }
 0x1e5   : > { %1986 = vmatpush.bf16.msra.mxu3 %v4211_v20 }
 0x1e6   : > { %1407 = vst [vmem:[%s1406_s26] sm:$0xff] %v1403_v62  ;;  %v1420_v2 = vpack.c.bf16 %v1403_v62, %v1403_v62  ;;  %v1416_v62 = vld [vmem:[%s6137_s10 + $0x8] sm:$0xff]  ;;  %1960 = vmatpush.bf16.msra.mxu1 %v4203_v13  ;;  %s6315_s26 = scalar_lea.vmem [#allocation2], %s4978_s15  ;;  %s5011_s10 = sshll.u32 %s6375_s29, 5 }
 0x1e7   : > { %1947 = vmatpush.bf16.msra.mxu0 %v4199_v7  ;;  %s5077_s15 = sshll.u32 %s3055_s24, 5  ;;  %s6688_s29 = sld [smem:[#allocation28_spill]] }
 0x1e8   : > { %1621 = vmatmul.bf16.vlgmr.msrb.gmra.mxu0 %v1420_v2  ;;  %1634 = vmatmul.bf16.vlgmr.msrb.gmra.mxu1 %v1420_v2 }
 0x1e9   : > { %1647 = vmatmul.bf16.vlgmr.msrb.gmra.mxu2 %v1420_v2  ;;  %1660 = vmatmul.bf16.vlgmr.msrb.gmra.mxu3 %v1420_v2 }
 0x1ea   : > { %1961 = vmatpush.bf16.msra.mxu1 %v4187_v26  ;;  %1974 = vmatpush.bf16.msra.mxu2 %v4191_v32 }
 0x1eb   : > { %1948 = vmatpush.bf16.msra.mxu0 %v4183_v21  ;;  %1987 = vmatpush.bf16.msra.mxu3 %v4195_v33  ;;  %v4412_v33 = vld [vmem:[%s5727_s6 + $0xe0] sm:$0xf] }
 0x1ec   : > { %v4413_v35 = vor.u32 %v5009_v59, %v4412_v33 }
 0x1ee   : > { %1962 = vmatpush.bf16.msra.mxu1 %v4171_v42  ;;  %1975 = vmatpush.bf16.msra.mxu2 %v4175_v43  ;;  %v4425_v42 = vor.u32 %v5008_v40, %v4422_v41  ;;  %v4396_v43 = vld [vmem:[%s5727_s6 + $0xc0] sm:$0xf]  ;;  %v4990_v40 = vld [vmem:[%s5727_s6 + $0x54] sm:$0xf0] }
 0x1ef   : > { %1949 = vmatpush.bf16.msra.mxu0 %v4167_v38  ;;  %1988 = vmatpush.bf16.msra.mxu3 %v4179_v48  ;;  %v4404_v48 = vld [vmem:[%s5727_s6 + $0xc8] sm:$0xf] }
 0x1f3   : > { %2271 = vmatpush.bf16.msrb.mxu0 %v4413_v35  ;;  %2310 = vmatpush.bf16.msrb.mxu3 %v4425_v42  ;;  %v4332_v35 = vld [vmem:[%s5727_s6 + $0x40] sm:$0xf] }
 0x265   : > { %v1622_v61 = vpop.f32.mrf.mxu0  ;;  %v1635_v2 = vpop.f32.mrf.mxu1 }
 0x266   : > { %v1665_v0 = vadd.f32 %v1622_v61, %v1415_v24  ;;  %v1666_v3 = vadd.f32 %v1635_v2, %v1416_v62 }
 0x268   : > { %v4158_v11 = vmul.f32 -1.442695, %v1665_v0  ;;  %v4159_v12 = vmul.f32 -1.442695, %v1666_v3 }
 0x26a   : > { %5229 = vpow2.f32 %v4158_v11 }
 0x26b   : > { %5231 = vpow2.f32 %v4159_v12 }
 0x26c   : > { %v1648_v30 = vpop.f32.mrf.mxu2  ;;  %v1661_v31 = vpop.f32.mrf.mxu3 }
 0x26d   : > { %v1668_v60 = vadd.f32 %v1661_v31, %v1418_v19  ;;  %v1624_v36 = vpop.f32.mrf.mxu0  ;;  %v1637_v37 = vpop.f32.mrf.mxu1  ;;  %v1667_v58 = vadd.f32 %v1648_v30, %v1417_v56  ;;  %v4380_v56 = vld [vmem:[%s5727_s6 + $0xa0] sm:$0xf] }
 0x26e   : > { %v4420_v36 = vld [vmem:[%s5727_s6 + $0xe8] sm:$0xf]  ;;  %v5010_v37 = vld [vmem:[%s5727_s6 + $0xf4] sm:$0xf0] }
 0x26f   : > { %v4160_v46 = vmul.f32 -1.442695, %v1668_v60  ;;  %v4414_v60 = vld [vmem:[%s5727_s6 + $0xf0] sm:$0xf0]  ;;  %v4421_v39 = vor.u32 %v5010_v37, %v4420_v36  ;;  %v4987_v36 = vld [vmem:[%s5727_s6 + $0x44] sm:$0xf] }
 0x270   : > { %v5230_v47 = vpop.eup %5229  ;;  %v4417_v38 = vor.u32 %v5007_v34, %v4414_v60  ;;  %v4989_v60 = vld [vmem:[%s5727_s6 + $0x4c] sm:$0xf0] }
 0x271   : > { %v5232_v49 = vpop.eup %5231  ;;  %v1672_v50 = vadd.f32 1.0, %v5230_v47  ;;  %5233 = vpow2.f32 %v4160_v46  ;;  %2297 = vmatpush.bf16.msrb.mxu2 %v4421_v39  ;;  %v4397_v46 = vor.u32 %v5005_v44, %v4396_v43  ;;  %v4398_v47 = vld [vmem:[%s5727_s6 + $0xd0] sm:$0xf0]  ;;  %v4333_v37 = vor.u32 %v4989_v60, %v4332_v35  ;;  %v4340_v39 = vld [vmem:[%s5727_s6 + $0x48] sm:$0xf] }
 0x272   : > { %v1691_v51 = vadd.f32 1.0, %v5232_v49  ;;  %2284 = vmatpush.bf16.msrb.mxu1 %v4417_v38  ;;  %v5006_v49 = vld [vmem:[%s5727_s6 + $0xd4] sm:$0xf0]  ;;  %v4334_v38 = vld [vmem:[%s5727_s6 + $0x50] sm:$0xf0]  ;;  %v4341_v44 = vor.u32 %v4990_v40, %v4340_v39 }
 0x273   : > { %5235 = vrcp.f32 %v1672_v50  ;;  %v1684_v0 = vand.u32 2147483648, %v1672_v50  ;;  %v1682_v5 = vand.u32 2147483647, %v1672_v50  ;;  %vm1678_vm11 = vweird.f32 %v1672_v50  ;;  %2272 = vmatpush.bf16.msrb.mxu0 %v4397_v46  ;;  %v4342_v46 = vld [vmem:[%s5727_s6 + $0x58] sm:$0xf0] }
 0x274   : > { %5237 = vrcp.f32 %v1691_v51  ;;  %v1650_v52 = vpop.f32.mrf.mxu2  ;;  %v1663_v53 = vpop.f32.mrf.mxu3  ;;  %v1703_v3 = vand.u32 2147483648, %v1691_v51  ;;  %v1701_v7 = vand.u32 2147483647, %v1691_v51  ;;  %vm1697_vm12 = vweird.f32 %v1691_v51 }
 0x275   : > { %v1685_v10 = vor.u32 1.1754944e-38, %v1684_v0  ;;  %vm1683_vm15 = vcmp.eq.f32.partialorder %v1682_v5, 8.507059e+37  ;;  %v5004_v52 = vld [vmem:[%s5727_s6 + $0xcc] sm:$0xf]  ;;  %v4406_v53 = vld [vmem:[%s5727_s6 + $0xd8] sm:$0xf0]  ;;  %v4337_v43 = vor.u32 %v4987_v36, %v4334_v38 }
 0x276   : > { %v1704_v13 = vor.u32 1.1754944e-38, %v1703_v3  ;;  %vm1702_vm0 = vcmp.eq.f32.partialorder %v1701_v7, 8.507059e+37  ;;  %v5000_v0 = vld [vmem:[%s5727_s6 + $0xac] sm:$0xf]  ;;  %v4390_v3 = vld [vmem:[%s5727_s6 + $0xb8] sm:$0xf0] }
 0x277   : > { %v5234_v55 = vpop.eup %5233  ;;  %v4364_v5 = vld [vmem:[%s5727_s6 + $0x80] sm:$0xf]  ;;  %v4995_v7 = vld [vmem:[%s5727_s6 + $0x84] sm:$0xf] }
 0x278   : > { %v1711_v57 = vadd.f32 1.0, %v5234_v55  ;;  %v4409_v55 = vor.u32 %v5004_v52, %v4406_v53  ;;  %v4983_v52 = vld [vmem:[%s5727_s6 + $0x24] sm:$0xf]  ;;  %v4318_v53 = vld [vmem:[%s5727_s6 + $0x30] sm:$0xf0] }
 0x279   : > { %v5236_v1 = vpop.eup %5235 }
 0x27a   : > { %v5238_v24 = vpop.eup %5237  ;;  %v1674_v61 = vmul.f32 %v5236_v1, %v1672_v50  ;;  %5239 = vrcp.f32 %v1711_v57  ;;  %vm1679_vm9 = vweird.f32 %v5236_v1  ;;  %v1723_v26 = vand.u32 2147483648, %v1711_v57  ;;  %2311 = vmatpush.bf16.msrb.mxu3 %v4409_v55  ;;  %v4324_v55 = vld [vmem:[%s5727_s6 + $0x28] sm:$0xf] }
 0x27b   : > { %v1693_v62 = vmul.f32 %v5238_v24, %v1691_v51  ;;  %5241 = vtanh.f32 %v1667_v58  ;;  %vm1698_vm10 = vweird.f32 %v5238_v24  ;;  %vm1680_vm13 = vmor %vm1678_vm11, %vm1679_vm9  ;;  %vm1717_vm2 = vweird.f32 %v1711_v57 }
 0x27c   : > { %v1675_v2 = vsub.f32 1.0, %v1674_v61  ;;  %vm1699_vm14 = vmor %vm1697_vm12, %vm1698_vm10  ;;  %v1721_v27 = vand.u32 2147483647, %v1711_v57  ;;  %v1724_v29 = vor.u32 1.1754944e-38, %v1723_v26  ;;  %v4401_v50 = vor.u32 %v5003_v45, %v4398_v47  ;;  %v4388_v61 = vld [vmem:[%s5727_s6 + $0xa8] sm:$0xf] }
 0x27d   : > { %v1694_v63 = vsub.f32 1.0, %v1693_v62  ;;  %v4405_v51 = vor.u32 %v5006_v49, %v4404_v48  ;;  %v5002_v62 = vld [vmem:[%s5727_s6 + $0xb4] sm:$0xf0]  ;;  %v4988_v45 = vld [vmem:[%s5727_s6 + $0x4c] sm:$0xf] }
 0x27e   : > { %v1676_v4 = vmul.f32 %v5236_v1, %v1675_v2  ;;  %vm1722_vm4 = vcmp.eq.f32.partialorder %v1721_v27, 8.507059e+37  ;;  %2285 = vmatpush.bf16.msrb.mxu1 %v4401_v50  ;;  %v4316_v47 = vld [vmem:[%s5727_s6 + $0x20] sm:$0xf]  ;;  %v4985_v48 = vld [vmem:[%s5727_s6 + $0x2c] sm:$0xf0]  ;;  %v1747_v49 = vld [vmem:[%s6226_s21 + $0x18] sm:$0xff]  ;;  %v4345_v50 = vor.u32 %v4988_v45, %v4342_v46 }
 0x27f   : > { %v1695_v6 = vmul.f32 %v5238_v24, %v1694_v63  ;;  %2298 = vmatpush.bf16.msrb.mxu2 %v4405_v51  ;;  %v4389_v63 = vor.u32 %v5002_v62, %v4388_v61  ;;  %v4317_v51 = vor.u32 %v4985_v48, %v4316_v47 }
 0x280   : > { %v5240_v8 = vpop.eup %5239  ;;  %v1677_v9 = vadd.f32 %v5236_v1, %v1676_v4  ;;  %v4393_v4 = vor.u32 %v5000_v0, %v4390_v3  ;;  %v4981_v0 = vld [vmem:[%s5727_s6 + $0xc] sm:$0xf0]  ;;  %v4979_v3 = vld [vmem:[%s5727_s6 + $0x4] sm:$0xf] }
 0x281   : > { %v1696_v11 = vadd.f32 %v5238_v24, %v1695_v6  ;;  %v1713_v12 = vmul.f32 %v5240_v8, %v1711_v57  ;;  %v5242_v15 = vpop.eup %5241  ;;  %vm1718_vm1 = vweird.f32 %v5240_v8  ;;  %v5001_v57 = vld [vmem:[%s5727_s6 + $0xac] sm:$0xf0] }
 0x282   : > { %v1681_v14 = vsel %vm1680_vm13, %v5236_v1, %v1677_v9  ;;  %vm1719_vm3 = vmor %vm1717_vm2, %vm1718_vm1  ;;  %v4999_v1 = vld [vmem:[%s5727_s6 + $0xa4] sm:$0xf]  ;;  %v4381_v58 = vor.u32 %v5001_v57, %v4380_v56  ;;  %v4997_v6 = vld [vmem:[%s5727_s6 + $0x8c] sm:$0xf0]  ;;  %2312 = vmatpush.bf16.msrb.mxu3 %v4393_v4  ;;  %v4321_v56 = vor.u32 %v4983_v52, %v4318_v53 }
 0x283   : > { %v1686_v16 = vsel %vm1683_vm15, %v1685_v10, %v1681_v14  ;;  %v1700_v17 = vsel %vm1699_vm14, %v5238_v24, %v1696_v11  ;;  %v1714_v18 = vsub.f32 1.0, %v1713_v12  ;;  %v4382_v24 = vld [vmem:[%s5727_s6 + $0xb0] sm:$0xf0]  ;;  %2299 = vmatpush.bf16.msrb.mxu2 %v4389_v63  ;;  %v4372_v10 = vld [vmem:[%s5727_s6 + $0x88] sm:$0xf] }
 0x284   : > { %v1705_v19 = vsel %vm1702_vm0, %v1704_v13, %v1700_v17  ;;  %v1729_v20 = vmul.f32 %v5242_v15, %v1686_v16  ;;  %v4385_v2 = vor.u32 %v4999_v1, %v4382_v24  ;;  %2273 = vmatpush.bf16.msrb.mxu0 %v4381_v58  ;;  %v4366_v9 = vld [vmem:[%s5727_s6 + $0x90] sm:$0xf0]  ;;  %v4998_v11 = vld [vmem:[%s5727_s6 + $0x94] sm:$0xf0]  ;;  %v4996_v14 = vld [vmem:[%s5727_s6 + $0x8c] sm:$0xf] }
 0x285   : > { %v1728_v21 = vmul.f32 %v1705_v19, %v6079_v54  ;;  %v1715_v22 = vmul.f32 %v5240_v8, %v1714_v18  ;;  %v4369_v12 = vor.u32 %v4995_v7, %v4366_v9  ;;  %v4373_v13 = vor.u32 %v4998_v11, %v4372_v10  ;;  %v4374_v15 = vld [vmem:[%s5727_s6 + $0x98] sm:$0xf0]  ;;  %v4348_v17 = vld [vmem:[%s5727_s6 + $0x60] sm:$0xf]  ;;  %v4993_v18 = vld [vmem:[%s5727_s6 + $0x6c] sm:$0xf0] }
 0x286   : > { %2286 = vmatpush.bf16.msrb.mxu1 %v4385_v2  ;;  %v4377_v16 = vor.u32 %v4996_v14, %v4374_v15  ;;  %v4991_v19 = vld [vmem:[%s5727_s6 + $0x64] sm:$0xf]  ;;  %v4986_v57 = vld [vmem:[%s5727_s6 + $0x34] sm:$0xf0]  ;;  %v4984_v1 = vld [vmem:[%s5727_s6 + $0x2c] sm:$0xf] }
 0x287   : > { %v6168_v23 = vadd.f32 %v1729_v20, %v1728_v21  ;;  %v1716_v25 = vadd.f32 %v5240_v8, %v1715_v22  ;;  %2300 = vmatpush.bf16.msrb.mxu2 %v4373_v13  ;;  %v4349_v20 = vor.u32 %v4993_v18, %v4348_v17  ;;  %v4350_v21 = vld [vmem:[%s5727_s6 + $0x70] sm:$0xf0]  ;;  %v4356_v22 = vld [vmem:[%s5727_s6 + $0x68] sm:$0xf]  ;;  %v4326_v58 = vld [vmem:[%s5727_s6 + $0x38] sm:$0xf0]  ;;  %v4325_v62 = vor.u32 %v4986_v57, %v4324_v55 }
 0x288   : > { %2313 = vmatpush.bf16.msrb.mxu3 %v4377_v16  ;;  %v4353_v26 = vor.u32 %v4991_v19, %v4350_v21  ;;  %v4329_v2 = vor.u32 %v4984_v1, %v4326_v58  ;;  %v4300_v63 = vld [vmem:[%s5727_s6] sm:$0xf]  ;;  %v4308_v9 = vld [vmem:[%s5727_s6 + $0x8] sm:$0xf]  ;;  %v4982_v10 = vld [vmem:[%s5727_s6 + $0x14] sm:$0xf0] }
 0x289   : > { %5243 = vtanh.f32 %v6168_v23  ;;  %v1720_v28 = vsel %vm1719_vm3, %v5240_v8, %v1716_v25  ;;  %v4365_v8 = vor.u32 %v4997_v6, %v4364_v5  ;;  %v4994_v25 = vld [vmem:[%s5727_s6 + $0x74] sm:$0xf0]  ;;  %v4301_v7 = vor.u32 %v4981_v0, %v4300_v63  ;;  %v4980_v13 = vld [vmem:[%s5727_s6 + $0xc] sm:$0xf]  ;;  %v4310_v14 = vld [vmem:[%s5727_s6 + $0x18] sm:$0xf0] }
 0x28a   : > { %v1725_v30 = vsel %vm1722_vm4, %v1724_v29, %v1720_v28  ;;  %2287 = vmatpush.bf16.msrb.mxu1 %v4369_v12  ;;  %v4357_v27 = vor.u32 %v4994_v25, %v4356_v22  ;;  %v4992_v28 = vld [vmem:[%s5727_s6 + $0x6c] sm:$0xf]  ;;  %v4358_v29 = vld [vmem:[%s5727_s6 + $0x78] sm:$0xf0]  ;;  %v4309_v12 = vor.u32 %v4982_v10, %v4308_v9  ;;  %v4313_v17 = vor.u32 %v4980_v13, %v4310_v14  ;;  %v5042_v63 = vld [vmem:[%s5727_s6 + $0xec] sm:$0xf0] }
 0x28b   : > { %2274 = vmatpush.bf16.msrb.mxu0 %v4365_v8  ;;  %v4361_v33 = vor.u32 %v4992_v28, %v4358_v29  ;;  %v4302_v8 = vld [vmem:[%s5727_s6 + $0x10] sm:$0xf0]  ;;  %v5040_v0 = vld [vmem:[%s5727_s6 + $0xe4] sm:$0xf]  ;;  %v5041_v9 = vld [vmem:[%s5727_s6 + $0xec] sm:$0xf] }
 0x28c   : > { %2301 = vmatpush.bf16.msrb.mxu2 %v4357_v27  ;;  %v4305_v11 = vor.u32 %v4979_v3, %v4302_v8  ;;  %v4556_v10 = vld [vmem:[%s5727_s6 + $0xf8] sm:$0xf0]  ;;  %v5038_v13 = vld [vmem:[%s5727_s6 + $0xcc] sm:$0xf0]  ;;  %v5036_v14 = vld [vmem:[%s5727_s6 + $0xc4] sm:$0xf] }
 0x28d   : > { %2314 = vmatpush.bf16.msrb.mxu3 %v4361_v33 }
 0x28e   : > { %2288 = vmatpush.bf16.msrb.mxu1 %v4353_v26  ;;  %v1746_v26 = vld [vmem:[%s6226_s21 + $0x10] sm:$0xff] }
 0x28f   : > { %v5244_v54 = vpop.eup %5243  ;;  %2275 = vmatpush.bf16.msrb.mxu0 %v4349_v20 }
 0x290   : > { %v1732_v31 = vmul.f32 %v5244_v54, %v1725_v30  ;;  %v1744_v54 = vld [vmem:[%s6226_s21] sm:$0xff]  ;;  %2302 = vmatpush.bf16.msrb.mxu2 %v4341_v44 }
 0x291   : > { %2315 = vmatpush.bf16.msrb.mxu3 %v4345_v50 }
 0x292   : > { %1736 = vst [vmem:[%s1735_s16] sm:$0xff] %v1732_v31  ;;  %v1749_v32 = vpack.c.bf16 %v1732_v31, %v1732_v31  ;;  %v1745_v31 = vld [vmem:[%s6226_s21 + $0x8] sm:$0xff]  ;;  %2289 = vmatpush.bf16.msrb.mxu1 %v4337_v43  ;;  %s6404_s16 = scalar_lea.vmem [#allocation2], %s5011_s10  ;;  %s5044_s21 = sshll.u32 %s6448_s25, 5 }
 0x293   : > { %2276 = vmatpush.bf16.msrb.mxu0 %v4333_v37 }
 0x294   : > { %1950 = vmatmul.bf16.vlgmr.msra.gmra.mxu0 %v1749_v32  ;;  %1963 = vmatmul.bf16.vlgmr.msra.gmra.mxu1 %v1749_v32 }
 0x295   : > { %1976 = vmatmul.bf16.vlgmr.msra.gmra.mxu2 %v1749_v32  ;;  %1989 = vmatmul.bf16.vlgmr.msra.gmra.mxu3 %v1749_v32 }
 0x296   : > { %2290 = vmatpush.bf16.msrb.mxu1 %v4321_v56  ;;  %2303 = vmatpush.bf16.msrb.mxu2 %v4325_v62 }
 0x297   : > { %2277 = vmatpush.bf16.msrb.mxu0 %v4317_v51  ;;  %2316 = vmatpush.bf16.msrb.mxu3 %v4329_v2  ;;  %v4546_v2 = vld [vmem:[%s5727_s6 + $0xe0] sm:$0xf] }
 0x298   : > { %v4547_v3 = vor.u32 %v5042_v63, %v4546_v2 }
 0x29a   : > { %2291 = vmatpush.bf16.msrb.mxu1 %v4305_v11  ;;  %2304 = vmatpush.bf16.msrb.mxu2 %v4309_v12  ;;  %v4559_v11 = vor.u32 %v5041_v9, %v4556_v10  ;;  %v4530_v12 = vld [vmem:[%s5727_s6 + $0xc0] sm:$0xf]  ;;  %v5023_v9 = vld [vmem:[%s5727_s6 + $0x54] sm:$0xf0] }
 0x29b   : > { %2278 = vmatpush.bf16.msrb.mxu0 %v4301_v7  ;;  %2317 = vmatpush.bf16.msrb.mxu3 %v4313_v17  ;;  %v4538_v17 = vld [vmem:[%s5727_s6 + $0xc8] sm:$0xf] }
 0x29f   : > { %2600 = vmatpush.bf16.msra.mxu0 %v4547_v3  ;;  %2639 = vmatpush.bf16.msra.mxu3 %v4559_v11  ;;  %v4466_v3 = vld [vmem:[%s5727_s6 + $0x40] sm:$0xf] }
 0x311   : > { %v1951_v30 = vpop.f32.mrf.mxu0  ;;  %v1964_v32 = vpop.f32.mrf.mxu1 }
 0x312   : > { %v1994_v59 = vadd.f32 %v1951_v30, %v1744_v54  ;;  %v1995_v34 = vadd.f32 %v1964_v32, %v1745_v31 }
 0x314   : > { %v4292_v41 = vmul.f32 -1.442695, %v1994_v59  ;;  %v4293_v42 = vmul.f32 -1.442695, %v1995_v34 }
 0x316   : > { %5245 = vpow2.f32 %v4292_v41 }
 0x317   : > { %5247 = vpow2.f32 %v4293_v42 }
 0x318   : > { %v1977_v24 = vpop.f32.mrf.mxu2  ;;  %v1990_v61 = vpop.f32.mrf.mxu3 }
 0x319   : > { %v1997_v4 = vadd.f32 %v1990_v61, %v1747_v49  ;;  %v1953_v5 = vpop.f32.mrf.mxu0  ;;  %v1966_v6 = vpop.f32.mrf.mxu1  ;;  %v1996_v29 = vadd.f32 %v1977_v24, %v1746_v26  ;;  %v4514_v26 = vld [vmem:[%s5727_s6 + $0xa0] sm:$0xf] }
 0x31a   : > { %v4554_v5 = vld [vmem:[%s5727_s6 + $0xe8] sm:$0xf]  ;;  %v5043_v6 = vld [vmem:[%s5727_s6 + $0xf4] sm:$0xf0] }
 0x31b   : > { %v4294_v15 = vmul.f32 -1.442695, %v1997_v4  ;;  %v4548_v4 = vld [vmem:[%s5727_s6 + $0xf0] sm:$0xf0]  ;;  %v4555_v8 = vor.u32 %v5043_v6, %v4554_v5  ;;  %v5020_v5 = vld [vmem:[%s5727_s6 + $0x44] sm:$0xf] }
 0x31c   : > { %v5246_v16 = vpop.eup %5245  ;;  %v4551_v7 = vor.u32 %v5040_v0, %v4548_v4  ;;  %v5022_v4 = vld [vmem:[%s5727_s6 + $0x4c] sm:$0xf0] }
 0x31d   : > { %v5248_v18 = vpop.eup %5247  ;;  %v2001_v19 = vadd.f32 1.0, %v5246_v16  ;;  %5249 = vpow2.f32 %v4294_v15  ;;  %2626 = vmatpush.bf16.msra.mxu2 %v4555_v8  ;;  %v4531_v15 = vor.u32 %v5038_v13, %v4530_v12  ;;  %v4532_v16 = vld [vmem:[%s5727_s6 + $0xd0] sm:$0xf0]  ;;  %v4467_v6 = vor.u32 %v5022_v4, %v4466_v3  ;;  %v4474_v8 = vld [vmem:[%s5727_s6 + $0x48] sm:$0xf] }
 0x31e   : > { %v2020_v20 = vadd.f32 1.0, %v5248_v18  ;;  %2613 = vmatpush.bf16.msra.mxu1 %v4551_v7  ;;  %v5039_v18 = vld [vmem:[%s5727_s6 + $0xd4] sm:$0xf0]  ;;  %v4468_v7 = vld [vmem:[%s5727_s6 + $0x50] sm:$0xf0]  ;;  %v4475_v13 = vor.u32 %v5023_v9, %v4474_v8 }
 0x31f   : > { %5251 = vrcp.f32 %v2001_v19  ;;  %v2013_v59 = vand.u32 2147483648, %v2001_v19  ;;  %v2011_v60 = vand.u32 2147483647, %v2001_v19  ;;  %vm2007_vm7 = vweird.f32 %v2001_v19  ;;  %2601 = vmatpush.bf16.msra.mxu0 %v4531_v15  ;;  %v4476_v15 = vld [vmem:[%s5727_s6 + $0x58] sm:$0xf0] }
 0x320   : > { %5253 = vrcp.f32 %v2020_v20  ;;  %v1979_v21 = vpop.f32.mrf.mxu2  ;;  %v1992_v22 = vpop.f32.mrf.mxu3  ;;  %v2032_v34 = vand.u32 2147483648, %v2020_v20  ;;  %v2030_v37 = vand.u32 2147483647, %v2020_v20  ;;  %vm2026_vm8 = vweird.f32 %v2020_v20 }
 0x321   : > { %v2014_v40 = vor.u32 1.1754944e-38, %v2013_v59  ;;  %vm2012_vm11 = vcmp.eq.f32.partialorder %v2011_v60, 8.507059e+37  ;;  %v5037_v21 = vld [vmem:[%s5727_s6 + $0xcc] sm:$0xf]  ;;  %v4540_v22 = vld [vmem:[%s5727_s6 + $0xd8] sm:$0xf0]  ;;  %v4471_v12 = vor.u32 %v5020_v5, %v4468_v7 }
 0x322   : > { %v2033_v43 = vor.u32 1.1754944e-38, %v2032_v34  ;;  %vm2031_vm12 = vcmp.eq.f32.partialorder %v2030_v37, 8.507059e+37  ;;  %v5033_v59 = vld [vmem:[%s5727_s6 + $0xac] sm:$0xf]  ;;  %v4524_v34 = vld [vmem:[%s5727_s6 + $0xb8] sm:$0xf0] }
 0x323   : > { %v5250_v25 = vpop.eup %5249  ;;  %v4498_v60 = vld [vmem:[%s5727_s6 + $0x80] sm:$0xf]  ;;  %v5028_v37 = vld [vmem:[%s5727_s6 + $0x84] sm:$0xf] }
 0x324   : > { %v2040_v27 = vadd.f32 1.0, %v5250_v25  ;;  %v4543_v25 = vor.u32 %v5037_v21, %v4540_v22  ;;  %v5016_v21 = vld [vmem:[%s5727_s6 + $0x24] sm:$0xf]  ;;  %v4452_v22 = vld [vmem:[%s5727_s6 + $0x30] sm:$0xf0] }
 0x325   : > { %v5252_v28 = vpop.eup %5251 }
 0x326   : > { %v5254_v54 = vpop.eup %5253  ;;  %v2003_v30 = vmul.f32 %v5252_v28, %v2001_v19  ;;  %5255 = vrcp.f32 %v2040_v27  ;;  %vm2008_vm5 = vweird.f32 %v5252_v28  ;;  %v2052_v56 = vand.u32 2147483648, %v2040_v27  ;;  %2640 = vmatpush.bf16.msra.mxu3 %v4543_v25  ;;  %v4458_v25 = vld [vmem:[%s5727_s6 + $0x28] sm:$0xf] }
 0x327   : > { %v2022_v31 = vmul.f32 %v5254_v54, %v2020_v20  ;;  %5257 = vtanh.f32 %v1996_v29  ;;  %vm2027_vm6 = vweird.f32 %v5254_v54  ;;  %vm2009_vm9 = vmor %vm2007_vm7, %vm2008_vm5  ;;  %vm2046_vm14 = vweird.f32 %v2040_v27 }
 0x328   : > { %v2004_v32 = vsub.f32 1.0, %v2003_v30  ;;  %vm2028_vm10 = vmor %vm2026_vm8, %vm2027_vm6  ;;  %v2050_v57 = vand.u32 2147483647, %v2040_v27  ;;  %v2053_v58 = vor.u32 1.1754944e-38, %v2052_v56  ;;  %v4535_v19 = vor.u32 %v5036_v14, %v4532_v16  ;;  %v4522_v30 = vld [vmem:[%s5727_s6 + $0xa8] sm:$0xf] }
 0x329   : > { %v2023_v33 = vsub.f32 1.0, %v2022_v31  ;;  %v4539_v20 = vor.u32 %v5039_v18, %v4538_v17  ;;  %v5035_v31 = vld [vmem:[%s5727_s6 + $0xb4] sm:$0xf0]  ;;  %v5021_v14 = vld [vmem:[%s5727_s6 + $0x4c] sm:$0xf] }
 0x32a   : > { %v2005_v35 = vmul.f32 %v5252_v28, %v2004_v32  ;;  %vm2051_vm0 = vcmp.eq.f32.partialorder %v2050_v57, 8.507059e+37  ;;  %2614 = vmatpush.bf16.msra.mxu1 %v4535_v19  ;;  %v4450_v16 = vld [vmem:[%s5727_s6 + $0x20] sm:$0xf]  ;;  %v5018_v17 = vld [vmem:[%s5727_s6 + $0x2c] sm:$0xf0]  ;;  %v2076_v18 = vld [vmem:[%s6315_s26 + $0x18] sm:$0xff]  ;;  %v4479_v19 = vor.u32 %v5021_v14, %v4476_v15 }
 0x32b   : > { %v2024_v36 = vmul.f32 %v5254_v54, %v2023_v33  ;;  %2627 = vmatpush.bf16.msra.mxu2 %v4539_v20  ;;  %v4523_v33 = vor.u32 %v5035_v31, %v4522_v30  ;;  %v4451_v20 = vor.u32 %v5018_v17, %v4450_v16 }
 0x32c   : > { %v5256_v38 = vpop.eup %5255  ;;  %v2006_v39 = vadd.f32 %v5252_v28, %v2005_v35  ;;  %v4527_v35 = vor.u32 %v5033_v59, %v4524_v34  ;;  %v5014_v59 = vld [vmem:[%s5727_s6 + $0xc] sm:$0xf0]  ;;  %v5012_v34 = vld [vmem:[%s5727_s6 + $0x4] sm:$0xf] }
 0x32d   : > { %v2025_v41 = vadd.f32 %v5254_v54, %v2024_v36  ;;  %v2042_v42 = vmul.f32 %v5256_v38, %v2040_v27  ;;  %v5258_v45 = vpop.eup %5257  ;;  %vm2047_vm13 = vweird.f32 %v5256_v38  ;;  %v5034_v27 = vld [vmem:[%s5727_s6 + $0xac] sm:$0xf0] }
 0x32e   : > { %v2010_v44 = vsel %vm2009_vm9, %v5252_v28, %v2006_v39  ;;  %vm2048_vm15 = vmor %vm2046_vm14, %vm2047_vm13  ;;  %v5032_v28 = vld [vmem:[%s5727_s6 + $0xa4] sm:$0xf]  ;;  %v4515_v29 = vor.u32 %v5034_v27, %v4514_v26  ;;  %v5030_v36 = vld [vmem:[%s5727_s6 + $0x8c] sm:$0xf0]  ;;  %2641 = vmatpush.bf16.msra.mxu3 %v4527_v35  ;;  %v4455_v26 = vor.u32 %v5016_v21, %v4452_v22 }
 0x32f   : > { %v2015_v46 = vsel %vm2012_vm11, %v2014_v40, %v2010_v44  ;;  %v2029_v47 = vsel %vm2028_vm10, %v5254_v54, %v2025_v41  ;;  %v2043_v48 = vsub.f32 1.0, %v2042_v42  ;;  %v4516_v54 = vld [vmem:[%s5727_s6 + $0xb0] sm:$0xf0]  ;;  %2628 = vmatpush.bf16.msra.mxu2 %v4523_v33  ;;  %v4506_v40 = vld [vmem:[%s5727_s6 + $0x88] sm:$0xf] }
 0x330   : > { %v2034_v49 = vsel %vm2031_vm12, %v2033_v43, %v2029_v47  ;;  %v2058_v50 = vmul.f32 %v5258_v45, %v2015_v46  ;;  %v4519_v32 = vor.u32 %v5032_v28, %v4516_v54  ;;  %2602 = vmatpush.bf16.msra.mxu0 %v4515_v29  ;;  %v4500_v39 = vld [vmem:[%s5727_s6 + $0x90] sm:$0xf0]  ;;  %v5031_v41 = vld [vmem:[%s5727_s6 + $0x94] sm:$0xf0]  ;;  %v5029_v44 = vld [vmem:[%s5727_s6 + $0x8c] sm:$0xf] }
 0x331   : > { %v2057_v51 = vmul.f32 %v2034_v49, %v6168_v23  ;;  %v2044_v52 = vmul.f32 %v5256_v38, %v2043_v48  ;;  %v4503_v42 = vor.u32 %v5028_v37, %v4500_v39  ;;  %v4507_v43 = vor.u32 %v5031_v41, %v4506_v40  ;;  %v4508_v45 = vld [vmem:[%s5727_s6 + $0x98] sm:$0xf0]  ;;  %v4482_v47 = vld [vmem:[%s5727_s6 + $0x60] sm:$0xf]  ;;  %v5026_v48 = vld [vmem:[%s5727_s6 + $0x6c] sm:$0xf0] }
 0x332   : > { %2615 = vmatpush.bf16.msra.mxu1 %v4519_v32  ;;  %v4511_v46 = vor.u32 %v5029_v44, %v4508_v45  ;;  %v5024_v49 = vld [vmem:[%s5727_s6 + $0x64] sm:$0xf]  ;;  %v5019_v27 = vld [vmem:[%s5727_s6 + $0x34] sm:$0xf0]  ;;  %v5017_v28 = vld [vmem:[%s5727_s6 + $0x2c] sm:$0xf] }
 0x333   : > { %v6257_v53 = vadd.f32 %v2058_v50, %v2057_v51  ;;  %v2045_v55 = vadd.f32 %v5256_v38, %v2044_v52  ;;  %2629 = vmatpush.bf16.msra.mxu2 %v4507_v43  ;;  %v4483_v50 = vor.u32 %v5026_v48, %v4482_v47  ;;  %v4484_v51 = vld [vmem:[%s5727_s6 + $0x70] sm:$0xf0]  ;;  %v4490_v52 = vld [vmem:[%s5727_s6 + $0x68] sm:$0xf]  ;;  %v4460_v29 = vld [vmem:[%s5727_s6 + $0x38] sm:$0xf0]  ;;  %v4459_v31 = vor.u32 %v5019_v27, %v4458_v25 }
 0x334   : > { %2642 = vmatpush.bf16.msra.mxu3 %v4511_v46  ;;  %v4487_v56 = vor.u32 %v5024_v49, %v4484_v51  ;;  %v4463_v32 = vor.u32 %v5017_v28, %v4460_v29  ;;  %v4434_v33 = vld [vmem:[%s5727_s6] sm:$0xf]  ;;  %v4442_v39 = vld [vmem:[%s5727_s6 + $0x8] sm:$0xf]  ;;  %v5015_v40 = vld [vmem:[%s5727_s6 + $0x14] sm:$0xf0] }
 0x335   : > { %5259 = vtanh.f32 %v6257_v53  ;;  %v2049_v1 = vsel %vm2048_vm15, %v5256_v38, %v2045_v55  ;;  %v4499_v38 = vor.u32 %v5030_v36, %v4498_v60  ;;  %v5027_v55 = vld [vmem:[%s5727_s6 + $0x74] sm:$0xf0]  ;;  %v4435_v37 = vor.u32 %v5014_v59, %v4434_v33  ;;  %v5013_v43 = vld [vmem:[%s5727_s6 + $0xc] sm:$0xf]  ;;  %v4444_v44 = vld [vmem:[%s5727_s6 + $0x18] sm:$0xf0] }
 0x336   : > { %v2054_v24 = vsel %vm2051_vm0, %v2053_v58, %v2049_v1  ;;  %2616 = vmatpush.bf16.msra.mxu1 %v4503_v42  ;;  %v4491_v57 = vor.u32 %v5027_v55, %v4490_v52  ;;  %v5025_v1 = vld [vmem:[%s5727_s6 + $0x6c] sm:$0xf]  ;;  %v4492_v58 = vld [vmem:[%s5727_s6 + $0x78] sm:$0xf0]  ;;  %v4443_v42 = vor.u32 %v5015_v40, %v4442_v39  ;;  %v4447_v47 = vor.u32 %v5013_v43, %v4444_v44  ;;  %v5075_v33 = vld [vmem:[%s5727_s6 + $0xec] sm:$0xf0] }
 0x337   : > { %2603 = vmatpush.bf16.msra.mxu0 %v4499_v38  ;;  %v4495_v2 = vor.u32 %v5025_v1, %v4492_v58  ;;  %v4436_v38 = vld [vmem:[%s5727_s6 + $0x10] sm:$0xf0]  ;;  %v5073_v59 = vld [vmem:[%s5727_s6 + $0xe4] sm:$0xf]  ;;  %v5074_v39 = vld [vmem:[%s5727_s6 + $0xec] sm:$0xf] }
 0x338   : > { %2630 = vmatpush.bf16.msra.mxu2 %v4491_v57  ;;  %v4439_v41 = vor.u32 %v5012_v34, %v4436_v38  ;;  %v4690_v40 = vld [vmem:[%s5727_s6 + $0xf8] sm:$0xf0]  ;;  %v5071_v43 = vld [vmem:[%s5727_s6 + $0xcc] sm:$0xf0]  ;;  %v5069_v44 = vld [vmem:[%s5727_s6 + $0xc4] sm:$0xf] }
 0x339   : > { %2643 = vmatpush.bf16.msra.mxu3 %v4495_v2 }
 0x33a   : > { %2617 = vmatpush.bf16.msra.mxu1 %v4487_v56  ;;  %v2075_v56 = vld [vmem:[%s6315_s26 + $0x10] sm:$0xff] }
 0x33b   : > { %v5260_v23 = vpop.eup %5259  ;;  %2604 = vmatpush.bf16.msra.mxu0 %v4483_v50 }
 0x33c   : > { %v2061_v61 = vmul.f32 %v5260_v23, %v2054_v24  ;;  %v2073_v23 = vld [vmem:[%s6315_s26] sm:$0xff]  ;;  %2631 = vmatpush.bf16.msra.mxu2 %v4475_v13 }
 0x33d   : > { %2644 = vmatpush.bf16.msra.mxu3 %v4479_v19 }
 0x33e   : > { %2065 = vst [vmem:[%s2064_s8] sm:$0xff] %v2061_v61  ;;  %v2078_v62 = vpack.c.bf16 %v2061_v61, %v2061_v61  ;;  %v2074_v61 = vld [vmem:[%s6315_s26 + $0x8] sm:$0xff]  ;;  %2618 = vmatpush.bf16.msra.mxu1 %v4471_v12  ;;  %s6477_s8 = scalar_lea.vmem [#allocation2], %s5044_s21  ;;  %s3059_s26 = scalar_lea.vmem [#allocation2], %s5077_s15 }
 0x33f   : > { %2605 = vmatpush.bf16.msra.mxu0 %v4467_v6  ;;  %s3380_s21 = scalar_lea.vmem %s5991_s20, %s4697_s18 [#allocation11]  ;;  %s6690_s15 = sld [smem:[#allocation29_spill]] }
 0x340   : > { %2279 = vmatmul.bf16.vlgmr.msrb.gmra.mxu0 %v2078_v62  ;;  %2292 = vmatmul.bf16.vlgmr.msrb.gmra.mxu1 %v2078_v62 }
 0x341   : > { %2305 = vmatmul.bf16.vlgmr.msrb.gmra.mxu2 %v2078_v62  ;;  %2318 = vmatmul.bf16.vlgmr.msrb.gmra.mxu3 %v2078_v62 }
 0x342   : > { %2619 = vmatpush.bf16.msra.mxu1 %v4455_v26  ;;  %2632 = vmatpush.bf16.msra.mxu2 %v4459_v31 }
 0x343   : > { %2606 = vmatpush.bf16.msra.mxu0 %v4451_v20  ;;  %2645 = vmatpush.bf16.msra.mxu3 %v4463_v32  ;;  %v4680_v32 = vld [vmem:[%s5727_s6 + $0xe0] sm:$0xf] }
 0x344   : > { %v4681_v34 = vor.u32 %v5075_v33, %v4680_v32 }
 0x346   : > { %2620 = vmatpush.bf16.msra.mxu1 %v4439_v41  ;;  %2633 = vmatpush.bf16.msra.mxu2 %v4443_v42  ;;  %v4693_v41 = vor.u32 %v5074_v39, %v4690_v40  ;;  %v4664_v42 = vld [vmem:[%s5727_s6 + $0xc0] sm:$0xf]  ;;  %v5056_v39 = vld [vmem:[%s5727_s6 + $0x54] sm:$0xf0] }
 0x347   : > { %2607 = vmatpush.bf16.msra.mxu0 %v4435_v37  ;;  %2646 = vmatpush.bf16.msra.mxu3 %v4447_v47  ;;  %v4672_v47 = vld [vmem:[%s5727_s6 + $0xc8] sm:$0xf] }
 0x34b   : > { %2929 = vmatpush.bf16.msrb.mxu0 %v4681_v34  ;;  %2968 = vmatpush.bf16.msrb.mxu3 %v4693_v41  ;;  %v4600_v34 = vld [vmem:[%s5727_s6 + $0x40] sm:$0xf] }
 0x3bd   : > { %v2280_v24 = vpop.f32.mrf.mxu0  ;;  %v2293_v62 = vpop.f32.mrf.mxu1 }
 0x3be   : > { %v2323_v63 = vadd.f32 %v2280_v24, %v2073_v23  ;;  %v2324_v0 = vadd.f32 %v2293_v62, %v2074_v61 }
 0x3c0   : > { %v4426_v10 = vmul.f32 -1.442695, %v2323_v63  ;;  %v4427_v11 = vmul.f32 -1.442695, %v2324_v0 }
 0x3c2   : > { %5261 = vpow2.f32 %v4426_v10 }
 0x3c3   : > { %5263 = vpow2.f32 %v4427_v11 }
 0x3c4   : > { %v2306_v54 = vpop.f32.mrf.mxu2  ;;  %v2319_v30 = vpop.f32.mrf.mxu3 }
 0x3c5   : > { %v2326_v35 = vadd.f32 %v2319_v30, %v2076_v18  ;;  %v2282_v60 = vpop.f32.mrf.mxu0  ;;  %v2295_v36 = vpop.f32.mrf.mxu1  ;;  %v2325_v58 = vadd.f32 %v2306_v54, %v2075_v56  ;;  %v4648_v56 = vld [vmem:[%s5727_s6 + $0xa0] sm:$0xf] }
 0x3c6   : > { %v4688_v60 = vld [vmem:[%s5727_s6 + $0xe8] sm:$0xf]  ;;  %v5076_v36 = vld [vmem:[%s5727_s6 + $0xf4] sm:$0xf0] }
 0x3c7   : > { %v4428_v45 = vmul.f32 -1.442695, %v2326_v35  ;;  %v4682_v35 = vld [vmem:[%s5727_s6 + $0xf0] sm:$0xf0]  ;;  %v4689_v38 = vor.u32 %v5076_v36, %v4688_v60  ;;  %v5053_v60 = vld [vmem:[%s5727_s6 + $0x44] sm:$0xf] }
 0x3c8   : > { %v5262_v46 = vpop.eup %5261  ;;  %v4685_v37 = vor.u32 %v5073_v59, %v4682_v35  ;;  %v5055_v35 = vld [vmem:[%s5727_s6 + $0x4c] sm:$0xf0] }
 0x3c9   : > { %v5264_v48 = vpop.eup %5263  ;;  %v2330_v49 = vadd.f32 1.0, %v5262_v46  ;;  %5265 = vpow2.f32 %v4428_v45  ;;  %2955 = vmatpush.bf16.msrb.mxu2 %v4689_v38  ;;  %v4665_v45 = vor.u32 %v5071_v43, %v4664_v42  ;;  %v4666_v46 = vld [vmem:[%s5727_s6 + $0xd0] sm:$0xf0]  ;;  %v4601_v36 = vor.u32 %v5055_v35, %v4600_v34  ;;  %v4608_v38 = vld [vmem:[%s5727_s6 + $0x48] sm:$0xf] }
 0x3ca   : > { %v2349_v50 = vadd.f32 1.0, %v5264_v48  ;;  %2942 = vmatpush.bf16.msrb.mxu1 %v4685_v37  ;;  %v5072_v48 = vld [vmem:[%s5727_s6 + $0xd4] sm:$0xf0]  ;;  %v4602_v37 = vld [vmem:[%s5727_s6 + $0x50] sm:$0xf0]  ;;  %v4609_v43 = vor.u32 %v5056_v39, %v4608_v38 }
 0x3cb   : > { %5267 = vrcp.f32 %v2330_v49  ;;  %v2342_v63 = vand.u32 2147483648, %v2330_v49  ;;  %v2340_v4 = vand.u32 2147483647, %v2330_v49  ;;  %vm2336_vm3 = vweird.f32 %v2330_v49  ;;  %2930 = vmatpush.bf16.msrb.mxu0 %v4665_v45  ;;  %v4610_v45 = vld [vmem:[%s5727_s6 + $0x58] sm:$0xf0] }
 0x3cc   : > { %5269 = vrcp.f32 %v2349_v50  ;;  %v2308_v51 = vpop.f32.mrf.mxu2  ;;  %v2321_v52 = vpop.f32.mrf.mxu3  ;;  %v2361_v0 = vand.u32 2147483648, %v2349_v50  ;;  %v2359_v6 = vand.u32 2147483647, %v2349_v50  ;;  %vm2355_vm4 = vweird.f32 %v2349_v50 }
 0x3cd   : > { %v2343_v9 = vor.u32 1.1754944e-38, %v2342_v63  ;;  %vm2341_vm7 = vcmp.eq.f32.partialorder %v2340_v4, 8.507059e+37  ;;  %v5070_v51 = vld [vmem:[%s5727_s6 + $0xcc] sm:$0xf]  ;;  %v4674_v52 = vld [vmem:[%s5727_s6 + $0xd8] sm:$0xf0]  ;;  %v4605_v42 = vor.u32 %v5053_v60, %v4602_v37 }
 0x3ce   : > { %v2362_v12 = vor.u32 1.1754944e-38, %v2361_v0  ;;  %vm2360_vm8 = vcmp.eq.f32.partialorder %v2359_v6, 8.507059e+37  ;;  %v5066_v63 = vld [vmem:[%s5727_s6 + $0xac] sm:$0xf]  ;;  %v4658_v0 = vld [vmem:[%s5727_s6 + $0xb8] sm:$0xf0] }
 0x3cf   : > { %v5266_v55 = vpop.eup %5265  ;;  %v4632_v4 = vld [vmem:[%s5727_s6 + $0x80] sm:$0xf]  ;;  %v5061_v6 = vld [vmem:[%s5727_s6 + $0x84] sm:$0xf] }
 0x3d0   : > { %v2369_v57 = vadd.f32 1.0, %v5266_v55  ;;  %v4677_v55 = vor.u32 %v5070_v51, %v4674_v52  ;;  %v5049_v51 = vld [vmem:[%s5727_s6 + $0x24] sm:$0xf]  ;;  %v4586_v52 = vld [vmem:[%s5727_s6 + $0x30] sm:$0xf0] }
 0x3d1   : > { %v5268_v1 = vpop.eup %5267 }
 0x3d2   : > { %v5270_v23 = vpop.eup %5269  ;;  %v2332_v24 = vmul.f32 %v5268_v1, %v2330_v49  ;;  %5271 = vrcp.f32 %v2369_v57  ;;  %vm2337_vm1 = vweird.f32 %v5268_v1  ;;  %v2381_v26 = vand.u32 2147483648, %v2369_v57  ;;  %2969 = vmatpush.bf16.msrb.mxu3 %v4677_v55  ;;  %v4592_v55 = vld [vmem:[%s5727_s6 + $0x28] sm:$0xf] }
 0x3d3   : > { %v2351_v61 = vmul.f32 %v5270_v23, %v2349_v50  ;;  %5273 = vtanh.f32 %v2325_v58  ;;  %vm2356_vm2 = vweird.f32 %v5270_v23  ;;  %vm2338_vm5 = vmor %vm2336_vm3, %vm2337_vm1  ;;  %vm2375_vm10 = vweird.f32 %v2369_v57 }
 0x3d4   : > { %v2333_v62 = vsub.f32 1.0, %v2332_v24  ;;  %vm2357_vm6 = vmor %vm2355_vm4, %vm2356_vm2  ;;  %v2379_v27 = vand.u32 2147483647, %v2369_v57  ;;  %v2382_v29 = vor.u32 1.1754944e-38, %v2381_v26  ;;  %v4669_v49 = vor.u32 %v5069_v44, %v4666_v46  ;;  %v4656_v24 = vld [vmem:[%s5727_s6 + $0xa8] sm:$0xf] }
 0x3d5   : > { %v2352_v2 = vsub.f32 1.0, %v2351_v61  ;;  %v4673_v50 = vor.u32 %v5072_v48, %v4672_v47  ;;  %v5068_v61 = vld [vmem:[%s5727_s6 + $0xb4] sm:$0xf0]  ;;  %v5054_v44 = vld [vmem:[%s5727_s6 + $0x4c] sm:$0xf] }
 0x3d6   : > { %v2334_v3 = vmul.f32 %v5268_v1, %v2333_v62  ;;  %vm2380_vm12 = vcmp.eq.f32.partialorder %v2379_v27, 8.507059e+37  ;;  %2943 = vmatpush.bf16.msrb.mxu1 %v4669_v49  ;;  %v4584_v46 = vld [vmem:[%s5727_s6 + $0x20] sm:$0xf]  ;;  %v5051_v47 = vld [vmem:[%s5727_s6 + $0x2c] sm:$0xf0]  ;;  %v2405_v48 = vld [vmem:[%s6404_s16 + $0x18] sm:$0xff]  ;;  %v4613_v49 = vor.u32 %v5054_v44, %v4610_v45 }
 0x3d7   : > { %v2353_v5 = vmul.f32 %v5270_v23, %v2352_v2  ;;  %2956 = vmatpush.bf16.msrb.mxu2 %v4673_v50  ;;  %v4657_v2 = vor.u32 %v5068_v61, %v4656_v24  ;;  %v4585_v50 = vor.u32 %v5051_v47, %v4584_v46 }
 0x3d8   : > { %v5272_v7 = vpop.eup %5271  ;;  %v2335_v8 = vadd.f32 %v5268_v1, %v2334_v3  ;;  %v4661_v3 = vor.u32 %v5066_v63, %v4658_v0  ;;  %v5047_v63 = vld [vmem:[%s5727_s6 + $0xc] sm:$0xf0]  ;;  %v5045_v0 = vld [vmem:[%s5727_s6 + $0x4] sm:$0xf] }
 0x3d9   : > { %v2354_v10 = vadd.f32 %v5270_v23, %v2353_v5  ;;  %v2371_v11 = vmul.f32 %v5272_v7, %v2369_v57  ;;  %v5274_v14 = vpop.eup %5273  ;;  %vm2376_vm9 = vweird.f32 %v5272_v7  ;;  %v5067_v57 = vld [vmem:[%s5727_s6 + $0xac] sm:$0xf0] }
 0x3da   : > { %v2339_v13 = vsel %vm2338_vm5, %v5268_v1, %v2335_v8  ;;  %vm2377_vm11 = vmor %vm2375_vm10, %vm2376_vm9  ;;  %v5065_v1 = vld [vmem:[%s5727_s6 + $0xa4] sm:$0xf]  ;;  %v4649_v58 = vor.u32 %v5067_v57, %v4648_v56  ;;  %v5063_v5 = vld [vmem:[%s5727_s6 + $0x8c] sm:$0xf0]  ;;  %2970 = vmatpush.bf16.msrb.mxu3 %v4661_v3  ;;  %v4589_v56 = vor.u32 %v5049_v51, %v4586_v52 }
 0x3db   : > { %v2344_v15 = vsel %vm2341_vm7, %v2343_v9, %v2339_v13  ;;  %v2358_v16 = vsel %vm2357_vm6, %v5270_v23, %v2354_v10  ;;  %v2372_v17 = vsub.f32 1.0, %v2371_v11  ;;  %v4650_v23 = vld [vmem:[%s5727_s6 + $0xb0] sm:$0xf0]  ;;  %2957 = vmatpush.bf16.msrb.mxu2 %v4657_v2  ;;  %v4640_v9 = vld [vmem:[%s5727_s6 + $0x88] sm:$0xf] }
 0x3dc   : > { %v2363_v18 = vsel %vm2360_vm8, %v2362_v12, %v2358_v16  ;;  %v2387_v19 = vmul.f32 %v5274_v14, %v2344_v15  ;;  %v4653_v62 = vor.u32 %v5065_v1, %v4650_v23  ;;  %2931 = vmatpush.bf16.msrb.mxu0 %v4649_v58  ;;  %v4634_v8 = vld [vmem:[%s5727_s6 + $0x90] sm:$0xf0]  ;;  %v5064_v10 = vld [vmem:[%s5727_s6 + $0x94] sm:$0xf0]  ;;  %v5062_v13 = vld [vmem:[%s5727_s6 + $0x8c] sm:$0xf] }
 0x3dd   : > { %v2386_v20 = vmul.f32 %v2363_v18, %v6257_v53  ;;  %v2373_v21 = vmul.f32 %v5272_v7, %v2372_v17  ;;  %v4637_v11 = vor.u32 %v5061_v6, %v4634_v8  ;;  %v4641_v12 = vor.u32 %v5064_v10, %v4640_v9  ;;  %v4642_v14 = vld [vmem:[%s5727_s6 + $0x98] sm:$0xf0]  ;;  %v4616_v16 = vld [vmem:[%s5727_s6 + $0x60] sm:$0xf]  ;;  %v5059_v17 = vld [vmem:[%s5727_s6 + $0x6c] sm:$0xf0] }
 0x3de   : > { %2944 = vmatpush.bf16.msrb.mxu1 %v4653_v62  ;;  %v4645_v15 = vor.u32 %v5062_v13, %v4642_v14  ;;  %v5057_v18 = vld [vmem:[%s5727_s6 + $0x64] sm:$0xf]  ;;  %v5052_v57 = vld [vmem:[%s5727_s6 + $0x34] sm:$0xf0]  ;;  %v5050_v1 = vld [vmem:[%s5727_s6 + $0x2c] sm:$0xf] }
 0x3df   : > { %v6346_v22 = vadd.f32 %v2387_v19, %v2386_v20  ;;  %v2374_v25 = vadd.f32 %v5272_v7, %v2373_v21  ;;  %2958 = vmatpush.bf16.msrb.mxu2 %v4641_v12  ;;  %v4617_v19 = vor.u32 %v5059_v17, %v4616_v16  ;;  %v4618_v20 = vld [vmem:[%s5727_s6 + $0x70] sm:$0xf0]  ;;  %v4624_v21 = vld [vmem:[%s5727_s6 + $0x68] sm:$0xf]  ;;  %v4594_v58 = vld [vmem:[%s5727_s6 + $0x38] sm:$0xf0]  ;;  %v4593_v61 = vor.u32 %v5052_v57, %v4592_v55 }
 0x3e0   : > { %2971 = vmatpush.bf16.msrb.mxu3 %v4645_v15  ;;  %v4621_v26 = vor.u32 %v5057_v18, %v4618_v20  ;;  %v4597_v62 = vor.u32 %v5050_v1, %v4594_v58  ;;  %v4568_v2 = vld [vmem:[%s5727_s6] sm:$0xf]  ;;  %v4576_v8 = vld [vmem:[%s5727_s6 + $0x8] sm:$0xf]  ;;  %v5048_v9 = vld [vmem:[%s5727_s6 + $0x14] sm:$0xf0] }
 0x3e1   : > { %5275 = vtanh.f32 %v6346_v22  ;;  %v2378_v28 = vsel %vm2377_vm11, %v5272_v7, %v2374_v25  ;;  %v4633_v7 = vor.u32 %v5063_v5, %v4632_v4  ;;  %v5060_v25 = vld [vmem:[%s5727_s6 + $0x74] sm:$0xf0]  ;;  %v4569_v6 = vor.u32 %v5047_v63, %v4568_v2  ;;  %v5046_v12 = vld [vmem:[%s5727_s6 + $0xc] sm:$0xf]  ;;  %v4578_v13 = vld [vmem:[%s5727_s6 + $0x18] sm:$0xf0] }
 0x3e2   : > { %v2383_v54 = vsel %vm2380_vm12, %v2382_v29, %v2378_v28  ;;  %2945 = vmatpush.bf16.msrb.mxu1 %v4637_v11  ;;  %v4625_v27 = vor.u32 %v5060_v25, %v4624_v21  ;;  %v5058_v28 = vld [vmem:[%s5727_s6 + $0x6c] sm:$0xf]  ;;  %v4626_v29 = vld [vmem:[%s5727_s6 + $0x78] sm:$0xf0]  ;;  %v4577_v11 = vor.u32 %v5048_v9, %v4576_v8  ;;  %v4581_v16 = vor.u32 %v5046_v12, %v4578_v13  ;;  %v5108_v2 = vld [vmem:[%s5727_s6 + $0xec] sm:$0xf0] }
 0x3e3   : > { %2932 = vmatpush.bf16.msrb.mxu0 %v4633_v7  ;;  %v4629_v32 = vor.u32 %v5058_v28, %v4626_v29  ;;  %v4570_v7 = vld [vmem:[%s5727_s6 + $0x10] sm:$0xf0]  ;;  %v5106_v63 = vld [vmem:[%s5727_s6 + $0xe4] sm:$0xf]  ;;  %v5107_v8 = vld [vmem:[%s5727_s6 + $0xec] sm:$0xf] }
 0x3e4   : > { %2959 = vmatpush.bf16.msrb.mxu2 %v4625_v27  ;;  %v4573_v10 = vor.u32 %v5045_v0, %v4570_v7  ;;  %v4824_v9 = vld [vmem:[%s5727_s6 + $0xf8] sm:$0xf0]  ;;  %v5104_v12 = vld [vmem:[%s5727_s6 + $0xcc] sm:$0xf0]  ;;  %v5102_v13 = vld [vmem:[%s5727_s6 + $0xc4] sm:$0xf] }
 0x3e5   : > { %2972 = vmatpush.bf16.msrb.mxu3 %v4629_v32 }
 0x3e6   : > { %2946 = vmatpush.bf16.msrb.mxu1 %v4621_v26  ;;  %v2404_v26 = vld [vmem:[%s6404_s16 + $0x10] sm:$0xff] }
 0x3e7   : > { %v5276_v53 = vpop.eup %5275  ;;  %2933 = vmatpush.bf16.msrb.mxu0 %v4617_v19 }
 0x3e8   : > { %v2390_v30 = vmul.f32 %v5276_v53, %v2383_v54  ;;  %v2402_v53 = vld [vmem:[%s6404_s16] sm:$0xff]  ;;  %2960 = vmatpush.bf16.msrb.mxu2 %v4609_v43 }
 0x3e9   : > { %2973 = vmatpush.bf16.msrb.mxu3 %v4613_v49 }
 0x3ea   : > { %2394 = vst [vmem:[%s2393_s17] sm:$0xff] %v2390_v30  ;;  %v2407_v31 = vpack.c.bf16 %v2390_v30, %v2390_v30  ;;  %v2403_v30 = vld [vmem:[%s6404_s16 + $0x8] sm:$0xff]  ;;  %2947 = vmatpush.bf16.msrb.mxu1 %v4605_v42  ;;  %s4836_s17 = sshll.u32 %s5553_s30, 3  ;;  %s6689_s16 = smov %s6688_s29 }
 0x3eb   : > { %2934 = vmatpush.bf16.msrb.mxu0 %v4601_v36  ;;  %s3430_s10 = scalar_lea.hbm %s6688_s29, %s4836_s17 }
 0x3ec   : > { %2608 = vmatmul.bf16.vlgmr.msra.gmra.mxu0 %v2407_v31  ;;  %2621 = vmatmul.bf16.vlgmr.msra.gmra.mxu1 %v2407_v31 }
 0x3ed   : > { %2634 = vmatmul.bf16.vlgmr.msra.gmra.mxu2 %v2407_v31  ;;  %2647 = vmatmul.bf16.vlgmr.msra.gmra.mxu3 %v2407_v31 }
 0x3ee   : > { %2948 = vmatpush.bf16.msrb.mxu1 %v4589_v56  ;;  %2961 = vmatpush.bf16.msrb.mxu2 %v4593_v61 }
 0x3ef   : > { %2935 = vmatpush.bf16.msrb.mxu0 %v4585_v50  ;;  %2974 = vmatpush.bf16.msrb.mxu3 %v4597_v62  ;;  %v4814_v62 = vld [vmem:[%s5727_s6 + $0xe0] sm:$0xf] }
 0x3f0   : > { %v4815_v0 = vor.u32 %v5108_v2, %v4814_v62  ;;  %v4758_v62 = vld [vmem:[%s5727_s6 + $0x68] sm:$0xf]  ;;  %v5093_v2 = vld [vmem:[%s5727_s6 + $0x74] sm:$0xf0] }
 0x3f2   : > { %2949 = vmatpush.bf16.msrb.mxu1 %v4573_v10  ;;  %2962 = vmatpush.bf16.msrb.mxu2 %v4577_v11  ;;  %v4827_v10 = vor.u32 %v5107_v8, %v4824_v9  ;;  %v4798_v11 = vld [vmem:[%s5727_s6 + $0xc0] sm:$0xf] }
 0x3f3   : > { %2936 = vmatpush.bf16.msrb.mxu0 %v4569_v6  ;;  %2975 = vmatpush.bf16.msrb.mxu3 %v4581_v16  ;;  %v4806_v16 = vld [vmem:[%s5727_s6 + $0xc8] sm:$0xf] }
 0x3f7   : > { %3258 = vmatpush.bf16.msra.mxu0 %v4815_v0  ;;  %3297 = vmatpush.bf16.msra.mxu3 %v4827_v10  ;;  %v4759_v0 = vor.u32 %v5093_v2, %v4758_v62  ;;  %v5086_v10 = vld [vmem:[%s5727_s6 + $0x44] sm:$0xf] }
 0x469   : > { %v2609_v54 = vpop.f32.mrf.mxu0  ;;  %v2622_v31 = vpop.f32.mrf.mxu1 }
 0x46a   : > { %v2652_v33 = vadd.f32 %v2609_v54, %v2402_v53  ;;  %v2653_v59 = vadd.f32 %v2622_v31, %v2403_v30 }
 0x46c   : > { %v4560_v40 = vmul.f32 -1.442695, %v2652_v33  ;;  %v4561_v41 = vmul.f32 -1.442695, %v2653_v59 }
 0x46e   : > { %5277 = vpow2.f32 %v4560_v40 }
 0x46f   : > { %5279 = vpow2.f32 %v4561_v41 }
 0x470   : > { %v2635_v23 = vpop.f32.mrf.mxu2  ;;  %v2648_v24 = vpop.f32.mrf.mxu3 }
 0x471   : > { %v2655_v3 = vadd.f32 %v2648_v24, %v2405_v48  ;;  %v2611_v4 = vpop.f32.mrf.mxu0  ;;  %v2624_v5 = vpop.f32.mrf.mxu1  ;;  %v2654_v29 = vadd.f32 %v2635_v23, %v2404_v26  ;;  %v4782_v26 = vld [vmem:[%s5727_s6 + $0xa0] sm:$0xf] }
 0x472   : > { %v4822_v4 = vld [vmem:[%s5727_s6 + $0xe8] sm:$0xf]  ;;  %v5109_v5 = vld [vmem:[%s5727_s6 + $0xf4] sm:$0xf0] }
 0x473   : > { %v4562_v14 = vmul.f32 -1.442695, %v2655_v3  ;;  %v4816_v3 = vld [vmem:[%s5727_s6 + $0xf0] sm:$0xf0]  ;;  %v4823_v7 = vor.u32 %v5109_v5, %v4822_v4  ;;  %v4734_v4 = vld [vmem:[%s5727_s6 + $0x40] sm:$0xf] }
 0x474   : > { %v5278_v15 = vpop.eup %5277  ;;  %v4819_v6 = vor.u32 %v5106_v63, %v4816_v3  ;;  %v5091_v63 = vld [vmem:[%s5727_s6 + $0x6c] sm:$0xf]  ;;  %v4760_v3 = vld [vmem:[%s5727_s6 + $0x78] sm:$0xf0]  ;;  %v5088_v5 = vld [vmem:[%s5727_s6 + $0x4c] sm:$0xf0] }
 0x475   : > { %v5280_v17 = vpop.eup %5279  ;;  %v2659_v18 = vadd.f32 1.0, %v5278_v15  ;;  %5281 = vpow2.f32 %v4562_v14  ;;  %3284 = vmatpush.bf16.msra.mxu2 %v4823_v7  ;;  %v4799_v14 = vor.u32 %v5104_v12, %v4798_v11  ;;  %v4800_v15 = vld [vmem:[%s5727_s6 + $0xd0] sm:$0xf0]  ;;  %v4763_v8 = vor.u32 %v5091_v63, %v4760_v3  ;;  %v4742_v12 = vld [vmem:[%s5727_s6 + $0x48] sm:$0xf] }
 0x476   : > { %v2678_v19 = vadd.f32 1.0, %v5280_v17  ;;  %3271 = vmatpush.bf16.msra.mxu1 %v4819_v6  ;;  %v5105_v17 = vld [vmem:[%s5727_s6 + $0xd4] sm:$0xf0]  ;;  %v4735_v9 = vor.u32 %v5088_v5, %v4734_v4  ;;  %v4736_v11 = vld [vmem:[%s5727_s6 + $0x50] sm:$0xf0] }
 0x477   : > { %5283 = vrcp.f32 %v2659_v18  ;;  %v2671_v33 = vand.u32 2147483648, %v2659_v18  ;;  %v2669_v35 = vand.u32 2147483647, %v2659_v18  ;;  %vm2665_vm15 = vweird.f32 %v2659_v18  ;;  %3259 = vmatpush.bf16.msra.mxu0 %v4799_v14 }
 0x478   : > { %5285 = vrcp.f32 %v2678_v19  ;;  %v2637_v20 = vpop.f32.mrf.mxu2  ;;  %v2650_v21 = vpop.f32.mrf.mxu3  ;;  %v2690_v59 = vand.u32 2147483648, %v2678_v19  ;;  %v2688_v36 = vand.u32 2147483647, %v2678_v19  ;;  %vm2684_vm0 = vweird.f32 %v2678_v19 }
 0x479   : > { %v2672_v39 = vor.u32 1.1754944e-38, %v2671_v33  ;;  %vm2670_vm3 = vcmp.eq.f32.partialorder %v2669_v35, 8.507059e+37  ;;  %v5103_v20 = vld [vmem:[%s5727_s6 + $0xcc] sm:$0xf]  ;;  %v4808_v21 = vld [vmem:[%s5727_s6 + $0xd8] sm:$0xf0] }
 0x47a   : > { %v2691_v42 = vor.u32 1.1754944e-38, %v2690_v59  ;;  %vm2689_vm4 = vcmp.eq.f32.partialorder %v2688_v36, 8.507059e+37  ;;  %v5099_v33 = vld [vmem:[%s5727_s6 + $0xac] sm:$0xf]  ;;  %v4792_v59 = vld [vmem:[%s5727_s6 + $0xb8] sm:$0xf0] }
 0x47b   : > { %v5282_v25 = vpop.eup %5281  ;;  %v2732_v35 = vld [vmem:[%s6477_s8 + $0x8] sm:$0xff]  ;;  %v4766_v36 = vld [vmem:[%s5727_s6 + $0x80] sm:$0xf] }
 0x47c   : > { %v2698_v27 = vadd.f32 1.0, %v5282_v25  ;;  %v4811_v25 = vor.u32 %v5103_v20, %v4808_v21 }
 0x47d   : > { %v5284_v28 = vpop.eup %5283 }
 0x47e   : > { %v5286_v53 = vpop.eup %5285  ;;  %v2661_v54 = vmul.f32 %v5284_v28, %v2659_v18  ;;  %5287 = vrcp.f32 %v2698_v27  ;;  %vm2666_vm13 = vweird.f32 %v5284_v28  ;;  %v2710_v56 = vand.u32 2147483648, %v2698_v27  ;;  %3298 = vmatpush.bf16.msra.mxu3 %v4811_v25  ;;  %v4718_v25 = vld [vmem:[%s5727_s6 + $0x20] sm:$0xf] }
 0x47f   : > { %v2680_v30 = vmul.f32 %v5286_v53, %v2678_v19  ;;  %5289 = vtanh.f32 %v2654_v29  ;;  %vm2685_vm14 = vweird.f32 %v5286_v53  ;;  %vm2667_vm1 = vmor %vm2665_vm15, %vm2666_vm13  ;;  %vm2704_vm6 = vweird.f32 %v2698_v27 }
 0x480   : > { %v2662_v31 = vsub.f32 1.0, %v2661_v54  ;;  %vm2686_vm2 = vmor %vm2684_vm0, %vm2685_vm14  ;;  %v2708_v57 = vand.u32 2147483647, %v2698_v27  ;;  %v2711_v58 = vor.u32 1.1754944e-38, %v2710_v56  ;;  %v4803_v18 = vor.u32 %v5102_v13, %v4800_v15  ;;  %v4790_v54 = vld [vmem:[%s5727_s6 + $0xa8] sm:$0xf] }
 0x481   : > { %v2681_v32 = vsub.f32 1.0, %v2680_v30  ;;  %v4807_v19 = vor.u32 %v5105_v17, %v4806_v16  ;;  %v5101_v30 = vld [vmem:[%s5727_s6 + $0xb4] sm:$0xf0]  ;;  %v4739_v16 = vor.u32 %v5086_v10, %v4736_v11 }
 0x482   : > { %v2663_v34 = vmul.f32 %v5284_v28, %v2662_v31  ;;  %vm2709_vm8 = vcmp.eq.f32.partialorder %v2708_v57, 8.507059e+37  ;;  %3272 = vmatpush.bf16.msra.mxu1 %v4803_v18  ;;  %v4750_v57 = vld [vmem:[%s5727_s6 + $0x60] sm:$0xf]  ;;  %v5089_v17 = vld [vmem:[%s5727_s6 + $0x54] sm:$0xf0] }
 0x483   : > { %v2682_v60 = vmul.f32 %v5286_v53, %v2681_v32  ;;  %3285 = vmatpush.bf16.msra.mxu2 %v4807_v19  ;;  %v4791_v32 = vor.u32 %v5101_v30, %v4790_v54  ;;  %v5087_v18 = vld [vmem:[%s5727_s6 + $0x4c] sm:$0xf]  ;;  %v4744_v19 = vld [vmem:[%s5727_s6 + $0x58] sm:$0xf0]  ;;  %v4743_v20 = vor.u32 %v5089_v17, %v4742_v12 }
 0x484   : > { %v5288_v37 = vpop.eup %5287  ;;  %v2664_v38 = vadd.f32 %v5284_v28, %v2663_v34  ;;  %v2731_v34 = vld [vmem:[%s6477_s8] sm:$0xff]  ;;  %v4747_v21 = vor.u32 %v5087_v18, %v4744_v19 }
 0x485   : > { %v2683_v40 = vadd.f32 %v5286_v53, %v2682_v60  ;;  %v2700_v41 = vmul.f32 %v5288_v37, %v2698_v27  ;;  %v5290_v44 = vpop.eup %5289  ;;  %vm2705_vm5 = vweird.f32 %v5288_v37  ;;  %v5100_v27 = vld [vmem:[%s5727_s6 + $0xac] sm:$0xf0]  ;;  %v4795_v60 = vor.u32 %v5099_v33, %v4792_v59  ;;  %v5083_v33 = vld [vmem:[%s5727_s6 + $0x2c] sm:$0xf]  ;;  %v4728_v59 = vld [vmem:[%s5727_s6 + $0x38] sm:$0xf0] }
 0x486   : > { %v2668_v43 = vsel %vm2667_vm1, %v5284_v28, %v2664_v38  ;;  %vm2706_vm7 = vmor %vm2704_vm6, %vm2705_vm5  ;;  %v5098_v28 = vld [vmem:[%s5727_s6 + $0xa4] sm:$0xf]  ;;  %v4783_v29 = vor.u32 %v5100_v27, %v4782_v26  ;;  %v5084_v26 = vld [vmem:[%s5727_s6 + $0x2c] sm:$0xf0] }
 0x487   : > { %v2673_v45 = vsel %vm2670_vm3, %v2672_v39, %v2668_v43  ;;  %v2687_v46 = vsel %vm2686_vm2, %v5286_v53, %v2683_v40  ;;  %v2701_v47 = vsub.f32 1.0, %v2700_v41  ;;  %v4784_v53 = vld [vmem:[%s5727_s6 + $0xb0] sm:$0xf0]  ;;  %3286 = vmatpush.bf16.msra.mxu2 %v4791_v32  ;;  %v5094_v38 = vld [vmem:[%s5727_s6 + $0x84] sm:$0xf]  ;;  %3299 = vmatpush.bf16.msra.mxu3 %v4795_v60  ;;  %v4719_v30 = vor.u32 %v5084_v26, %v4718_v25 }
 0x488   : > { %v2692_v48 = vsel %vm2689_vm4, %v2691_v42, %v2687_v46  ;;  %v2716_v49 = vmul.f32 %v5290_v44, %v2673_v45  ;;  %v4787_v31 = vor.u32 %v5098_v28, %v4784_v53  ;;  %3260 = vmatpush.bf16.msra.mxu0 %v4783_v29  ;;  %v4768_v42 = vld [vmem:[%s5727_s6 + $0x90] sm:$0xf0]  ;;  %v4774_v43 = vld [vmem:[%s5727_s6 + $0x88] sm:$0xf]  ;;  %v5097_v44 = vld [vmem:[%s5727_s6 + $0x94] sm:$0xf0] }
 0x489   : > { %v2715_v50 = vmul.f32 %v2692_v48, %v6346_v22  ;;  %v2702_v51 = vmul.f32 %v5288_v37, %v2701_v47  ;;  %v4771_v47 = vor.u32 %v5094_v38, %v4768_v42  ;;  %v4775_v48 = vor.u32 %v5097_v44, %v4774_v43  ;;  %v5082_v27 = vld [vmem:[%s5727_s6 + $0x24] sm:$0xf]  ;;  %v4720_v29 = vld [vmem:[%s5727_s6 + $0x30] sm:$0xf0]  ;;  %v4726_v53 = vld [vmem:[%s5727_s6 + $0x28] sm:$0xf] }
 0x48a   : > { %3273 = vmatpush.bf16.msra.mxu1 %v4787_v31  ;;  %v4723_v31 = vor.u32 %v5082_v27, %v4720_v29  ;;  %v5085_v32 = vld [vmem:[%s5727_s6 + $0x34] sm:$0xf0]  ;;  %v4710_v42 = vld [vmem:[%s5727_s6 + $0x8] sm:$0xf] }
 0x48b   : > { %v6435_v52 = vadd.f32 %v2716_v49, %v2715_v50  ;;  %v2703_v55 = vadd.f32 %v5288_v37, %v2702_v51  ;;  %v5095_v49 = vld [vmem:[%s5727_s6 + $0x8c] sm:$0xf]  ;;  %v4776_v50 = vld [vmem:[%s5727_s6 + $0x98] sm:$0xf0]  ;;  %3287 = vmatpush.bf16.msra.mxu2 %v4775_v48  ;;  %v4727_v60 = vor.u32 %v5085_v32, %v4726_v53 }
 0x48c   : > { %v4779_v51 = vor.u32 %v5095_v49, %v4776_v50  ;;  %v5079_v49 = vld [vmem:[%s5727_s6 + $0xc] sm:$0xf]  ;;  %v4712_v50 = vld [vmem:[%s5727_s6 + $0x18] sm:$0xf0] }
 0x48d   : > { %5291 = vtanh.f32 %v6435_v52  ;;  %v2707_v1 = vsel %vm2706_vm7, %v5288_v37, %v2703_v55  ;;  %v5096_v37 = vld [vmem:[%s5727_s6 + $0x8c] sm:$0xf0] }
 0x48e   : > { %v2712_v22 = vsel %vm2709_vm8, %v2711_v58, %v2707_v1  ;;  %v4767_v41 = vor.u32 %v5096_v37, %v4766_v36  ;;  %3274 = vmatpush.bf16.msra.mxu1 %v4771_v47  ;;  %3300 = vmatpush.bf16.msra.mxu3 %v4779_v51  ;;  %v5092_v1 = vld [vmem:[%s5727_s6 + $0x6c] sm:$0xf0]  ;;  %v5090_v58 = vld [vmem:[%s5727_s6 + $0x64] sm:$0xf]  ;;  %v4702_v36 = vld [vmem:[%s5727_s6] sm:$0xf]  ;;  %v4715_v51 = vor.u32 %v5079_v49, %v4712_v50 }
 0x48f   : > { %3288 = vmatpush.bf16.msra.mxu2 %v4759_v0  ;;  %v5080_v37 = vld [vmem:[%s5727_s6 + $0xc] sm:$0xf0] }
 0x490   : > { %3261 = vmatpush.bf16.msra.mxu0 %v4767_v41  ;;  %v4704_v41 = vld [vmem:[%s5727_s6 + $0x10] sm:$0xf0] }
 0x492   : > { %3301 = vmatpush.bf16.msra.mxu3 %v4763_v8 }
 0x493   : > { %v5292_v23 = vpop.eup %5291  ;;  %3289 = vmatpush.bf16.msra.mxu2 %v4743_v20 }
 0x494   : > { %v2719_v24 = vmul.f32 %v5292_v23, %v2712_v22  ;;  %v4752_v23 = vld [vmem:[%s5727_s6 + $0x70] sm:$0xf0]  ;;  %v2734_v22 = vld [vmem:[%s6477_s8 + $0x18] sm:$0xff] }
 0x496   : > { %2723 = vst [vmem:[%s2722_s22] sm:$0xff] %v2719_v24  ;;  %v2736_v61 = vpack.c.bf16 %v2719_v24, %v2719_v24  ;;  %v4751_v24 = vor.u32 %v5092_v1, %v4750_v57  ;;  %3302 = vmatpush.bf16.msra.mxu3 %v4747_v21  ;;  %s5110_s22 = sshll.u32 %s5553_s30, 6 }
 0x497   : > { %3290 = vmatpush.bf16.msra.mxu2 %v4727_v60  ;;  %s3414_s29 = scalar_lea.hbm %s6691_s13, %s5110_s22 }
 0x498   : > { %2937 = vmatmul.bf16.vlgmr.msrb.gmra.mxu0 %v2736_v61  ;;  %2950 = vmatmul.bf16.vlgmr.msrb.gmra.mxu1 %v2736_v61 }
 0x499   : > { %2963 = vmatmul.bf16.vlgmr.msrb.gmra.mxu2 %v2736_v61  ;;  %2976 = vmatmul.bf16.vlgmr.msrb.gmra.mxu3 %v2736_v61  ;;  %v4755_v61 = vor.u32 %v5090_v58, %v4752_v23 }
 0x49a   : > { %3262 = vmatpush.bf16.msra.mxu0 %v4751_v24 }
 0x49b   : > { %3275 = vmatpush.bf16.msra.mxu1 %v4755_v61 }
 0x49e   : > { %3263 = vmatpush.bf16.msra.mxu0 %v4735_v9 }
 0x49f   : > { %3276 = vmatpush.bf16.msra.mxu1 %v4739_v16 }
 0x4a2   : > { %3264 = vmatpush.bf16.msra.mxu0 %v4719_v30 }
 0x4a3   : > { %3277 = vmatpush.bf16.msra.mxu1 %v4723_v31  ;;  %v3060_v31 = vld [vmem:[%s3059_s26] sm:$0xff] }
 0x515   : > { %v2938_v39 = vpop.f32.mrf.mxu0  ;;  %v2951_v40 = vpop.f32.mrf.mxu1 }
 0x516   : > { %v2981_v45 = vadd.f32 %v2938_v39, %v2731_v34  ;;  %v2982_v46 = vadd.f32 %v2951_v40, %v2732_v35  ;;  %v4731_v39 = vor.u32 %v5083_v33, %v4728_v59  ;;  %v5078_v40 = vld [vmem:[%s5727_s6 + $0x4] sm:$0xf]  ;;  %v3061_v33 = vld [vmem:[%s3059_s26 + $0x8] sm:$0xff] }
 0x517   : > { %v4707_v47 = vor.u32 %v5078_v40, %v4704_v41 }
 0x518   : > { %v4694_v55 = vmul.f32 -1.442695, %v2981_v45  ;;  %v4695_v56 = vmul.f32 -1.442695, %v2982_v46  ;;  %v4703_v45 = vor.u32 %v5080_v37, %v4702_v36  ;;  %v5081_v46 = vld [vmem:[%s5727_s6 + $0x14] sm:$0xf0]  ;;  %3303 = vmatpush.bf16.msra.mxu3 %v4731_v39  ;;  %s3051_s6 = scalar_lea.vmem %s5991_s20, %s4563_s14 [#allocation11] }
 0x519   : > { %v4711_v48 = vor.u32 %v5081_v46, %v4710_v42  ;;  %3278 = vmatpush.bf16.msra.mxu1 %v4707_v47  ;;  %s497_s14 = scalar_lea.vmem [#allocation12], %s5984_s19  ;;  %s3415_s19 = sshll.u32 %s5991_s20, 4  ;;  %s6570_s19 = int_to_ptr.vmem [resolvable:$true] %s3415_s19 }
 0x51a   : > { %5293 = vpow2.f32 %v4694_v55  ;;  %3265 = vmatpush.bf16.msra.mxu0 %v4703_v45  ;;  %s6555_s25 = sshll.u32 %s497_s14, 4  ;;  %s3433_s25 = int_to_ptr.vmem [resolvable:$true] %s6555_s25 }
 0x51b   : > { %5295 = vpow2.f32 %v4695_v56  ;;  %v2733_v56 = vld [vmem:[%s6477_s8 + $0x10] sm:$0xff]  ;;  %3291 = vmatpush.bf16.msra.mxu2 %v4711_v48  ;;  %s3434_s8 = sshll.u32 %s3430_s10, 4  ;;  %s3417_s10 = sshll.u32 %s3414_s29, 4  ;;  %s3435_s8 = int_to_ptr.hbm [resolvable:$true] %s3434_s8  ;;  %s6572_s10 = int_to_ptr.hbm [resolvable:$true] %s3417_s10 }
 0x51c   : > { %v6500_v6 = vpop.f32.mrf.mxu2  ;;  %v2977_v7 = vpop.f32.mrf.mxu3  ;;  %3304 = vmatpush.bf16.msra.mxu3 %v4715_v51  ;;  %v3062_v51 = vld [vmem:[%s3059_s26 + $0x10] sm:$0xff]  ;;  %s5429_s22 = sshra.s32 %s3435_s8, 4  ;;  %s5430_s22 = int_to_ptr.hbm [resolvable:$true] %s5429_s22 }
 0x51d   : > { %v2984_v13 = vadd.f32 %v2977_v7, %v2734_v22  ;;  %v2940_v14 = vpop.f32.mrf.mxu0  ;;  %v2953_v15 = vpop.f32.mrf.mxu1  ;;  %v2983_v58 = vadd.f32 %v6500_v6, %v2733_v56  ;;  %p5436_p10 = scmp.lt.s32.totalorder %s5430_s22, %s6689_s16 }
 0x51f   : > { %v4696_v28 = vmul.f32 -1.442695, %v2984_v13 }
 0x520   : > { %v5294_v54 = vpop.eup %5293 }
 0x521   : > { %v5296_v34 = vpop.eup %5295  ;;  %v6516_v35 = vadd.f32 1.0, %v5294_v54  ;;  %5297 = vpow2.f32 %v4696_v28 }
 0x522   : > { %v3007_v38 = vadd.f32 1.0, %v5296_v34 }
 0x523   : > { %5299 = vrcp.f32 %v6516_v35  ;;  %v3000_v2 = vand.u32 2147483648, %v6516_v35  ;;  %v2998_v3 = vand.u32 2147483647, %v6516_v35  ;;  %vm2994_vm11 = vweird.f32 %v6516_v35 }
 0x524   : > { %5301 = vrcp.f32 %v3007_v38  ;;  %v2966_v43 = vpop.f32.mrf.mxu2  ;;  %v2979_v44 = vpop.f32.mrf.mxu3  ;;  %v3019_v63 = vand.u32 2147483648, %v3007_v38  ;;  %v3017_v5 = vand.u32 2147483647, %v3007_v38  ;;  %vm3013_vm12 = vweird.f32 %v3007_v38 }
 0x525   : > { %v3001_v8 = vor.u32 1.1754944e-38, %v3000_v2  ;;  %vm2999_vm15 = vcmp.eq.f32.partialorder %v2998_v3, 8.507059e+37 }
 0x526   : > { %v3020_v11 = vor.u32 1.1754944e-38, %v3019_v63  ;;  %vm3018_vm0 = vcmp.eq.f32.partialorder %v3017_v5, 8.507059e+37 }
 0x527   : > { %v5298_v55 = vpop.eup %5297 }
 0x528   : > { %v3027_v57 = vadd.f32 1.0, %v5298_v55 }
 0x529   : > { %v5300_v1 = vpop.eup %5299 }
 0x52a   : > { %v5302_v23 = vpop.eup %5301  ;;  %v2990_v22 = vmul.f32 %v5300_v1, %v6516_v35  ;;  %5303 = vrcp.f32 %v3027_v57  ;;  %vm2995_vm9 = vweird.f32 %v5300_v1  ;;  %v3039_v26 = vand.u32 2147483648, %v3027_v57 }
 0x52b   : > { %v3009_v24 = vmul.f32 %v5302_v23, %v3007_v38  ;;  %5305 = vtanh.f32 %v2983_v58  ;;  %vm3014_vm10 = vweird.f32 %v5302_v23  ;;  %vm2996_vm13 = vmor %vm2994_vm11, %vm2995_vm9  ;;  %vm3033_vm2 = vweird.f32 %v3027_v57  ;;  %v3063_v38 = vld [vmem:[%s3059_s26 + $0x18] sm:$0xff]  ;;  %s3444_s26 = scalar_lea.hbm %s6690_s15, %s4836_s17  ;;  %s6693_s17 = sand.u32 1, %s5643_s11  }
 0x52c   : > { %v2991_v61 = vsub.f32 1.0, %v2990_v22  ;;  %vm3015_vm14 = vmor %vm3013_vm12, %vm3014_vm10  ;;  %v3037_v27 = vand.u32 2147483647, %v3027_v57  ;;  %v3040_v29 = vor.u32 1.1754944e-38, %v3039_v26  ;;  %s3448_s18 = sshll.u32 %s3444_s26, 4  ;;  %s6579_s20 = scalar_lea.sflag [#allocation13], %s6693_s17  ;;  %s6575_s18 = int_to_ptr.hbm [resolvable:$true] %s3448_s18 }
 0x52d   : > { %v3010_v62 = vsub.f32 1.0, %v3009_v24 }
 0x52e   : > { %v2992_v0 = vmul.f32 %v5300_v1, %v2991_v61  ;;  %vm3038_vm4 = vcmp.eq.f32.partialorder %v3037_v27, 8.507059e+37 }
 0x52f   : > { %v3011_v4 = vmul.f32 %v5302_v23, %v3010_v62 }
 0x530   : > { %v5304_v6 = vpop.eup %5303  ;;  %v2993_v7 = vadd.f32 %v5300_v1, %v2992_v0 }
 0x531   : > { %v3012_v9 = vadd.f32 %v5302_v23, %v3011_v4  ;;  %v3029_v10 = vmul.f32 %v5304_v6, %v3027_v57  ;;  %v5306_v13 = vpop.eup %5305  ;;  %vm3034_vm1 = vweird.f32 %v5304_v6 }
 0x532   : > { %v2997_v12 = vsel %vm2996_vm13, %v5300_v1, %v2993_v7  ;;  %vm3035_vm3 = vmor %vm3033_vm2, %vm3034_vm1 }
 0x533   : > { %v3002_v14 = vsel %vm2999_vm15, %v3001_v8, %v2997_v12  ;;  %v3016_v15 = vsel %vm3015_vm14, %v5302_v23, %v3012_v9  ;;  %v3030_v16 = vsub.f32 1.0, %v3029_v10 }
 0x534   : > { %v3021_v17 = vsel %vm3018_vm0, %v3020_v11, %v3016_v15  ;;  %v3045_v18 = vmul.f32 %v5306_v13, %v3002_v14 }
 0x535   : > { %v3044_v19 = vmul.f32 %v3021_v17, %v6435_v52  ;;  %v3031_v20 = vmul.f32 %v5304_v6, %v3030_v16 }
 0x537   : > { %v6534_v21 = vadd.f32 %v3045_v18, %v3044_v19  ;;  %v3032_v25 = vadd.f32 %v5304_v6, %v3031_v20 }
 0x539   : > { %5307 = vtanh.f32 %v6534_v21  ;;  %v3036_v28 = vsel %vm3035_vm3, %v5304_v6, %v3032_v25 }
 0x53a   : > { %v3041_v54 = vsel %vm3038_vm4, %v3040_v29, %v3036_v28 }
 0x53f   : > { %v5308_v53 = vpop.eup %5307 }
 0x540   : > { %v3048_v52 = vmul.f32 %v5308_v53, %v3041_v54 }
 0x542   : > { %3052 = vst [vmem:[%s3051_s6] sm:$0xff] %v3048_v52  ;;  %v3065_v30 = vpack.c.bf16 %v3048_v52, %v3048_v52  ;;  %s5431_s6 = scalar_lea.hbm %s5430_s22, 8 }
 0x543   : > { %p5432_p6 = scmp.ne.s32.totalorder %s5430_s22, %s5431_s6 }
 0x544   : > { %3266 = vmatmul.bf16.vlgmr.msra.gmra.mxu0 %v3065_v30  ;;  %3279 = vmatmul.bf16.vlgmr.msra.gmra.mxu1 %v3065_v30 }
 0x545   : > { %3292 = vmatmul.bf16.vlgmr.msra.gmra.mxu2 %v3065_v30  ;;  %3305 = vmatmul.bf16.vlgmr.msra.gmra.mxu3 %v3065_v30  ;;  %p5433_p7 = pnand %p5432_p6, %p5667_p9 }
 0x547   : > { %p5434_p8 = pneg %p5433_p7 }
 0x5c1   : > { %v3267_v32 = vpop.f32.mrf.mxu0  ;;  %v3280_v59 = vpop.f32.mrf.mxu1 }
 0x5c2   : > { %v3310_v34 = vadd.f32 %v3267_v32, %v3060_v31  ;;  %v3311_v35 = vadd.f32 %v3280_v59, %v3061_v33 }
 0x5c4   : > { %v4828_v60 = vmul.f32 -1.442695, %v3310_v34  ;;  %v4829_v36 = vmul.f32 -1.442695, %v3311_v35 }
 0x5c6   : > { %5309 = vpow2.f32 %v4828_v60 }
 0x5c7   : > { %5311 = vpow2.f32 %v4829_v36 }
 0x5c8   : > { %v3293_v37 = vpop.f32.mrf.mxu2  ;;  %v3306_v39 = vpop.f32.mrf.mxu3 }
 0x5c9   : > { %v3313_v40 = vadd.f32 %v3306_v39, %v3063_v38  ;;  %v3269_v41 = vpop.f32.mrf.mxu0  ;;  %v3282_v42 = vpop.f32.mrf.mxu1  ;;  %v3312_v57 = vadd.f32 %v3293_v37, %v3062_v51 }
 0x5cb   : > { %v4830_v43 = vmul.f32 -1.442695, %v3313_v40 }
 0x5cc   : > { %v5310_v44 = vpop.eup %5309 }
 0x5cd   : > { %v5312_v45 = vpop.eup %5311  ;;  %v3317_v46 = vadd.f32 1.0, %v5310_v44  ;;  %5313 = vpow2.f32 %v4830_v43 }
 0x5ce   : > { %v3336_v47 = vadd.f32 1.0, %v5312_v45 }
 0x5cf   : > { %5315 = vrcp.f32 %v3317_v46  ;;  %v3329_v61 = vand.u32 2147483648, %v3317_v46  ;;  %v3327_v63 = vand.u32 2147483647, %v3317_v46  ;;  %vm3323_vm7 = vweird.f32 %v3317_v46 }
 0x5d0   : > { %5317 = vrcp.f32 %v3336_v47  ;;  %v3295_v48 = vpop.f32.mrf.mxu2  ;;  %v3308_v49 = vpop.f32.mrf.mxu3  ;;  %v3348_v62 = vand.u32 2147483648, %v3336_v47  ;;  %v3346_v3 = vand.u32 2147483647, %v3336_v47  ;;  %vm3342_vm8 = vweird.f32 %v3336_v47 }
 0x5d1   : > { %v3330_v6 = vor.u32 1.1754944e-38, %v3329_v61  ;;  %vm3328_vm11 = vcmp.eq.f32.partialorder %v3327_v63, 8.507059e+37 }
 0x5d2   : > { %v3349_v9 = vor.u32 1.1754944e-38, %v3348_v62  ;;  %vm3347_vm12 = vcmp.eq.f32.partialorder %v3346_v3, 8.507059e+37 }
 0x5d3   : > { %v5314_v50 = vpop.eup %5313 }
 0x5d4   : > { %v3356_v55 = vadd.f32 1.0, %v5314_v50 }
 0x5d5   : > { %v5316_v56 = vpop.eup %5315 }
 0x5d6   : > { %v5318_v1 = vpop.eup %5317  ;;  %v3319_v58 = vmul.f32 %v5316_v56, %v3317_v46  ;;  %5319 = vrcp.f32 %v3356_v55  ;;  %vm3324_vm5 = vweird.f32 %v5316_v56  ;;  %v3368_v25 = vand.u32 2147483648, %v3356_v55 }
 0x5d7   : > { %v3338_v23 = vmul.f32 %v5318_v1, %v3336_v47  ;;  %5321 = vtanh.f32 %v3312_v57  ;;  %vm3343_vm6 = vweird.f32 %v5318_v1  ;;  %vm3325_vm9 = vmor %vm3323_vm7, %vm3324_vm5  ;;  %vm3362_vm14 = vweird.f32 %v3356_v55 }
 0x5d8   : > { %v3320_v22 = vsub.f32 1.0, %v3319_v58  ;;  %vm3344_vm10 = vmor %vm3342_vm8, %vm3343_vm6  ;;  %v3366_v26 = vand.u32 2147483647, %v3356_v55  ;;  %v3369_v27 = vor.u32 1.1754944e-38, %v3368_v25 }
 0x5d9   : > { %v3339_v24 = vsub.f32 1.0, %v3338_v23 }
 0x5da   : > { %v3321_v2 = vmul.f32 %v5316_v56, %v3320_v22  ;;  %vm3367_vm0 = vcmp.eq.f32.partialorder %v3366_v26, 8.507059e+37 }
 0x5db   : > { %v3340_v0 = vmul.f32 %v5318_v1, %v3339_v24 }
 0x5dc   : > { %v5320_v4 = vpop.eup %5319  ;;  %v3322_v5 = vadd.f32 %v5316_v56, %v3321_v2 }
 0x5dd   : > { %v3341_v7 = vadd.f32 %v5318_v1, %v3340_v0  ;;  %v3358_v8 = vmul.f32 %v5320_v4, %v3356_v55  ;;  %v5322_v11 = vpop.eup %5321  ;;  %vm3363_vm13 = vweird.f32 %v5320_v4 }
 0x5de   : > { %v3326_v10 = vsel %vm3325_vm9, %v5316_v56, %v3322_v5  ;;  %vm3364_vm15 = vmor %vm3362_vm14, %vm3363_vm13 }
 0x5df   : > { %v3331_v12 = vsel %vm3328_vm11, %v3330_v6, %v3326_v10  ;;  %v3345_v13 = vsel %vm3344_vm10, %v5318_v1, %v3341_v7  ;;  %v3359_v14 = vsub.f32 1.0, %v3358_v8 }
 0x5e0   : > { %v3350_v15 = vsel %vm3347_vm12, %v3349_v9, %v3345_v13  ;;  %v3374_v16 = vmul.f32 %v5322_v11, %v3331_v12 }
 0x5e1   : > { %v3373_v17 = vmul.f32 %v3350_v15, %v6534_v21  ;;  %v3360_v18 = vmul.f32 %v5320_v4, %v3359_v14 }
 0x5e3   : > { %v3375_v19 = vadd.f32 %v3374_v16, %v3373_v17  ;;  %v3361_v20 = vadd.f32 %v5320_v4, %v3360_v18 }
 0x5e5   : > { %5323 = vtanh.f32 %v3375_v19  ;;  %3385 = vst [vmem:[%s504_s12] sm:$0xff] %v3375_v19  ;;  %v3365_v21 = vsel %vm3364_vm15, %v5320_v4, %v3361_v20 }
 0x5e6   : > { %v3370_v29 = vsel %vm3367_vm0, %v3369_v27, %v3365_v21 }
 0x5eb   : > { %v5324_v28 = vpop.eup %5323 }
 0x5ec   : > { %v3377_v53 = vmul.f32 %v5324_v28, %v3370_v29 }
 0x5ee   : > { %3381 = vst [vmem:[%s3380_s21] sm:$0xff] %v3377_v53  ;;  %s5435_s21 = scalar_lea.hbm %s6689_s16, 16 }
 0x5ef   : > { %3383 = vst [vmem:[%s497_s14] sm:$0xff] %v3377_v53  ;;  %p5437_p13 = scmp.lt.s32.totalorder %s5435_s21, %s5431_s6 }
 0x5f1   : > { %p5438_p0 = por %p5437_p13, %p5436_p10 }
 0x5f3   : > { %p5439_p1 = pnand %p5438_p0, %p5434_p8 }
 0x5f5   : > { %5442 = shalt.err (!%p5439_p1)
}
 0x5f6   : > { %5118 = dma.vmem_to_hbm [thread:$0]  (%p5667_p9), %s3433_s25, 128, %s3435_s8, %s6579_s20  }
 0x5f7   : > { %s3387_s11 = scalar_lea.sflag [#allocation7], %s5723_s3  ;;  %s5457_s14 = sshra.s32 %s6572_s10, 4  ;;  %s5458_s14 = int_to_ptr.hbm [resolvable:$true] %s5457_s14 }
 0x5f8   : > { %s5459_s30 = scalar_lea.hbm %s5458_s14, 64  ;;  %s5463_s22 = scalar_lea.hbm %s6691_s13, 128 }
 0x5f9   : > { %p5460_p2 = scmp.ne.s32.totalorder %s5458_s14, %s5459_s30  ;;  %p5464_p5 = scmp.lt.s32.totalorder %s5458_s14, %s6691_s13 }
 0x5fa   : > { %p5465_p6 = scmp.lt.s32.totalorder %s5463_s22, %s5459_s30 }
 0x5fb   : > { %p5461_p3 = pnand %p5460_p2, %p5667_p9 }
 0x5fc   : > { %p5466_p7 = por %p5465_p6, %p5464_p5 }
 0x5fd   : > { %p5462_p4 = pneg %p5461_p3 }
 0x5ff   : > { %p5467_p8 = pnand %p5466_p7, %p5462_p4 }
 0x601   : > { %5470 = shalt.err (!%p5467_p8)
}
 0x602   : > { %s5565_s3 = smov 128   ;;  %s5566_s25 = smov 8  }
 0x603   : > { %5117 = dma.vmem_to_hbm [thread:$0]  (%p5667_p9), %s6570_s19, 1024, %s6572_s10, %s3387_s11, %s5565_s3, %s5565_s3, %s5566_s25  }
 0x604   : > { %s5485_s8 = sshra.s32 %s6575_s18, 4  ;;  %s5491_s23 = scalar_lea.hbm %s6690_s15, 16  ;;  %s5486_s8 = int_to_ptr.hbm [resolvable:$true] %s5485_s8 }
 0x605   : > { %s5487_s24 = scalar_lea.hbm %s5486_s8, 8  ;;  %p5492_p1 = scmp.lt.s32.totalorder %s5486_s8, %s6690_s15 }
 0x606   : > { %p5488_p10 = scmp.ne.s32.totalorder %s5486_s8, %s5487_s24  ;;  %p5493_p2 = scmp.lt.s32.totalorder %s5491_s23, %s5487_s24 }
 0x608   : > { %p5489_p13 = pnand %p5488_p10, %p5667_p9  ;;  %p5494_p3 = por %p5493_p2, %p5492_p1 }
 0x60a   : > { %p5490_p0 = pneg %p5489_p13 }
 0x60c   : > { %p5495_p4 = pnand %p5494_p3, %p5490_p0 }
 0x60e   : > { %5498 = shalt.err (!%p5495_p4)
}
 0x60f   : > { %5119 = dma.vmem_to_hbm [thread:$0]  (%p5667_p9), %s3447_s7, 128, %s6575_s18, %s6579_s20  }
 0x610 PF: > { %s6694_s19 = sld [smem:[#allocation19_spill]]  ;;  %p5134_p5 = pnand %p3708_p12, %p5676_p11 }
 0x611   : > { %s6696_s11 = sld [smem:[#allocation21_spill]] }
 0x612   : > { %p5135_p6 = pneg %p5134_p5 }
 0x616   : > { %s3460_s29 = sand.u32 1, %s6694_s19  }
 0x617   : > { %s3461_s17 = scalar_lea.sflag [#allocation7], %s3460_s29 }
 0x618   : > { %5532 = dma.done.wait (%p5135_p6), %s3461_s17, 1024  }
 0x619   : > { %5534 = vsyncadd (%p5135_p6), %s3461_s17, 4294966272  ;;  %s6697_s22 = sadd.s32 4294967294, %s6696_s11  }
 0x61a   : > { %s3470_s27 = sand.u32 1, %s6697_s22  }
 0x61b   : > { %s3471_s6 = scalar_lea.sflag [#allocation13], %s3470_s27 }
 0x61c   : > { %5536 = dma.done.wait (%p5135_p6), %s3471_s6, 256  }
 0x61d   : > { %5538 = vsyncadd (%p5135_p6), %s3471_s6, 4294967040  ;;  %s31_s10 = sadd.s32 1, %s6696_s11   ;;  %s6698_s7 = sld [smem:[#allocation20_spill]] }
 0x61e   : > { %p28_p9 = scmp.ge.s32.totalorder %s31_s10, 4   ;;  %s6699_s29 = sld [smem:[#allocation24_spill]] }
 0x61f   : > { %s6700_s18 = sld [smem:[#allocation22_spill]]  ;;  %s6701_s27 = smov %s5545_s28 }
 0x620   : > { %s6703_s30 = smov %s5557_s9 }
 0x621   :  { %30 = sbr.rel (!%p28_p9) target bundleno = 15 (0xf), region = 174 }
 0x623   : > { %s6702_s28 = smov %s6698_s7 }
 0x625   : > { %s6704_s9 = smov %s6700_s18 }
 0x626   :  { %3487 = vsyncpa [#allocation6], 1 }
 0x627   :  { %3489 = vsyncpa [#allocation6 + $0x1], 1 }
 0x628   :  { %3490 = vsyncpa [#allocation9], 1 }
 0x629   :  { %3492 = vsyncpa [#allocation9 + $0x1], 1 }
 0x62a   :  { %3493 = vsyncpa [#allocation7], 1 }
 0x62b   :  { %3495 = vsyncpa [#allocation7 + $0x1], 1 }
 0x62c   :  { %3496 = vsyncpa [#allocation13], 1 }
 0x62d   :  { %3498 = vsyncpa [#allocation13 + $0x1], 1 }

</bundles_post_ra>
